<compile_context>
chip_gen: v5e
topology: v5e:2x2
jax: 0.10.0
libtpu: 0.0.40
codegen_flags: <defaults>
</compile_context>

<pallas_src>
import functools

import jax
import jax.numpy as jnp
import numpy as np
from jax.experimental import pallas as pl
from jax.experimental.pallas import tpu as pltpu


def _make_cbam_kernel(C, H, W, HID, K, use_mxu):
    PAD = K // 2
    KK = K * K
    HW = H * W
    INV_HW = 1.0 / float(HW)
    INV_C = 1.0 / float(C)

    def kernel(x_ref, w1_ref, w2_ref, conv_ref, rowm_ref, colm_ref, o_ref):
        x = x_ref[...].astype(jnp.float32)               # (BT, C, HW)
        w1 = w1_ref[...]                                 # (HID, C)
        w2 = w2_ref[...]                                 # (C, HID)
        row_mask = rowm_ref[...]                         # (K, HW)
        col_mask = colm_ref[...]                         # (K, HW)

        # ---------------- channel attention ----------------
        # TODO(synk): if vector-load becomes the saturated slot at large
        # blocks, fuse each (sum, max) pair into one chunked pass over the data.
        avg_c = jnp.sum(x, axis=-1) * INV_HW             # (BT, C)
        max_c = jnp.max(x, axis=-1)                      # (BT, C)

        def shared_mlp(v):                               # (BT, C) -> (BT, C)
            if use_mxu:
                # MXU: contract last dims (v @ w1.T, h @ w2.T) with f32 accum.
                h = jax.lax.dot_general(
                    v, w1, (((1,), (1,)), ((), ())),
                    preferred_element_type=jnp.float32)            # (BT, HID)
                h = jnp.maximum(h, 0.0)
                return jax.lax.dot_general(
                    h, w2, (((1,), (1,)), ((), ())),
                    preferred_element_type=jnp.float32)            # (BT, C)
            # Tiny-C fallback: lane-dense broadcast-multiply-reduce on the VPU.
            h = jnp.sum(v[:, None, :] * w1[None, :, :], axis=-1)    # (BT, HID)
            h = jnp.maximum(h, 0.0)
            return jnp.sum(h[:, None, :] * w2[None, :, :], axis=-1)  # (BT, C)

        ca = jax.nn.sigmoid(shared_mlp(avg_c) + shared_mlp(max_c))  # (BT, C)
        y = x * ca[:, :, None]                           # channel-gated (BT, C, HW)

        # ---------------- spatial attention -----------------
        avg_s = jnp.sum(y, axis=1) * INV_C               # (BT, HW)
        max_s = jnp.max(y, axis=1)                       # (BT, HW)
        pooled = jnp.stack([avg_s, max_s], axis=0)       # (2, BT, HW)

        def shift_flat(v, s):
            # u[..., f] = v[..., (f + s) mod HW]  (lane rotation on the XLU)
            amt = (-s) % HW
            if amt == 0:
                return v
            return pltpu.roll(v, shift=amt, axis=v.ndim - 1)

        def tree_sum(terms):
            terms = list(terms)
            while len(terms) > 1:
                nxt = [a + b for a, b in zip(terms[0::2], terms[1::2])]
                if len(terms) % 2:
                    nxt.append(terms[-1])
                terms = nxt
            return terms[0]

        # 7x7 conv, 2 in-channels -> 1 out-channel, zero 'same' padding.
        # Stage 1: 7 row rolls applied once to the stacked (avg, max) pair.
        r_avg = []
        r_max = []
        for di in range(K):
            shifted = shift_flat(pooled, (di - PAD) * W)           # (2, BT, HW)
            masked = row_mask[di:di + 1, :] * shifted              # (2, BT, HW)
            r_avg.append(masked[0])                                # (BT, HW)
            r_max.append(masked[1])                                # (BT, HW)

        # Stage 2: per column offset, reduce over BOTH input channels first,
        # then apply a single masked column roll (7 rolls total).
        contribs = []
        for dj in range(K):
            s = tree_sum([conv_ref[di * K + dj] * r_avg[di]
                          + conv_ref[KK + di * K + dj] * r_max[di]
                          for di in range(K)])
            contribs.append(col_mask[dj:dj + 1, :] * shift_flat(s, dj - PAD))
        attn = jax.nn.sigmoid(tree_sum(contribs))        # (BT, HW)

        o_ref[...] = (y * attn[:, None, :]).astype(o_ref.dtype)

    return kernel


@functools.partial(jax.jit, static_argnames=("kernel_size",))
def cbam_pallas(x, w1, w2, conv_w, *, kernel_size=7):
    """x: (B, C, H, W). w1: (HID, C), w2: (C, HID), conv_w: (1, 2, K, K)."""
    B, C, H, W = x.shape
    HID = w1.shape[0]
    K = kernel_size
    PAD = K // 2
    HW = H * W

    # lane-dense relayout of the main tensor; keep its dtype (no upcast pass)
    x_flat = x.reshape(B, C, HW)
    w1f = w1.astype(jnp.float32)                         # (HID, C)
    w2f = w2.astype(jnp.float32)                         # (C, HID)
    conv_flat = conv_w.reshape(-1).astype(jnp.float32)   # (2*K*K,) scalars -> SMEM

    # Loop-invariant zero-padding masks for the 'same' conv, precomputed on the
    # host; they ride in as small VMEM-resident inputs with a constant index_map.
    rows = np.arange(HW, dtype=np.int64) // W
    cols = np.arange(HW, dtype=np.int64) % W
    row_mask = np.stack(
        [((rows + (d - PAD) >= 0) & (rows + (d - PAD) < H)) for d in range(K)]
    ).astype(np.float32)                                 # (K, HW)
    col_mask = np.stack(
        [((cols + (d - PAD) >= 0) & (cols + (d - PAD) < W)) for d in range(K)]
    ).astype(np.float32)                                 # (K, HW)

    # ---- block sizing: fill VMEM; keep >=2 grid steps on small-VMEM parts ----
    try:
        vmem_cap = int(pltpu.get_tpu_info().vmem_capacity_bytes)
    except Exception:
        vmem_cap = 64 << 20                              # conservative fallback
    small_vmem = vmem_cap <= (64 << 20)                  # v7x-like
    block_budget = (7 << 20) if small_vmem else (14 << 20)
    f32_sample = C * HW * 4                              # dominant f32 working set
    target_steps = 2 if (small_vmem and B >= 2) else 1   # feed both v7x TCs
    bt = 1
    for cand in range(max(1, B // target_steps), 0, -1):
        if B % cand == 0 and cand * f32_sample <= block_budget:
            bt = cand
            break
    # TODO(synk): for production shapes where a single (C, H*W) sample exceeds
    # the budget (e.g. C=512, H=W=56 on v7x), add a C-tiling grid axis with the
    # channel pools carried as cross-step accumulators instead of bt=1 fallback.
    grid = (B // bt,)

    block_f32 = bt * f32_sample
    vmem_cap_limit = (48 << 20) if small_vmem else (100 << 20)
    vmem_limit = int(min(vmem_cap_limit, max(32 << 20, 7 * block_f32)))

    use_mxu = (C >= 128 and HID >= 8)
    kernel = _make_cbam_kernel(C, H, W, HID, K, use_mxu)

    out_flat = pl.pallas_call(
        kernel,
        out_shape=jax.ShapeDtypeStruct((B, C, HW), x.dtype),
        grid_spec=pltpu.PrefetchScalarGridSpec(
            num_scalar_prefetch=0,
            grid=grid,
            in_specs=[
                pl.BlockSpec((bt, C, HW), lambda b: (b, 0, 0)),
                pl.BlockSpec((HID, C), lambda b: (0, 0)),
                pl.BlockSpec((C, HID), lambda b: (0, 0)),
                pl.BlockSpec(memory_space=pltpu.MemorySpace.SMEM),
                pl.BlockSpec((K, HW), lambda b: (0, 0)),
                pl.BlockSpec((K, HW), lambda b: (0, 0)),
            ],
            out_specs=pl.BlockSpec((bt, C, HW), lambda b: (b, 0, 0)),
        ),
        compiler_params=pltpu.CompilerParams(
            dimension_semantics=("parallel",),
            vmem_limit_bytes=vmem_limit,
        ),
    )(x_flat, w1f, w2f, conv_flat, jnp.asarray(row_mask), jnp.asarray(col_mask))

    return out_flat.reshape(B, C, H, W)


def cbam_reference(x, w1, w2, conv_w, kernel_size=7):
    """Pure-JAX reference mirroring the PyTorch module."""
    pad = kernel_size // 2
    avg = x.mean(axis=(2, 3))                               # (B, C)
    mx = x.max(axis=(2, 3))                                 # (B, C)

    def mlp(v):
        return jnp.maximum(v @ w1.T, 0.0) @ w2.T

    scale = jax.nn.sigmoid(mlp(avg) + mlp(mx))[:, :, None, None]
    y = x * scale

    avg_s = y.mean(axis=1, keepdims=True)
    max_s = y.max(axis=1, keepdims=True)
    cat = jnp.concatenate([avg_s, max_s], axis=1)           # (B, 2, H, W)
    attn = jax.lax.conv_general_dilated(
        cat, conv_w, window_strides=(1, 1),
        padding=((pad, pad), (pad, pad)),
        dimension_numbers=("NCHW", "OIHW", "NCHW"))
    return y * jax.nn.sigmoid(attn)


if __name__ == "__main__":
    B, C, H, W = 2, 32, 16, 16     # channels=32, reduction=16 -> hidden=2
    RED, K = 16, 7
    HID = C // RED

    key = jax.random.PRNGKey(0)
    k1, k2, k3, k4 = jax.random.split(key, 4)
    w1 = jax.random.normal(k1, (HID, C), jnp.float32) * 0.1   # Linear(C -> HID).weight
    w2 = jax.random.normal(k2, (C, HID), jnp.float32) * 0.1   # Linear(HID -> C).weight
    conv_w = jax.random.normal(k3, (1, 2, K, K), jnp.float32) * 0.1
    x = jax.random.normal(k4, (B, C, H, W), jnp.float32)

    out = cbam_pallas(x, w1, w2, conv_w, kernel_size=K)
    out = jax.block_until_ready(out)

    ref = cbam_reference(x, w1, w2, conv_w, kernel_size=K)
    np.testing.assert_allclose(np.asarray(out), np.asarray(ref),
                               rtol=1e-4, atol=1e-4)

    print("KERNEL_OK")
</pallas_src>

<mosaic_0001>
module attributes {stable_mosaic.version = 11 : i64} {
  func.func @kernel(%arg0: i32, %arg1: memref<1x32x256xf32, #tpu.memory_space<vmem>>, %arg2: memref<2x32xf32, #tpu.memory_space<vmem>>, %arg3: memref<32x2xf32, #tpu.memory_space<vmem>>, %arg4: memref<98xf32, #tpu.memory_space<smem>>, %arg5: memref<7x256xf32, #tpu.memory_space<vmem>>, %arg6: memref<7x256xf32, #tpu.memory_space<vmem>>, %arg7: memref<1x32x256xf32, #tpu.memory_space<vmem>>) attributes {dimension_semantics = [#tpu.dimension_semantics<parallel>], iteration_bounds = array<i64: 2>, scalar_prefetch = 0 : i64, scratch_operands = 0 : i64, tpu.core_type = #tpu.core_type<tc>, window_params = [{transform_indices = @transform_0, window_bounds = array<i64: 1, 32, 256>}, {pipeline_mode = #tpu.pipeline_mode<synchronous>, transform_indices = @transform_1, window_bounds = array<i64: 2, 32>}, {pipeline_mode = #tpu.pipeline_mode<synchronous>, transform_indices = @transform_2, window_bounds = array<i64: 32, 2>}, {transform_indices = @transform_3, window_bounds = array<i64: 98>}, {pipeline_mode = #tpu.pipeline_mode<synchronous>, transform_indices = @transform_4, window_bounds = array<i64: 7, 256>}, {pipeline_mode = #tpu.pipeline_mode<synchronous>, transform_indices = @transform_5, window_bounds = array<i64: 7, 256>}, {transform_indices = @transform_6, window_bounds = array<i64: 1, 32, 256>}]} {
    %c0 = arith.constant 0 : index
    %c0_0 = arith.constant 0 : index
    %c0_1 = arith.constant 0 : index
    %0 = vector.load %arg1[%c0, %c0_0, %c0_1] : memref<1x32x256xf32, #tpu.memory_space<vmem>>, vector<1x32x256xf32>
    %c0_2 = arith.constant 0 : index
    %c0_3 = arith.constant 0 : index
    %1 = vector.load %arg2[%c0_2, %c0_3] : memref<2x32xf32, #tpu.memory_space<vmem>>, vector<2x32xf32>
    %c0_4 = arith.constant 0 : index
    %c0_5 = arith.constant 0 : index
    %2 = vector.load %arg3[%c0_4, %c0_5] : memref<32x2xf32, #tpu.memory_space<vmem>>, vector<32x2xf32>
    %c0_6 = arith.constant 0 : index
    %c0_7 = arith.constant 0 : index
    %3 = vector.load %arg5[%c0_6, %c0_7] : memref<7x256xf32, #tpu.memory_space<vmem>>, vector<7x256xf32>
    %c0_8 = arith.constant 0 : index
    %c0_9 = arith.constant 0 : index
    %4 = vector.load %arg6[%c0_8, %c0_9] : memref<7x256xf32, #tpu.memory_space<vmem>>, vector<7x256xf32>
    %cst = arith.constant dense<0.000000e+00> : vector<1x32xf32>
    %5 = vector.multi_reduction <add>, %0, %cst [2] : vector<1x32x256xf32> to vector<1x32xf32>
    %cst_10 = arith.constant 3.906250e-03 : f32
    %6 = vector.broadcast %cst_10 : f32 to vector<1x32xf32>
    %7 = arith.mulf %5, %6 : vector<1x32xf32>
    %cst_11 = arith.constant dense<0xFF800000> : vector<1x32xf32>
    %8 = vector.multi_reduction <maximumf>, %0, %cst_11 [2] : vector<1x32x256xf32> to vector<1x32xf32>
    %9 = vector.shape_cast %7 : vector<1x32xf32> to vector<1x1x32xf32>
    %10 = vector.shape_cast %1 : vector<2x32xf32> to vector<1x2x32xf32>
    %11 = vector.broadcast %9 : vector<1x1x32xf32> to vector<1x2x32xf32>
    %12 = arith.mulf %11, %10 : vector<1x2x32xf32>
    %cst_12 = arith.constant dense<0.000000e+00> : vector<1x2xf32>
    %13 = vector.multi_reduction <add>, %12, %cst_12 [2] : vector<1x2x32xf32> to vector<1x2xf32>
    %cst_13 = arith.constant 0.000000e+00 : f32
    %14 = vector.broadcast %cst_13 : f32 to vector<1x2xf32>
    %15 = arith.maximumf %13, %14 : vector<1x2xf32>
    %16 = vector.shape_cast %15 : vector<1x2xf32> to vector<1x1x2xf32>
    %17 = vector.shape_cast %2 : vector<32x2xf32> to vector<1x32x2xf32>
    %18 = vector.broadcast %16 : vector<1x1x2xf32> to vector<1x32x2xf32>
    %19 = arith.mulf %18, %17 : vector<1x32x2xf32>
    %cst_14 = arith.constant dense<0.000000e+00> : vector<1x32xf32>
    %20 = vector.multi_reduction <add>, %19, %cst_14 [2] : vector<1x32x2xf32> to vector<1x32xf32>
    %21 = vector.shape_cast %8 : vector<1x32xf32> to vector<1x1x32xf32>
    %22 = vector.shape_cast %1 : vector<2x32xf32> to vector<1x2x32xf32>
    %23 = vector.broadcast %21 : vector<1x1x32xf32> to vector<1x2x32xf32>
    %24 = arith.mulf %23, %22 : vector<1x2x32xf32>
    %cst_15 = arith.constant dense<0.000000e+00> : vector<1x2xf32>
    %25 = vector.multi_reduction <add>, %24, %cst_15 [2] : vector<1x2x32xf32> to vector<1x2xf32>
    %cst_16 = arith.constant 0.000000e+00 : f32
    %26 = vector.broadcast %cst_16 : f32 to vector<1x2xf32>
    %27 = arith.maximumf %25, %26 : vector<1x2xf32>
    %28 = vector.shape_cast %27 : vector<1x2xf32> to vector<1x1x2xf32>
    %29 = vector.shape_cast %2 : vector<32x2xf32> to vector<1x32x2xf32>
    %30 = vector.broadcast %28 : vector<1x1x2xf32> to vector<1x32x2xf32>
    %31 = arith.mulf %30, %29 : vector<1x32x2xf32>
    %cst_17 = arith.constant dense<0.000000e+00> : vector<1x32xf32>
    %32 = vector.multi_reduction <add>, %31, %cst_17 [2] : vector<1x32x2xf32> to vector<1x32xf32>
    %33 = arith.addf %20, %32 : vector<1x32xf32>
    %34 = arith.negf %33 : vector<1x32xf32>
    %35 = math.exp %34 : vector<1x32xf32>
    %cst_18 = arith.constant 1.000000e+00 : f32
    %36 = vector.broadcast %cst_18 : f32 to vector<1x32xf32>
    %37 = arith.addf %36, %35 : vector<1x32xf32>
    %38 = arith.divf %36, %37 : vector<1x32xf32>
    %39 = vector.shape_cast %38 : vector<1x32xf32> to vector<1x32x1xf32>
    %40 = vector.broadcast %39 : vector<1x32x1xf32> to vector<1x32x256xf32>
    %41 = arith.mulf %0, %40 : vector<1x32x256xf32>
    %cst_19 = arith.constant dense<0.000000e+00> : vector<1x256xf32>
    %42 = vector.multi_reduction <add>, %41, %cst_19 [1] : vector<1x32x256xf32> to vector<1x256xf32>
    %cst_20 = arith.constant 3.125000e-02 : f32
    %43 = vector.broadcast %cst_20 : f32 to vector<1x256xf32>
    %44 = arith.mulf %42, %43 : vector<1x256xf32>
    %cst_21 = arith.constant dense<0xFF800000> : vector<1x256xf32>
    %45 = vector.multi_reduction <maximumf>, %41, %cst_21 [1] : vector<1x32x256xf32> to vector<1x256xf32>
    %46 = vector.shape_cast %44 : vector<1x256xf32> to vector<1x1x256xf32>
    %47 = vector.shape_cast %45 : vector<1x256xf32> to vector<1x1x256xf32>
    %48 = tpu.concatenate %46, %47 in 0 : vector<1x1x256xf32>, vector<1x1x256xf32> -> vector<2x1x256xf32>
    %c48_i32 = arith.constant 48 : i32
    %49 = tpu.dynamic_rotate %48 by %c48_i32 dim 2 : vector<2x1x256xf32>, i32 -> vector<2x1x256xf32>
    %50 = vector.extract_strided_slice %3 {offsets = [0, 0], sizes = [1, 256], strides = [1, 1]} : vector<7x256xf32> to vector<1x256xf32>
    %51 = vector.shape_cast %50 : vector<1x256xf32> to vector<1x1x256xf32>
    %52 = vector.broadcast %51 : vector<1x1x256xf32> to vector<2x1x256xf32>
    %53 = arith.mulf %52, %49 : vector<2x1x256xf32>
    %54 = vector.extract_strided_slice %53 {offsets = [0, 0, 0], sizes = [1, 1, 256], strides = [1, 1, 1]} : vector<2x1x256xf32> to vector<1x1x256xf32>
    %55 = vector.shape_cast %54 : vector<1x1x256xf32> to vector<1x256xf32>
    %56 = vector.extract_strided_slice %53 {offsets = [1, 0, 0], sizes = [1, 1, 256], strides = [1, 1, 1]} : vector<2x1x256xf32> to vector<1x1x256xf32>
    %57 = vector.shape_cast %56 : vector<1x1x256xf32> to vector<1x256xf32>
    %c32_i32 = arith.constant 32 : i32
    %58 = tpu.dynamic_rotate %48 by %c32_i32 dim 2 : vector<2x1x256xf32>, i32 -> vector<2x1x256xf32>
    %59 = vector.extract_strided_slice %3 {offsets = [1, 0], sizes = [1, 256], strides = [1, 1]} : vector<7x256xf32> to vector<1x256xf32>
    %60 = vector.shape_cast %59 : vector<1x256xf32> to vector<1x1x256xf32>
    %61 = vector.broadcast %60 : vector<1x1x256xf32> to vector<2x1x256xf32>
    %62 = arith.mulf %61, %58 : vector<2x1x256xf32>
    %63 = vector.extract_strided_slice %62 {offsets = [0, 0, 0], sizes = [1, 1, 256], strides = [1, 1, 1]} : vector<2x1x256xf32> to vector<1x1x256xf32>
    %64 = vector.shape_cast %63 : vector<1x1x256xf32> to vector<1x256xf32>
    %65 = vector.extract_strided_slice %62 {offsets = [1, 0, 0], sizes = [1, 1, 256], strides = [1, 1, 1]} : vector<2x1x256xf32> to vector<1x1x256xf32>
    %66 = vector.shape_cast %65 : vector<1x1x256xf32> to vector<1x256xf32>
    %c16_i32 = arith.constant 16 : i32
    %67 = tpu.dynamic_rotate %48 by %c16_i32 dim 2 : vector<2x1x256xf32>, i32 -> vector<2x1x256xf32>
    %68 = vector.extract_strided_slice %3 {offsets = [2, 0], sizes = [1, 256], strides = [1, 1]} : vector<7x256xf32> to vector<1x256xf32>
    %69 = vector.shape_cast %68 : vector<1x256xf32> to vector<1x1x256xf32>
    %70 = vector.broadcast %69 : vector<1x1x256xf32> to vector<2x1x256xf32>
    %71 = arith.mulf %70, %67 : vector<2x1x256xf32>
    %72 = vector.extract_strided_slice %71 {offsets = [0, 0, 0], sizes = [1, 1, 256], strides = [1, 1, 1]} : vector<2x1x256xf32> to vector<1x1x256xf32>
    %73 = vector.shape_cast %72 : vector<1x1x256xf32> to vector<1x256xf32>
    %74 = vector.extract_strided_slice %71 {offsets = [1, 0, 0], sizes = [1, 1, 256], strides = [1, 1, 1]} : vector<2x1x256xf32> to vector<1x1x256xf32>
    %75 = vector.shape_cast %74 : vector<1x1x256xf32> to vector<1x256xf32>
    %76 = vector.extract_strided_slice %3 {offsets = [3, 0], sizes = [1, 256], strides = [1, 1]} : vector<7x256xf32> to vector<1x256xf32>
    %77 = vector.shape_cast %76 : vector<1x256xf32> to vector<1x1x256xf32>
    %78 = vector.broadcast %77 : vector<1x1x256xf32> to vector<2x1x256xf32>
    %79 = arith.mulf %78, %48 : vector<2x1x256xf32>
    %80 = vector.extract_strided_slice %79 {offsets = [0, 0, 0], sizes = [1, 1, 256], strides = [1, 1, 1]} : vector<2x1x256xf32> to vector<1x1x256xf32>
    %81 = vector.shape_cast %80 : vector<1x1x256xf32> to vector<1x256xf32>
    %82 = vector.extract_strided_slice %79 {offsets = [1, 0, 0], sizes = [1, 1, 256], strides = [1, 1, 1]} : vector<2x1x256xf32> to vector<1x1x256xf32>
    %83 = vector.shape_cast %82 : vector<1x1x256xf32> to vector<1x256xf32>
    %c240_i32 = arith.constant 240 : i32
    %84 = tpu.dynamic_rotate %48 by %c240_i32 dim 2 : vector<2x1x256xf32>, i32 -> vector<2x1x256xf32>
    %85 = vector.extract_strided_slice %3 {offsets = [4, 0], sizes = [1, 256], strides = [1, 1]} : vector<7x256xf32> to vector<1x256xf32>
    %86 = vector.shape_cast %85 : vector<1x256xf32> to vector<1x1x256xf32>
    %87 = vector.broadcast %86 : vector<1x1x256xf32> to vector<2x1x256xf32>
    %88 = arith.mulf %87, %84 : vector<2x1x256xf32>
    %89 = vector.extract_strided_slice %88 {offsets = [0, 0, 0], sizes = [1, 1, 256], strides = [1, 1, 1]} : vector<2x1x256xf32> to vector<1x1x256xf32>
    %90 = vector.shape_cast %89 : vector<1x1x256xf32> to vector<1x256xf32>
    %91 = vector.extract_strided_slice %88 {offsets = [1, 0, 0], sizes = [1, 1, 256], strides = [1, 1, 1]} : vector<2x1x256xf32> to vector<1x1x256xf32>
    %92 = vector.shape_cast %91 : vector<1x1x256xf32> to vector<1x256xf32>
    %c224_i32 = arith.constant 224 : i32
    %93 = tpu.dynamic_rotate %48 by %c224_i32 dim 2 : vector<2x1x256xf32>, i32 -> vector<2x1x256xf32>
    %94 = vector.extract_strided_slice %3 {offsets = [5, 0], sizes = [1, 256], strides = [1, 1]} : vector<7x256xf32> to vector<1x256xf32>
    %95 = vector.shape_cast %94 : vector<1x256xf32> to vector<1x1x256xf32>
    %96 = vector.broadcast %95 : vector<1x1x256xf32> to vector<2x1x256xf32>
    %97 = arith.mulf %96, %93 : vector<2x1x256xf32>
    %98 = vector.extract_strided_slice %97 {offsets = [0, 0, 0], sizes = [1, 1, 256], strides = [1, 1, 1]} : vector<2x1x256xf32> to vector<1x1x256xf32>
    %99 = vector.shape_cast %98 : vector<1x1x256xf32> to vector<1x256xf32>
    %100 = vector.extract_strided_slice %97 {offsets = [1, 0, 0], sizes = [1, 1, 256], strides = [1, 1, 1]} : vector<2x1x256xf32> to vector<1x1x256xf32>
    %101 = vector.shape_cast %100 : vector<1x1x256xf32> to vector<1x256xf32>
    %c208_i32 = arith.constant 208 : i32
    %102 = tpu.dynamic_rotate %48 by %c208_i32 dim 2 : vector<2x1x256xf32>, i32 -> vector<2x1x256xf32>
    %103 = vector.extract_strided_slice %3 {offsets = [6, 0], sizes = [1, 256], strides = [1, 1]} : vector<7x256xf32> to vector<1x256xf32>
    %104 = vector.shape_cast %103 : vector<1x256xf32> to vector<1x1x256xf32>
    %105 = vector.broadcast %104 : vector<1x1x256xf32> to vector<2x1x256xf32>
    %106 = arith.mulf %105, %102 : vector<2x1x256xf32>
    %107 = vector.extract_strided_slice %106 {offsets = [0, 0, 0], sizes = [1, 1, 256], strides = [1, 1, 1]} : vector<2x1x256xf32> to vector<1x1x256xf32>
    %108 = vector.shape_cast %107 : vector<1x1x256xf32> to vector<1x256xf32>
    %109 = vector.extract_strided_slice %106 {offsets = [1, 0, 0], sizes = [1, 1, 256], strides = [1, 1, 1]} : vector<2x1x256xf32> to vector<1x1x256xf32>
    %110 = vector.shape_cast %109 : vector<1x1x256xf32> to vector<1x256xf32>
    %c0_22 = arith.constant 0 : index
    %111 = memref.load %arg4[%c0_22] : memref<98xf32, #tpu.memory_space<smem>>
    %112 = vector.broadcast %111 : f32 to vector<1x256xf32>
    %113 = arith.mulf %112, %55 : vector<1x256xf32>
    %c49 = arith.constant 49 : index
    %114 = memref.load %arg4[%c49] : memref<98xf32, #tpu.memory_space<smem>>
    %115 = vector.broadcast %114 : f32 to vector<1x256xf32>
    %116 = arith.mulf %115, %57 : vector<1x256xf32>
    %117 = arith.addf %113, %116 : vector<1x256xf32>
    %c7 = arith.constant 7 : index
    %118 = memref.load %arg4[%c7] : memref<98xf32, #tpu.memory_space<smem>>
    %119 = vector.broadcast %118 : f32 to vector<1x256xf32>
    %120 = arith.mulf %119, %64 : vector<1x256xf32>
    %c56 = arith.constant 56 : index
    %121 = memref.load %arg4[%c56] : memref<98xf32, #tpu.memory_space<smem>>
    %122 = vector.broadcast %121 : f32 to vector<1x256xf32>
    %123 = arith.mulf %122, %66 : vector<1x256xf32>
    %124 = arith.addf %120, %123 : vector<1x256xf32>
    %c14 = arith.constant 14 : index
    %125 = memref.load %arg4[%c14] : memref<98xf32, #tpu.memory_space<smem>>
    %126 = vector.broadcast %125 : f32 to vector<1x256xf32>
    %127 = arith.mulf %126, %73 : vector<1x256xf32>
    %c63 = arith.constant 63 : index
    %128 = memref.load %arg4[%c63] : memref<98xf32, #tpu.memory_space<smem>>
    %129 = vector.broadcast %128 : f32 to vector<1x256xf32>
    %130 = arith.mulf %129, %75 : vector<1x256xf32>
    %131 = arith.addf %127, %130 : vector<1x256xf32>
    %c21 = arith.constant 21 : index
    %132 = memref.load %arg4[%c21] : memref<98xf32, #tpu.memory_space<smem>>
    %133 = vector.broadcast %132 : f32 to vector<1x256xf32>
    %134 = arith.mulf %133, %81 : vector<1x256xf32>
    %c70 = arith.constant 70 : index
    %135 = memref.load %arg4[%c70] : memref<98xf32, #tpu.memory_space<smem>>
    %136 = vector.broadcast %135 : f32 to vector<1x256xf32>
    %137 = arith.mulf %136, %83 : vector<1x256xf32>
    %138 = arith.addf %134, %137 : vector<1x256xf32>
    %c28 = arith.constant 28 : index
    %139 = memref.load %arg4[%c28] : memref<98xf32, #tpu.memory_space<smem>>
    %140 = vector.broadcast %139 : f32 to vector<1x256xf32>
    %141 = arith.mulf %140, %90 : vector<1x256xf32>
    %c77 = arith.constant 77 : index
    %142 = memref.load %arg4[%c77] : memref<98xf32, #tpu.memory_space<smem>>
    %143 = vector.broadcast %142 : f32 to vector<1x256xf32>
    %144 = arith.mulf %143, %92 : vector<1x256xf32>
    %145 = arith.addf %141, %144 : vector<1x256xf32>
    %c35 = arith.constant 35 : index
    %146 = memref.load %arg4[%c35] : memref<98xf32, #tpu.memory_space<smem>>
    %147 = vector.broadcast %146 : f32 to vector<1x256xf32>
    %148 = arith.mulf %147, %99 : vector<1x256xf32>
    %c84 = arith.constant 84 : index
    %149 = memref.load %arg4[%c84] : memref<98xf32, #tpu.memory_space<smem>>
    %150 = vector.broadcast %149 : f32 to vector<1x256xf32>
    %151 = arith.mulf %150, %101 : vector<1x256xf32>
    %152 = arith.addf %148, %151 : vector<1x256xf32>
    %c42 = arith.constant 42 : index
    %153 = memref.load %arg4[%c42] : memref<98xf32, #tpu.memory_space<smem>>
    %154 = vector.broadcast %153 : f32 to vector<1x256xf32>
    %155 = arith.mulf %154, %108 : vector<1x256xf32>
    %c91 = arith.constant 91 : index
    %156 = memref.load %arg4[%c91] : memref<98xf32, #tpu.memory_space<smem>>
    %157 = vector.broadcast %156 : f32 to vector<1x256xf32>
    %158 = arith.mulf %157, %110 : vector<1x256xf32>
    %159 = arith.addf %155, %158 : vector<1x256xf32>
    %160 = arith.addf %117, %124 : vector<1x256xf32>
    %161 = arith.addf %131, %138 : vector<1x256xf32>
    %162 = arith.addf %145, %152 : vector<1x256xf32>
    %163 = arith.addf %160, %161 : vector<1x256xf32>
    %164 = arith.addf %162, %159 : vector<1x256xf32>
    %165 = arith.addf %163, %164 : vector<1x256xf32>
    %166 = vector.extract_strided_slice %4 {offsets = [0, 0], sizes = [1, 256], strides = [1, 1]} : vector<7x256xf32> to vector<1x256xf32>
    %c3_i32 = arith.constant 3 : i32
    %167 = tpu.dynamic_rotate %165 by %c3_i32 dim 1 : vector<1x256xf32>, i32 -> vector<1x256xf32>
    %168 = arith.mulf %166, %167 : vector<1x256xf32>
    %c1 = arith.constant 1 : index
    %169 = memref.load %arg4[%c1] : memref<98xf32, #tpu.memory_space<smem>>
    %170 = vector.broadcast %169 : f32 to vector<1x256xf32>
    %171 = arith.mulf %170, %55 : vector<1x256xf32>
    %c50 = arith.constant 50 : index
    %172 = memref.load %arg4[%c50] : memref<98xf32, #tpu.memory_space<smem>>
    %173 = vector.broadcast %172 : f32 to vector<1x256xf32>
    %174 = arith.mulf %173, %57 : vector<1x256xf32>
    %175 = arith.addf %171, %174 : vector<1x256xf32>
    %c8 = arith.constant 8 : index
    %176 = memref.load %arg4[%c8] : memref<98xf32, #tpu.memory_space<smem>>
    %177 = vector.broadcast %176 : f32 to vector<1x256xf32>
    %178 = arith.mulf %177, %64 : vector<1x256xf32>
    %c57 = arith.constant 57 : index
    %179 = memref.load %arg4[%c57] : memref<98xf32, #tpu.memory_space<smem>>
    %180 = vector.broadcast %179 : f32 to vector<1x256xf32>
    %181 = arith.mulf %180, %66 : vector<1x256xf32>
    %182 = arith.addf %178, %181 : vector<1x256xf32>
    %c15 = arith.constant 15 : index
    %183 = memref.load %arg4[%c15] : memref<98xf32, #tpu.memory_space<smem>>
    %184 = vector.broadcast %183 : f32 to vector<1x256xf32>
    %185 = arith.mulf %184, %73 : vector<1x256xf32>
    %c64 = arith.constant 64 : index
    %186 = memref.load %arg4[%c64] : memref<98xf32, #tpu.memory_space<smem>>
    %187 = vector.broadcast %186 : f32 to vector<1x256xf32>
    %188 = arith.mulf %187, %75 : vector<1x256xf32>
    %189 = arith.addf %185, %188 : vector<1x256xf32>
    %c22 = arith.constant 22 : index
    %190 = memref.load %arg4[%c22] : memref<98xf32, #tpu.memory_space<smem>>
    %191 = vector.broadcast %190 : f32 to vector<1x256xf32>
    %192 = arith.mulf %191, %81 : vector<1x256xf32>
    %c71 = arith.constant 71 : index
    %193 = memref.load %arg4[%c71] : memref<98xf32, #tpu.memory_space<smem>>
    %194 = vector.broadcast %193 : f32 to vector<1x256xf32>
    %195 = arith.mulf %194, %83 : vector<1x256xf32>
    %196 = arith.addf %192, %195 : vector<1x256xf32>
    %c29 = arith.constant 29 : index
    %197 = memref.load %arg4[%c29] : memref<98xf32, #tpu.memory_space<smem>>
    %198 = vector.broadcast %197 : f32 to vector<1x256xf32>
    %199 = arith.mulf %198, %90 : vector<1x256xf32>
    %c78 = arith.constant 78 : index
    %200 = memref.load %arg4[%c78] : memref<98xf32, #tpu.memory_space<smem>>
    %201 = vector.broadcast %200 : f32 to vector<1x256xf32>
    %202 = arith.mulf %201, %92 : vector<1x256xf32>
    %203 = arith.addf %199, %202 : vector<1x256xf32>
    %c36 = arith.constant 36 : index
    %204 = memref.load %arg4[%c36] : memref<98xf32, #tpu.memory_space<smem>>
    %205 = vector.broadcast %204 : f32 to vector<1x256xf32>
    %206 = arith.mulf %205, %99 : vector<1x256xf32>
    %c85 = arith.constant 85 : index
    %207 = memref.load %arg4[%c85] : memref<98xf32, #tpu.memory_space<smem>>
    %208 = vector.broadcast %207 : f32 to vector<1x256xf32>
    %209 = arith.mulf %208, %101 : vector<1x256xf32>
    %210 = arith.addf %206, %209 : vector<1x256xf32>
    %c43 = arith.constant 43 : index
    %211 = memref.load %arg4[%c43] : memref<98xf32, #tpu.memory_space<smem>>
    %212 = vector.broadcast %211 : f32 to vector<1x256xf32>
    %213 = arith.mulf %212, %108 : vector<1x256xf32>
    %c92 = arith.constant 92 : index
    %214 = memref.load %arg4[%c92] : memref<98xf32, #tpu.memory_space<smem>>
    %215 = vector.broadcast %214 : f32 to vector<1x256xf32>
    %216 = arith.mulf %215, %110 : vector<1x256xf32>
    %217 = arith.addf %213, %216 : vector<1x256xf32>
    %218 = arith.addf %175, %182 : vector<1x256xf32>
    %219 = arith.addf %189, %196 : vector<1x256xf32>
    %220 = arith.addf %203, %210 : vector<1x256xf32>
    %221 = arith.addf %218, %219 : vector<1x256xf32>
    %222 = arith.addf %220, %217 : vector<1x256xf32>
    %223 = arith.addf %221, %222 : vector<1x256xf32>
    %224 = vector.extract_strided_slice %4 {offsets = [1, 0], sizes = [1, 256], strides = [1, 1]} : vector<7x256xf32> to vector<1x256xf32>
    %c2_i32 = arith.constant 2 : i32
    %225 = tpu.dynamic_rotate %223 by %c2_i32 dim 1 : vector<1x256xf32>, i32 -> vector<1x256xf32>
    %226 = arith.mulf %224, %225 : vector<1x256xf32>
    %c2 = arith.constant 2 : index
    %227 = memref.load %arg4[%c2] : memref<98xf32, #tpu.memory_space<smem>>
    %228 = vector.broadcast %227 : f32 to vector<1x256xf32>
    %229 = arith.mulf %228, %55 : vector<1x256xf32>
    %c51 = arith.constant 51 : index
    %230 = memref.load %arg4[%c51] : memref<98xf32, #tpu.memory_space<smem>>
    %231 = vector.broadcast %230 : f32 to vector<1x256xf32>
    %232 = arith.mulf %231, %57 : vector<1x256xf32>
    %233 = arith.addf %229, %232 : vector<1x256xf32>
    %c9 = arith.constant 9 : index
    %234 = memref.load %arg4[%c9] : memref<98xf32, #tpu.memory_space<smem>>
    %235 = vector.broadcast %234 : f32 to vector<1x256xf32>
    %236 = arith.mulf %235, %64 : vector<1x256xf32>
    %c58 = arith.constant 58 : index
    %237 = memref.load %arg4[%c58] : memref<98xf32, #tpu.memory_space<smem>>
    %238 = vector.broadcast %237 : f32 to vector<1x256xf32>
    %239 = arith.mulf %238, %66 : vector<1x256xf32>
    %240 = arith.addf %236, %239 : vector<1x256xf32>
    %c16 = arith.constant 16 : index
    %241 = memref.load %arg4[%c16] : memref<98xf32, #tpu.memory_space<smem>>
    %242 = vector.broadcast %241 : f32 to vector<1x256xf32>
    %243 = arith.mulf %242, %73 : vector<1x256xf32>
    %c65 = arith.constant 65 : index
    %244 = memref.load %arg4[%c65] : memref<98xf32, #tpu.memory_space<smem>>
    %245 = vector.broadcast %244 : f32 to vector<1x256xf32>
    %246 = arith.mulf %245, %75 : vector<1x256xf32>
    %247 = arith.addf %243, %246 : vector<1x256xf32>
    %c23 = arith.constant 23 : index
    %248 = memref.load %arg4[%c23] : memref<98xf32, #tpu.memory_space<smem>>
    %249 = vector.broadcast %248 : f32 to vector<1x256xf32>
    %250 = arith.mulf %249, %81 : vector<1x256xf32>
    %c72 = arith.constant 72 : index
    %251 = memref.load %arg4[%c72] : memref<98xf32, #tpu.memory_space<smem>>
    %252 = vector.broadcast %251 : f32 to vector<1x256xf32>
    %253 = arith.mulf %252, %83 : vector<1x256xf32>
    %254 = arith.addf %250, %253 : vector<1x256xf32>
    %c30 = arith.constant 30 : index
    %255 = memref.load %arg4[%c30] : memref<98xf32, #tpu.memory_space<smem>>
    %256 = vector.broadcast %255 : f32 to vector<1x256xf32>
    %257 = arith.mulf %256, %90 : vector<1x256xf32>
    %c79 = arith.constant 79 : index
    %258 = memref.load %arg4[%c79] : memref<98xf32, #tpu.memory_space<smem>>
    %259 = vector.broadcast %258 : f32 to vector<1x256xf32>
    %260 = arith.mulf %259, %92 : vector<1x256xf32>
    %261 = arith.addf %257, %260 : vector<1x256xf32>
    %c37 = arith.constant 37 : index
    %262 = memref.load %arg4[%c37] : memref<98xf32, #tpu.memory_space<smem>>
    %263 = vector.broadcast %262 : f32 to vector<1x256xf32>
    %264 = arith.mulf %263, %99 : vector<1x256xf32>
    %c86 = arith.constant 86 : index
    %265 = memref.load %arg4[%c86] : memref<98xf32, #tpu.memory_space<smem>>
    %266 = vector.broadcast %265 : f32 to vector<1x256xf32>
    %267 = arith.mulf %266, %101 : vector<1x256xf32>
    %268 = arith.addf %264, %267 : vector<1x256xf32>
    %c44 = arith.constant 44 : index
    %269 = memref.load %arg4[%c44] : memref<98xf32, #tpu.memory_space<smem>>
    %270 = vector.broadcast %269 : f32 to vector<1x256xf32>
    %271 = arith.mulf %270, %108 : vector<1x256xf32>
    %c93 = arith.constant 93 : index
    %272 = memref.load %arg4[%c93] : memref<98xf32, #tpu.memory_space<smem>>
    %273 = vector.broadcast %272 : f32 to vector<1x256xf32>
    %274 = arith.mulf %273, %110 : vector<1x256xf32>
    %275 = arith.addf %271, %274 : vector<1x256xf32>
    %276 = arith.addf %233, %240 : vector<1x256xf32>
    %277 = arith.addf %247, %254 : vector<1x256xf32>
    %278 = arith.addf %261, %268 : vector<1x256xf32>
    %279 = arith.addf %276, %277 : vector<1x256xf32>
    %280 = arith.addf %278, %275 : vector<1x256xf32>
    %281 = arith.addf %279, %280 : vector<1x256xf32>
    %282 = vector.extract_strided_slice %4 {offsets = [2, 0], sizes = [1, 256], strides = [1, 1]} : vector<7x256xf32> to vector<1x256xf32>
    %c1_i32 = arith.constant 1 : i32
    %283 = tpu.dynamic_rotate %281 by %c1_i32 dim 1 : vector<1x256xf32>, i32 -> vector<1x256xf32>
    %284 = arith.mulf %282, %283 : vector<1x256xf32>
    %c3 = arith.constant 3 : index
    %285 = memref.load %arg4[%c3] : memref<98xf32, #tpu.memory_space<smem>>
    %286 = vector.broadcast %285 : f32 to vector<1x256xf32>
    %287 = arith.mulf %286, %55 : vector<1x256xf32>
    %c52 = arith.constant 52 : index
    %288 = memref.load %arg4[%c52] : memref<98xf32, #tpu.memory_space<smem>>
    %289 = vector.broadcast %288 : f32 to vector<1x256xf32>
    %290 = arith.mulf %289, %57 : vector<1x256xf32>
    %291 = arith.addf %287, %290 : vector<1x256xf32>
    %c10 = arith.constant 10 : index
    %292 = memref.load %arg4[%c10] : memref<98xf32, #tpu.memory_space<smem>>
    %293 = vector.broadcast %292 : f32 to vector<1x256xf32>
    %294 = arith.mulf %293, %64 : vector<1x256xf32>
    %c59 = arith.constant 59 : index
    %295 = memref.load %arg4[%c59] : memref<98xf32, #tpu.memory_space<smem>>
    %296 = vector.broadcast %295 : f32 to vector<1x256xf32>
    %297 = arith.mulf %296, %66 : vector<1x256xf32>
    %298 = arith.addf %294, %297 : vector<1x256xf32>
    %c17 = arith.constant 17 : index
    %299 = memref.load %arg4[%c17] : memref<98xf32, #tpu.memory_space<smem>>
    %300 = vector.broadcast %299 : f32 to vector<1x256xf32>
    %301 = arith.mulf %300, %73 : vector<1x256xf32>
    %c66 = arith.constant 66 : index
    %302 = memref.load %arg4[%c66] : memref<98xf32, #tpu.memory_space<smem>>
    %303 = vector.broadcast %302 : f32 to vector<1x256xf32>
    %304 = arith.mulf %303, %75 : vector<1x256xf32>
    %305 = arith.addf %301, %304 : vector<1x256xf32>
    %c24 = arith.constant 24 : index
    %306 = memref.load %arg4[%c24] : memref<98xf32, #tpu.memory_space<smem>>
    %307 = vector.broadcast %306 : f32 to vector<1x256xf32>
    %308 = arith.mulf %307, %81 : vector<1x256xf32>
    %c73 = arith.constant 73 : index
    %309 = memref.load %arg4[%c73] : memref<98xf32, #tpu.memory_space<smem>>
    %310 = vector.broadcast %309 : f32 to vector<1x256xf32>
    %311 = arith.mulf %310, %83 : vector<1x256xf32>
    %312 = arith.addf %308, %311 : vector<1x256xf32>
    %c31 = arith.constant 31 : index
    %313 = memref.load %arg4[%c31] : memref<98xf32, #tpu.memory_space<smem>>
    %314 = vector.broadcast %313 : f32 to vector<1x256xf32>
    %315 = arith.mulf %314, %90 : vector<1x256xf32>
    %c80 = arith.constant 80 : index
    %316 = memref.load %arg4[%c80] : memref<98xf32, #tpu.memory_space<smem>>
    %317 = vector.broadcast %316 : f32 to vector<1x256xf32>
    %318 = arith.mulf %317, %92 : vector<1x256xf32>
    %319 = arith.addf %315, %318 : vector<1x256xf32>
    %c38 = arith.constant 38 : index
    %320 = memref.load %arg4[%c38] : memref<98xf32, #tpu.memory_space<smem>>
    %321 = vector.broadcast %320 : f32 to vector<1x256xf32>
    %322 = arith.mulf %321, %99 : vector<1x256xf32>
    %c87 = arith.constant 87 : index
    %323 = memref.load %arg4[%c87] : memref<98xf32, #tpu.memory_space<smem>>
    %324 = vector.broadcast %323 : f32 to vector<1x256xf32>
    %325 = arith.mulf %324, %101 : vector<1x256xf32>
    %326 = arith.addf %322, %325 : vector<1x256xf32>
    %c45 = arith.constant 45 : index
    %327 = memref.load %arg4[%c45] : memref<98xf32, #tpu.memory_space<smem>>
    %328 = vector.broadcast %327 : f32 to vector<1x256xf32>
    %329 = arith.mulf %328, %108 : vector<1x256xf32>
    %c94 = arith.constant 94 : index
    %330 = memref.load %arg4[%c94] : memref<98xf32, #tpu.memory_space<smem>>
    %331 = vector.broadcast %330 : f32 to vector<1x256xf32>
    %332 = arith.mulf %331, %110 : vector<1x256xf32>
    %333 = arith.addf %329, %332 : vector<1x256xf32>
    %334 = arith.addf %291, %298 : vector<1x256xf32>
    %335 = arith.addf %305, %312 : vector<1x256xf32>
    %336 = arith.addf %319, %326 : vector<1x256xf32>
    %337 = arith.addf %334, %335 : vector<1x256xf32>
    %338 = arith.addf %336, %333 : vector<1x256xf32>
    %339 = arith.addf %337, %338 : vector<1x256xf32>
    %340 = vector.extract_strided_slice %4 {offsets = [3, 0], sizes = [1, 256], strides = [1, 1]} : vector<7x256xf32> to vector<1x256xf32>
    %341 = arith.mulf %340, %339 : vector<1x256xf32>
    %c4 = arith.constant 4 : index
    %342 = memref.load %arg4[%c4] : memref<98xf32, #tpu.memory_space<smem>>
    %343 = vector.broadcast %342 : f32 to vector<1x256xf32>
    %344 = arith.mulf %343, %55 : vector<1x256xf32>
    %c53 = arith.constant 53 : index
    %345 = memref.load %arg4[%c53] : memref<98xf32, #tpu.memory_space<smem>>
    %346 = vector.broadcast %345 : f32 to vector<1x256xf32>
    %347 = arith.mulf %346, %57 : vector<1x256xf32>
    %348 = arith.addf %344, %347 : vector<1x256xf32>
    %c11 = arith.constant 11 : index
    %349 = memref.load %arg4[%c11] : memref<98xf32, #tpu.memory_space<smem>>
    %350 = vector.broadcast %349 : f32 to vector<1x256xf32>
    %351 = arith.mulf %350, %64 : vector<1x256xf32>
    %c60 = arith.constant 60 : index
    %352 = memref.load %arg4[%c60] : memref<98xf32, #tpu.memory_space<smem>>
    %353 = vector.broadcast %352 : f32 to vector<1x256xf32>
    %354 = arith.mulf %353, %66 : vector<1x256xf32>
    %355 = arith.addf %351, %354 : vector<1x256xf32>
    %c18 = arith.constant 18 : index
    %356 = memref.load %arg4[%c18] : memref<98xf32, #tpu.memory_space<smem>>
    %357 = vector.broadcast %356 : f32 to vector<1x256xf32>
    %358 = arith.mulf %357, %73 : vector<1x256xf32>
    %c67 = arith.constant 67 : index
    %359 = memref.load %arg4[%c67] : memref<98xf32, #tpu.memory_space<smem>>
    %360 = vector.broadcast %359 : f32 to vector<1x256xf32>
    %361 = arith.mulf %360, %75 : vector<1x256xf32>
    %362 = arith.addf %358, %361 : vector<1x256xf32>
    %c25 = arith.constant 25 : index
    %363 = memref.load %arg4[%c25] : memref<98xf32, #tpu.memory_space<smem>>
    %364 = vector.broadcast %363 : f32 to vector<1x256xf32>
    %365 = arith.mulf %364, %81 : vector<1x256xf32>
    %c74 = arith.constant 74 : index
    %366 = memref.load %arg4[%c74] : memref<98xf32, #tpu.memory_space<smem>>
    %367 = vector.broadcast %366 : f32 to vector<1x256xf32>
    %368 = arith.mulf %367, %83 : vector<1x256xf32>
    %369 = arith.addf %365, %368 : vector<1x256xf32>
    %c32 = arith.constant 32 : index
    %370 = memref.load %arg4[%c32] : memref<98xf32, #tpu.memory_space<smem>>
    %371 = vector.broadcast %370 : f32 to vector<1x256xf32>
    %372 = arith.mulf %371, %90 : vector<1x256xf32>
    %c81 = arith.constant 81 : index
    %373 = memref.load %arg4[%c81] : memref<98xf32, #tpu.memory_space<smem>>
    %374 = vector.broadcast %373 : f32 to vector<1x256xf32>
    %375 = arith.mulf %374, %92 : vector<1x256xf32>
    %376 = arith.addf %372, %375 : vector<1x256xf32>
    %c39 = arith.constant 39 : index
    %377 = memref.load %arg4[%c39] : memref<98xf32, #tpu.memory_space<smem>>
    %378 = vector.broadcast %377 : f32 to vector<1x256xf32>
    %379 = arith.mulf %378, %99 : vector<1x256xf32>
    %c88 = arith.constant 88 : index
    %380 = memref.load %arg4[%c88] : memref<98xf32, #tpu.memory_space<smem>>
    %381 = vector.broadcast %380 : f32 to vector<1x256xf32>
    %382 = arith.mulf %381, %101 : vector<1x256xf32>
    %383 = arith.addf %379, %382 : vector<1x256xf32>
    %c46 = arith.constant 46 : index
    %384 = memref.load %arg4[%c46] : memref<98xf32, #tpu.memory_space<smem>>
    %385 = vector.broadcast %384 : f32 to vector<1x256xf32>
    %386 = arith.mulf %385, %108 : vector<1x256xf32>
    %c95 = arith.constant 95 : index
    %387 = memref.load %arg4[%c95] : memref<98xf32, #tpu.memory_space<smem>>
    %388 = vector.broadcast %387 : f32 to vector<1x256xf32>
    %389 = arith.mulf %388, %110 : vector<1x256xf32>
    %390 = arith.addf %386, %389 : vector<1x256xf32>
    %391 = arith.addf %348, %355 : vector<1x256xf32>
    %392 = arith.addf %362, %369 : vector<1x256xf32>
    %393 = arith.addf %376, %383 : vector<1x256xf32>
    %394 = arith.addf %391, %392 : vector<1x256xf32>
    %395 = arith.addf %393, %390 : vector<1x256xf32>
    %396 = arith.addf %394, %395 : vector<1x256xf32>
    %397 = vector.extract_strided_slice %4 {offsets = [4, 0], sizes = [1, 256], strides = [1, 1]} : vector<7x256xf32> to vector<1x256xf32>
    %c255_i32 = arith.constant 255 : i32
    %398 = tpu.dynamic_rotate %396 by %c255_i32 dim 1 : vector<1x256xf32>, i32 -> vector<1x256xf32>
    %399 = arith.mulf %397, %398 : vector<1x256xf32>
    %c5 = arith.constant 5 : index
    %400 = memref.load %arg4[%c5] : memref<98xf32, #tpu.memory_space<smem>>
    %401 = vector.broadcast %400 : f32 to vector<1x256xf32>
    %402 = arith.mulf %401, %55 : vector<1x256xf32>
    %c54 = arith.constant 54 : index
    %403 = memref.load %arg4[%c54] : memref<98xf32, #tpu.memory_space<smem>>
    %404 = vector.broadcast %403 : f32 to vector<1x256xf32>
    %405 = arith.mulf %404, %57 : vector<1x256xf32>
    %406 = arith.addf %402, %405 : vector<1x256xf32>
    %c12 = arith.constant 12 : index
    %407 = memref.load %arg4[%c12] : memref<98xf32, #tpu.memory_space<smem>>
    %408 = vector.broadcast %407 : f32 to vector<1x256xf32>
    %409 = arith.mulf %408, %64 : vector<1x256xf32>
    %c61 = arith.constant 61 : index
    %410 = memref.load %arg4[%c61] : memref<98xf32, #tpu.memory_space<smem>>
    %411 = vector.broadcast %410 : f32 to vector<1x256xf32>
    %412 = arith.mulf %411, %66 : vector<1x256xf32>
    %413 = arith.addf %409, %412 : vector<1x256xf32>
    %c19 = arith.constant 19 : index
    %414 = memref.load %arg4[%c19] : memref<98xf32, #tpu.memory_space<smem>>
    %415 = vector.broadcast %414 : f32 to vector<1x256xf32>
    %416 = arith.mulf %415, %73 : vector<1x256xf32>
    %c68 = arith.constant 68 : index
    %417 = memref.load %arg4[%c68] : memref<98xf32, #tpu.memory_space<smem>>
    %418 = vector.broadcast %417 : f32 to vector<1x256xf32>
    %419 = arith.mulf %418, %75 : vector<1x256xf32>
    %420 = arith.addf %416, %419 : vector<1x256xf32>
    %c26 = arith.constant 26 : index
    %421 = memref.load %arg4[%c26] : memref<98xf32, #tpu.memory_space<smem>>
    %422 = vector.broadcast %421 : f32 to vector<1x256xf32>
    %423 = arith.mulf %422, %81 : vector<1x256xf32>
    %c75 = arith.constant 75 : index
    %424 = memref.load %arg4[%c75] : memref<98xf32, #tpu.memory_space<smem>>
    %425 = vector.broadcast %424 : f32 to vector<1x256xf32>
    %426 = arith.mulf %425, %83 : vector<1x256xf32>
    %427 = arith.addf %423, %426 : vector<1x256xf32>
    %c33 = arith.constant 33 : index
    %428 = memref.load %arg4[%c33] : memref<98xf32, #tpu.memory_space<smem>>
    %429 = vector.broadcast %428 : f32 to vector<1x256xf32>
    %430 = arith.mulf %429, %90 : vector<1x256xf32>
    %c82 = arith.constant 82 : index
    %431 = memref.load %arg4[%c82] : memref<98xf32, #tpu.memory_space<smem>>
    %432 = vector.broadcast %431 : f32 to vector<1x256xf32>
    %433 = arith.mulf %432, %92 : vector<1x256xf32>
    %434 = arith.addf %430, %433 : vector<1x256xf32>
    %c40 = arith.constant 40 : index
    %435 = memref.load %arg4[%c40] : memref<98xf32, #tpu.memory_space<smem>>
    %436 = vector.broadcast %435 : f32 to vector<1x256xf32>
    %437 = arith.mulf %436, %99 : vector<1x256xf32>
    %c89 = arith.constant 89 : index
    %438 = memref.load %arg4[%c89] : memref<98xf32, #tpu.memory_space<smem>>
    %439 = vector.broadcast %438 : f32 to vector<1x256xf32>
    %440 = arith.mulf %439, %101 : vector<1x256xf32>
    %441 = arith.addf %437, %440 : vector<1x256xf32>
    %c47 = arith.constant 47 : index
    %442 = memref.load %arg4[%c47] : memref<98xf32, #tpu.memory_space<smem>>
    %443 = vector.broadcast %442 : f32 to vector<1x256xf32>
    %444 = arith.mulf %443, %108 : vector<1x256xf32>
    %c96 = arith.constant 96 : index
    %445 = memref.load %arg4[%c96] : memref<98xf32, #tpu.memory_space<smem>>
    %446 = vector.broadcast %445 : f32 to vector<1x256xf32>
    %447 = arith.mulf %446, %110 : vector<1x256xf32>
    %448 = arith.addf %444, %447 : vector<1x256xf32>
    %449 = arith.addf %406, %413 : vector<1x256xf32>
    %450 = arith.addf %420, %427 : vector<1x256xf32>
    %451 = arith.addf %434, %441 : vector<1x256xf32>
    %452 = arith.addf %449, %450 : vector<1x256xf32>
    %453 = arith.addf %451, %448 : vector<1x256xf32>
    %454 = arith.addf %452, %453 : vector<1x256xf32>
    %455 = vector.extract_strided_slice %4 {offsets = [5, 0], sizes = [1, 256], strides = [1, 1]} : vector<7x256xf32> to vector<1x256xf32>
    %c254_i32 = arith.constant 254 : i32
    %456 = tpu.dynamic_rotate %454 by %c254_i32 dim 1 : vector<1x256xf32>, i32 -> vector<1x256xf32>
    %457 = arith.mulf %455, %456 : vector<1x256xf32>
    %c6 = arith.constant 6 : index
    %458 = memref.load %arg4[%c6] : memref<98xf32, #tpu.memory_space<smem>>
    %459 = vector.broadcast %458 : f32 to vector<1x256xf32>
    %460 = arith.mulf %459, %55 : vector<1x256xf32>
    %c55 = arith.constant 55 : index
    %461 = memref.load %arg4[%c55] : memref<98xf32, #tpu.memory_space<smem>>
    %462 = vector.broadcast %461 : f32 to vector<1x256xf32>
    %463 = arith.mulf %462, %57 : vector<1x256xf32>
    %464 = arith.addf %460, %463 : vector<1x256xf32>
    %c13 = arith.constant 13 : index
    %465 = memref.load %arg4[%c13] : memref<98xf32, #tpu.memory_space<smem>>
    %466 = vector.broadcast %465 : f32 to vector<1x256xf32>
    %467 = arith.mulf %466, %64 : vector<1x256xf32>
    %c62 = arith.constant 62 : index
    %468 = memref.load %arg4[%c62] : memref<98xf32, #tpu.memory_space<smem>>
    %469 = vector.broadcast %468 : f32 to vector<1x256xf32>
    %470 = arith.mulf %469, %66 : vector<1x256xf32>
    %471 = arith.addf %467, %470 : vector<1x256xf32>
    %c20 = arith.constant 20 : index
    %472 = memref.load %arg4[%c20] : memref<98xf32, #tpu.memory_space<smem>>
    %473 = vector.broadcast %472 : f32 to vector<1x256xf32>
    %474 = arith.mulf %473, %73 : vector<1x256xf32>
    %c69 = arith.constant 69 : index
    %475 = memref.load %arg4[%c69] : memref<98xf32, #tpu.memory_space<smem>>
    %476 = vector.broadcast %475 : f32 to vector<1x256xf32>
    %477 = arith.mulf %476, %75 : vector<1x256xf32>
    %478 = arith.addf %474, %477 : vector<1x256xf32>
    %c27 = arith.constant 27 : index
    %479 = memref.load %arg4[%c27] : memref<98xf32, #tpu.memory_space<smem>>
    %480 = vector.broadcast %479 : f32 to vector<1x256xf32>
    %481 = arith.mulf %480, %81 : vector<1x256xf32>
    %c76 = arith.constant 76 : index
    %482 = memref.load %arg4[%c76] : memref<98xf32, #tpu.memory_space<smem>>
    %483 = vector.broadcast %482 : f32 to vector<1x256xf32>
    %484 = arith.mulf %483, %83 : vector<1x256xf32>
    %485 = arith.addf %481, %484 : vector<1x256xf32>
    %c34 = arith.constant 34 : index
    %486 = memref.load %arg4[%c34] : memref<98xf32, #tpu.memory_space<smem>>
    %487 = vector.broadcast %486 : f32 to vector<1x256xf32>
    %488 = arith.mulf %487, %90 : vector<1x256xf32>
    %c83 = arith.constant 83 : index
    %489 = memref.load %arg4[%c83] : memref<98xf32, #tpu.memory_space<smem>>
    %490 = vector.broadcast %489 : f32 to vector<1x256xf32>
    %491 = arith.mulf %490, %92 : vector<1x256xf32>
    %492 = arith.addf %488, %491 : vector<1x256xf32>
    %c41 = arith.constant 41 : index
    %493 = memref.load %arg4[%c41] : memref<98xf32, #tpu.memory_space<smem>>
    %494 = vector.broadcast %493 : f32 to vector<1x256xf32>
    %495 = arith.mulf %494, %99 : vector<1x256xf32>
    %c90 = arith.constant 90 : index
    %496 = memref.load %arg4[%c90] : memref<98xf32, #tpu.memory_space<smem>>
    %497 = vector.broadcast %496 : f32 to vector<1x256xf32>
    %498 = arith.mulf %497, %101 : vector<1x256xf32>
    %499 = arith.addf %495, %498 : vector<1x256xf32>
    %c48 = arith.constant 48 : index
    %500 = memref.load %arg4[%c48] : memref<98xf32, #tpu.memory_space<smem>>
    %501 = vector.broadcast %500 : f32 to vector<1x256xf32>
    %502 = arith.mulf %501, %108 : vector<1x256xf32>
    %c97 = arith.constant 97 : index
    %503 = memref.load %arg4[%c97] : memref<98xf32, #tpu.memory_space<smem>>
    %504 = vector.broadcast %503 : f32 to vector<1x256xf32>
    %505 = arith.mulf %504, %110 : vector<1x256xf32>
    %506 = arith.addf %502, %505 : vector<1x256xf32>
    %507 = arith.addf %464, %471 : vector<1x256xf32>
    %508 = arith.addf %478, %485 : vector<1x256xf32>
    %509 = arith.addf %492, %499 : vector<1x256xf32>
    %510 = arith.addf %507, %508 : vector<1x256xf32>
    %511 = arith.addf %509, %506 : vector<1x256xf32>
    %512 = arith.addf %510, %511 : vector<1x256xf32>
    %513 = vector.extract_strided_slice %4 {offsets = [6, 0], sizes = [1, 256], strides = [1, 1]} : vector<7x256xf32> to vector<1x256xf32>
    %c253_i32 = arith.constant 253 : i32
    %514 = tpu.dynamic_rotate %512 by %c253_i32 dim 1 : vector<1x256xf32>, i32 -> vector<1x256xf32>
    %515 = arith.mulf %513, %514 : vector<1x256xf32>
    %516 = arith.addf %168, %226 : vector<1x256xf32>
    %517 = arith.addf %284, %341 : vector<1x256xf32>
    %518 = arith.addf %399, %457 : vector<1x256xf32>
    %519 = arith.addf %516, %517 : vector<1x256xf32>
    %520 = arith.addf %518, %515 : vector<1x256xf32>
    %521 = arith.addf %519, %520 : vector<1x256xf32>
    %522 = arith.negf %521 : vector<1x256xf32>
    %523 = math.exp %522 : vector<1x256xf32>
    %cst_23 = arith.constant 1.000000e+00 : f32
    %524 = vector.broadcast %cst_23 : f32 to vector<1x256xf32>
    %525 = arith.addf %524, %523 : vector<1x256xf32>
    %526 = arith.divf %524, %525 : vector<1x256xf32>
    %527 = vector.shape_cast %526 : vector<1x256xf32> to vector<1x1x256xf32>
    %528 = vector.broadcast %527 : vector<1x1x256xf32> to vector<1x32x256xf32>
    %529 = arith.mulf %41, %528 : vector<1x32x256xf32>
    %c0_24 = arith.constant 0 : index
    %c0_25 = arith.constant 0 : index
    %c0_26 = arith.constant 0 : index
    %530 = vector.load %arg7[%c0_24, %c0_25, %c0_26] : memref<1x32x256xf32, #tpu.memory_space<vmem>>, vector<1x32x256xf32>
    tpu.vector_store %arg7[%c0_24, %c0_25, %c0_26], %529 {strides = array<i32>} : memref<1x32x256xf32, #tpu.memory_space<vmem>>, vector<1x32x256xf32>,
    return
  }
  func.func @transform_0(%arg0: i32) -> (i32, i32, i32) {
    %c0_i32 = arith.constant 0 : i32
    %c0_i32_0 = arith.constant 0 : i32
    %c0_i32_1 = arith.constant 0 : i32
    return %arg0, %c0_i32, %c0_i32_0 : i32, i32, i32
  }
  func.func @transform_1(%arg0: i32) -> (i32, i32) {
    %c0_i32 = arith.constant 0 : i32
    %c0_i32_0 = arith.constant 0 : i32
    %c0_i32_1 = arith.constant 0 : i32
    return %c0_i32, %c0_i32_0 : i32, i32
  }
  func.func @transform_2(%arg0: i32) -> (i32, i32) {
    %c0_i32 = arith.constant 0 : i32
    %c0_i32_0 = arith.constant 0 : i32
    %c0_i32_1 = arith.constant 0 : i32
    return %c0_i32, %c0_i32_0 : i32, i32
  }
  func.func @transform_3(%arg0: i32) -> i32 {
    %c0_i32 = arith.constant 0 : i32
    %c0_i32_0 = arith.constant 0 : i32
    return %c0_i32 : i32
  }
  func.func @transform_4(%arg0: i32) -> (i32, i32) {
    %c0_i32 = arith.constant 0 : i32
    %c0_i32_0 = arith.constant 0 : i32
    %c0_i32_1 = arith.constant 0 : i32
    return %c0_i32, %c0_i32_0 : i32, i32
  }
  func.func @transform_5(%arg0: i32) -> (i32, i32) {
    %c0_i32 = arith.constant 0 : i32
    %c0_i32_0 = arith.constant 0 : i32
    %c0_i32_1 = arith.constant 0 : i32
    return %c0_i32, %c0_i32_0 : i32, i32
  }
  func.func @transform_6(%arg0: i32) -> (i32, i32, i32) {
    %c0_i32 = arith.constant 0 : i32
    %c0_i32_0 = arith.constant 0 : i32
    %c0_i32_1 = arith.constant 0 : i32
    return %arg0, %c0_i32, %c0_i32_0 : i32, i32, i32
  }
}

</mosaic_0001>

<bundles_post_ra>
// kernel: cbam_pallas.1
= control target key start
LH: loop header
LB: loop body
LE: loop exit
PB: predicated region body
PF: predicated region fallthrough
CT: control target
= control target key end

     0   :  { %s4486_s0 = inlined_call_operand.vmem [shape: f32[2,32,256], index: 0, kind: input, shape index: {}]   ;;  %s4487_s1 = inlined_call_operand.vmem [shape: f32[2,32], index: 1, kind: input, shape index: {}]   ;;  %s4488_s2 = inlined_call_operand.vmem [shape: f32[32,2], index: 2, kind: input, shape index: {}]   ;;  %s4489_s3 = inlined_call_operand.vmem [shape: f32[98], index: 3, kind: input, shape index: {}]   ;;  %s4490_s4 = inlined_call_operand.vmem [shape: f32[7,256], index: 4, kind: input, shape index: {}]   ;;  %s4491_s5 = inlined_call_operand.vmem [shape: f32[7,256], index: 5, kind: input, shape index: {}]   ;;  %s4492_s6 = inlined_call_operand.vmem [shape: f32[2,32,256], index: 6, kind: output, shape index: {}]  }
   0x1   :  { %4534 = sst [smem:[#allocation34_spill]] %s4486_s0 }
   0x2   :  { %4535 = sst [smem:[#allocation35_spill]] %s4487_s1 }
   0x3   :  { %4536 = sst [smem:[#allocation36_spill]] %s4488_s2 }
   0x4   :  { %11 = vsyncpa [#allocation3], 0  ;;  %s2908_s21 = smov 0  }
   0x5 LB: > { %s2632_s22 = sadd.s32 4294967295, %s2857_s21   ;;  %p2634_p0 = scmp.ge.s32.totalorder %s2857_s21, 1  ;;  %s2857_s21 = sphi %s2908_s21, %s17_s21  }
   0x6   : > { %p179_p1 = scmp.lt.s32.totalorder %s2857_s21, 3  ;;  %s197_s25 = sshll.u32 %s4489_s3, 4  ;;  %s198_s25 = int_to_ptr.vmem [resolvable:$true] %s197_s25 }
   0x7   : > { %p2758_p3 = scmp.eq.s32.totalorder %s2632_s22, 0  ;;  %s2859_s26 = smov [#allocation2]  }
   0x8   : > { %p180_p2 = pnand %p2634_p0, %p179_p1 }
   0xa   : > { %p2754_p4 = pneg %p180_p2  ;;  %224 = sbr.rel (%p180_p2) target bundleno = 1351 (0x547), region = 44 }
   0xc   : > { %p2755_p5 = pnand %p2758_p3, %p2754_p4 }
   0xe   : > { %2757 = dma.vmem_to_smem (!%p2755_p5), %s198_s25, 16, %s2859_s26, [#allocation3]  }
   0xf   : > { %2852 = dma.done.wait (%p2758_p3), [#allocation3], 16  }
  0x10   : > { %2854 = vsyncadd (%p2758_p3), [#allocation3], 4294967280 }
  0x11   : > { %231 = sfence }
  0x12   : > { %p256_p6 = scmp.lt.s32.totalorder %s2632_s22, 1  ;;  %v313_v0 = vlaneseq  ;;  %s4537_s0 = sld [smem:[#allocation34_spill]]  ;;  %v2860_v39 = vmov 0   ;;  %vm415_vm0 = vcmask 130112   ;;  %vm419_vm1 = vcmask 195712  }
  0x13   : > { %s4538_s1 = sld [smem:[#allocation35_spill]]  ;;  %vm423_vm2 = vcmask 261312   ;;  %vm432_vm3 = vcmask 1041409   ;;  %vm435_vm4 = vcmask 254976   ;;  %vm893_vm5 = vcmask 1042434   ;;  %s2861_s17 = smov 96  }
  0x14   : > { %s4682_s22 = smov (!%p256_p6, %s2632_s22), 1  ;;  %v2922_v1 = vshrl.u32 %v313_v0, 7  ;;  %s4539_s2 = sld [smem:[#allocation36_spill]]  ;;  %vm895_vm6 = vcmask 1043459   ;;  %vm897_vm7 = vcmask 1044484   ;;  %vm899_vm8 = vcmask 1045509  }
  0x15   : > { %s4494_s27 = sshll.u32 %s4682_s22, 6  ;;  %vm901_vm9 = vcmask 1046534   ;;  %vm903_vm10 = vcmask 1047559   ;;  %vm930_vm11 = vcmask 15360   ;;  %s2862_s18 = smov 16  }
  0x16   : > { %2782 = vset.pattern.permute.xlu2 %v2922_v1  ;;  %v321_v2 = vadd.s32 8, %v2922_v1  ;;  %v327_v10 = vadd.s32 16, %v2922_v1  ;;  %v333_v22 = vadd.s32 24, %v2922_v1  ;;  %s2863_s19 = smov 112   ;;  %s2864_s20 = smov 32  }
  0x17   : > { %s2865_s23 = smov 80   ;;  %s2866_s24 = smov 48  }
  0x18   : > { %s2932_s30 = scalar_lea.vmem %s4537_s0, %s4494_s27  ;;  %2783 = vset.pattern.permute.xlu0 %v321_v2  ;;  %2784 = vset.pattern.permute.xlu1 %v327_v10  ;;  %s3441_s25 = sld [smem:[#allocation2 + $0x1a]] }
  0x19   : > { %v270_v3 = vld [vmem:[%s2932_s30 + $0x20] sm:$0xff]  ;;  %v271_v4 = vld [vmem:[%s2932_s30 + $0x28] sm:$0xff]  ;;  %v272_v11 = vld [vmem:[%s2932_s30 + $0x30] sm:$0xff]  ;;  %s3443_s26 = sld [smem:[#allocation2 + $0x4b]] }
  0x1a   : > { %v266_v5 = vld [vmem:[%s2932_s30] sm:$0xff]  ;;  %v289_v6 = vadd.f32 %v271_v4, %v270_v3  ;;  %v267_v7 = vld [vmem:[%s2932_s30 + $0x8] sm:$0xff]  ;;  %v273_v12 = vld [vmem:[%s2932_s30 + $0x38] sm:$0xff]  ;;  %v305_v19 = vmax.f32 %v270_v3, %v271_v4  ;;  %s3447_s28 = sld [smem:[#allocation2 + $0x16]] }
  0x1b   : > { %v299_v8 = vmax.f32 %v266_v5, %v267_v7  ;;  %v283_v9 = vadd.f32 %v267_v7, %v266_v5  ;;  %v268_v13 = vld [vmem:[%s2932_s30 + $0x10] sm:$0xff]  ;;  %v269_v14 = vld [vmem:[%s2932_s30 + $0x18] sm:$0xff]  ;;  %v292_v15 = vadd.f32 %v273_v12, %v272_v11  ;;  %v308_v18 = vmax.f32 %v272_v11, %v273_v12  ;;  %v274_v20 = vld [vmem:[%s4538_s1] sm:$0x3]  ;;  %s3449_s29 = sld [smem:[#allocation2 + $0x47]] }
  0x1c   : > { %290 = vadd.xlane.f32.xlu1 %v289_v6  ;;  %v302_v16 = vmax.f32 %v268_v13, %v269_v14  ;;  %v286_v17 = vadd.f32 %v269_v14, %v268_v13  ;;  %v312_v21 = vperm.slane %v274_v20, 0  ;;  %v337_v23 = vperm.slane %v274_v20, 1  ;;  %v2952_v24 = vld [vmem:[%s4539_s2 + $0x8] sm:$0xff]  ;;  %v275_v26 = vld [vmem:[%s4539_s2] sm:$0xff]  ;;  %v2962_v27 = vld [vmem:[%s4539_s2 + $0x10] sm:$0xff]  ;;  %s3454_s7 = sld [smem:[#allocation2 + $0x48]] }
  0x1d   : > { %300 = vmax.xlane.f32.xlu2 %v299_v8  ;;  %284 = vadd.xlane.f32.xlu0 %v283_v9  ;;  %v528_v25 = vperm.slane %v2952_v24, 4  ;;  %v605_v28 = vperm.slane %v2962_v27, 7  ;;  %v451_v29 = vperm.slane %v275_v26, 1  ;;  %v2969_v30 = vld [vmem:[%s4539_s2 + $0x18] sm:$0xff]  ;;  %v465_v32 = vperm.slane %v275_v26, 3  ;;  %s3461_s10 = sld [smem:[#allocation2 + $0x19]] }
  0x1e   : > { %v626_v31 = vperm.slane %v2969_v30, 2  ;;  %v444_v33 = vperm.slane %v275_v26, 0  ;;  %v647_v34 = vperm.slane %v2969_v30, 5  ;;  %v479_v35 = vperm.slane %v275_v26, 5  ;;  %s3463_s11 = sld [smem:[#allocation2 + $0x4a]] }
  0x1f   : > { %v458_v36 = vperm.slane %v275_v26, 2  ;;  %v493_v37 = vperm.slane %v275_v26, 7  ;;  %v472_v38 = vperm.slane %v275_v26, 4  ;;  %v507_v41 = vperm.slane %v2952_v24, 1  ;;  %s3471_s14 = sld [smem:[#allocation2 + $0x1b]] }
  0x20   : > { %v486_v42 = vperm.slane %v275_v26, 6  ;;  %v521_v45 = vperm.slane %v2952_v24, 3  ;;  %v500_v46 = vperm.slane %v2952_v24, 0  ;;  %v514_v52 = vperm.slane %v2952_v24, 2  ;;  %s3479_s15 = sld [smem:[#allocation2 + $0x4c]] }
  0x21   : > { %v549_v14 = vperm.slane %v2952_v24, 7  ;;  %v556_v20 = vperm.slane %v2962_v27, 0  ;;  %s3483_s16 = sld [smem:[#allocation2 + $0x15]] }
  0x22   : > { %s3562_s8 = sld [smem:[#allocation2 + $0x41]] }
  0x23   : > { %s3570_s9 = sld [smem:[#allocation2 + $0xc]] }
  0x24   : > { %293 = vadd.xlane.f32.xlu1 %v292_v15  ;;  %s3594_s12 = sld [smem:[#allocation2 + $0x5c]] }
  0x25   : > { %303 = vmax.xlane.f32.xlu2 %v302_v16  ;;  %287 = vadd.xlane.f32.xlu0 %v286_v17  ;;  %v563_v16 = vperm.slane %v2962_v27, 1  ;;  %v542_v17 = vperm.slane %v2952_v24, 6  ;;  %s3602_s13 = sld [smem:[#allocation2 + $0x9]] }
  0x26   : > { %s3760_s27 = sld [smem:[#allocation2 + $0x5]] }
  0x27   : > { %s3780_s0 = sld [smem:[#allocation2 + $0x1]] }
  0x28   : > { %s3782_s1 = sld [smem:[#allocation2 + $0x36]] }
  0x29   : > { %s3794_s2 = sld [smem:[#allocation2 + $0x2]] }
  0x2c   : > { %309 = vmax.xlane.f32.xlu1 %v308_v18 }
  0x2d   : > { %306 = vmax.xlane.f32.xlu0 %v305_v19  ;;  %v577_v19 = vperm.slane %v2962_v27, 3 }
  0x3d   : > { %317 = vperm.xlu2 %2782, %v312_v21  }
  0x41   : > { %323 = vperm.xlu0 %2783, %v312_v21  }
  0x45   : > { %2785 = vset.pattern.permute.xlu2 %v333_v22  ;;  %329 = vperm.xlu1 %2784, %v312_v21  }
  0x49   : > { %2792 = vset.pattern.permute.xlu0 %v2922_v1 }
  0x4d   : > { %335 = vperm.xlu2 %2785, %v312_v21   ;;  %2787 = vset.pattern.permute.xlu1 %v321_v2  ;;  %v591_v21 = vperm.slane %v2962_v27, 5 }
  0x51   : > { %533 = vperm.xlu0 %2792, %v528_v25  }
  0x55   : > { %2786 = vset.pattern.permute.xlu2 %v2922_v1  ;;  %348 = vperm.xlu1 %2787, %v337_v23  }
  0x59   : > { %610 = vperm.xlu0 %2792, %v605_v28   ;;  %v633_v28 = vperm.slane %v2969_v30, 3 }
  0x5d   : > { %342 = vperm.xlu2 %2786, %v337_v23   ;;  %2789 = vset.pattern.permute.xlu1 %v333_v22  ;;  %v570_v22 = vperm.slane %v2962_v27, 2 }
  0x61   : > { %631 = vperm.xlu0 %2792, %v626_v31  }
  0x65   : > { %2788 = vset.pattern.permute.xlu2 %v327_v10  ;;  %360 = vperm.xlu1 %2789, %v337_v23   ;;  %v535_v10 = vperm.slane %v2952_v24, 5  ;;  %v584_v24 = vperm.slane %v2962_v27, 4 }
  0x69   : > { %652 = vperm.xlu0 %2792, %v647_v34   ;;  %v619_v34 = vperm.slane %v2969_v30, 1 }
  0x6d   : > { %354 = vperm.xlu2 %2788, %v337_v23   ;;  %2791 = vset.pattern.permute.xlu1 %v2922_v1  ;;  %v612_v23 = vperm.slane %v2969_v30, 0 }
  0x71   : > { %2797 = vset.pattern.permute.xlu0 %v2860_v39 }
  0x75   : > { %456 = vperm.xlu1 %2791, %v451_v29   ;;  %2790 = vset.pattern.permute.xlu2 %v2922_v1  ;;  %v598_v29 = vperm.slane %v2962_v27, 6  ;;  %v640_v27 = vperm.slane %v2969_v30, 4 }
  0x7d   : > { %470 = vperm.xlu1 %2791, %v465_v32   ;;  %449 = vperm.xlu2 %2790, %v444_v33   ;;  %v654_v33 = vperm.slane %v2969_v30, 6 }
  0x85   : > { %484 = vperm.xlu1 %2791, %v479_v35   ;;  %463 = vperm.xlu2 %2790, %v458_v36  }
  0x8d   : > { %498 = vperm.xlu1 %2791, %v493_v37   ;;  %477 = vperm.xlu2 %2790, %v472_v38  }
  0x8f   : > { %v291_v50 = vpop.xlane.xlu1 %290 }
  0x90   : > { %v2974_v40 = vpop.xlane.xlu2 %300  ;;  %v285_v43 = vpop.xlane.xlu0 %284  ;;  %v297_v3 = vmul.f32 0.00390625, %v291_v50 }
  0x91   : > { %v295_v47 = vmul.f32 0.00390625, %v285_v43  ;;  %v661_v43 = vperm.slane %v2969_v30, 7 }
  0x95   : > { %512 = vperm.xlu1 %2791, %v507_v41   ;;  %491 = vperm.xlu2 %2790, %v486_v42  }
  0x97   : > { %v294_v54 = vpop.xlane.xlu1 %293 }
  0x98   : > { %v2977_v44 = vpop.xlane.xlu2 %303  ;;  %v288_v48 = vpop.xlane.xlu0 %287  ;;  %v298_v62 = vmul.f32 0.00390625, %v294_v54 }
  0x99   : > { %v296_v56 = vmul.f32 0.00390625, %v288_v48 }
  0x9d   : > { %526 = vperm.xlu1 %2791, %v521_v45   ;;  %505 = vperm.xlu2 %2790, %v500_v46  }
  0x9f   : > { %v2990_v59 = vpop.xlane.xlu1 %309 }
  0xa0   : > { %v2981_v49 = vpop.permute.xlu2 %317  ;;  %v307_v53 = vpop.xlane.xlu0 %306 }
  0xa1   : > { %v370_v51 = vmul.f32 %v2981_v49, %v295_v47  ;;  %v943_v38 = vmul.f32 %v2981_v49, %v2974_v40 }
  0xa3   : > { %387 = vperm.xlu0 %2797, %v370_v51  }
  0xa5   : > { %519 = vperm.xlu2 %2790, %v514_v52   ;;  %2793 = vset.pattern.permute.xlu1 %v2860_v39 }
  0xa8   : > { %v336_v55 = vpop.permute.xlu2 %335 }
  0xa9   : > { %v373_v63 = vmul.f32 %v336_v55, %v298_v62  ;;  %v946_v13 = vmul.f32 %v336_v55, %v2990_v59 }
  0xad   : > { %2794 = vset.pattern.permute.xlu2 %v2860_v39 }
  0xb3   : > { %v2987_v57 = vpop.permute.xlu0 %323 }
  0xb4   : > { %v371_v58 = vmul.f32 %v2987_v57, %v296_v56  ;;  %v944_v50 = vmul.f32 %v2987_v57, %v2977_v44  ;;  %v3061_v57 = vand.u32 127, %v313_v0 }
  0xb6   : > { %390 = vperm.xlu2 %2794, %v371_v58   ;;  %v421_v0 = vadd.s32 4294967272, %v3061_v57 }
  0xb7   : > { %v2992_v60 = vpop.permute.xlu2 %342  ;;  %v330_v2 = vpop.permute.xlu1 %329 }
  0xb8   : > { %v374_v61 = vmul.f32 %v2992_v60, %v295_v47  ;;  %v372_v4 = vmul.f32 %v330_v2, %v297_v3  ;;  %v945_v9 = vmul.f32 %v330_v2, %v307_v53  ;;  %v947_v46 = vmul.f32 %v2992_v60, %v2974_v40 }
  0xba   : > { %399 = vperm.xlu1 %2793, %v374_v61  }
  0xbe   : > { %396 = vperm.xlu2 %2794, %v373_v63  }
  0xc2   : > { %393 = vperm.xlu1 %2793, %v372_v4  }
  0xc3   : > { %v3029_v36 = vpop.permute.xlu0 %533 }
  0xc7   : > { %v355_v5 = vpop.permute.xlu2 %354  ;;  %v2995_v6 = vpop.permute.xlu1 %348 }
  0xc8   : > { %v376_v7 = vmul.f32 %v355_v5, %v297_v3  ;;  %v375_v8 = vmul.f32 %v2995_v6, %v296_v56  ;;  %v949_v15 = vmul.f32 %v355_v5, %v307_v53  ;;  %v948_v30 = vmul.f32 %v2995_v6, %v2977_v44 }
  0xc9   : > { %v417_v44 = vadd.s32 4294967280, %v3061_v57 }
  0xca   : > { %405 = vperm.xlu2 %2794, %v376_v7   ;;  %402 = vperm.xlu0 %2797, %v375_v8  }
  0xcb   : > { %v3039_v42 = vpop.permute.xlu0 %610 }
  0xd2   : > { %2795 = vset.pattern.permute.xlu2 %v2922_v1  ;;  %966 = vperm.xlu0 %2797, %v945_v9  }
  0xd3   : > { %v3048_v49 = vpop.permute.xlu0 %631 }
  0xd7   : > { %v361_v11 = vpop.permute.xlu1 %360  ;;  %v3005_v18 = vpop.permute.xlu2 %449 }
  0xd8   : > { %v377_v12 = vmul.f32 %v361_v11, %v298_v62  ;;  %v950_v51 = vmul.f32 %v361_v11, %v2990_v59 }
  0xda   : > { %540 = vperm.xlu2 %2795, %v535_v10   ;;  %408 = vperm.xlu1 %2793, %v377_v12  }
  0xdb   : > { %969 = vperm.xlu0 %2797, %v946_v13   ;;  %v3058_v53 = vpop.permute.xlu0 %652 }
  0xe2   : > { %554 = vperm.xlu2 %2795, %v549_v14   ;;  %2796 = vset.pattern.permute.xlu1 %v2922_v1  ;;  %v3011_v1 = vpop.permute.xlu2 %463 }
  0xe3   : > { %978 = vperm.xlu0 %2797, %v949_v15  }
  0xe7   : > { %v3015_v25 = vpop.permute.xlu1 %456 }
  0xea   : > { %568 = vperm.xlu2 %2795, %v563_v16   ;;  %547 = vperm.xlu1 %2796, %v542_v17   ;;  %v3017_v26 = vpop.permute.xlu2 %477 }
  0xef   : > { %v3021_v31 = vpop.permute.xlu1 %470 }
  0xf2   : > { %582 = vperm.xlu2 %2795, %v577_v19   ;;  %561 = vperm.xlu1 %2796, %v556_v20   ;;  %v3023_v32 = vpop.permute.xlu2 %491 }
  0xf7   : > { %v3027_v35 = vpop.permute.xlu1 %484 }
  0xfa   : > { %596 = vperm.xlu2 %2795, %v591_v21   ;;  %575 = vperm.xlu1 %2796, %v570_v22   ;;  %v3031_v37 = vpop.permute.xlu2 %505 }
  0xff   : > { %v3037_v41 = vpop.permute.xlu1 %498 }
 0x102   : > { %617 = vperm.xlu2 %2795, %v612_v23   ;;  %589 = vperm.xlu1 %2796, %v584_v24   ;;  %v3042_v45 = vpop.permute.xlu2 %519 }
 0x107   : > { %v3046_v48 = vpop.permute.xlu1 %512 }
 0x10a   : > { %638 = vperm.xlu2 %2795, %v633_v28   ;;  %603 = vperm.xlu1 %2796, %v598_v29  }
 0x10f   : > { %v3056_v52 = vpop.permute.xlu1 %526 }
 0x110   : > { %v391_v47 = vpop.permute.xlu2 %390 }
 0x112   : > { %659 = vperm.xlu2 %2795, %v654_v33   ;;  %624 = vperm.xlu1 %2796, %v619_v34  }
 0x115   : > { %v388_v56 = vpop.permute.xlu0 %387 }
 0x116   : > { %v412_v62 = vperm.slane %v388_v56, %v3061_v57 }
 0x118   : > { %v397_v40 = vpop.permute.xlu2 %396 }
 0x119   : > { %v422_v10 = vperm.slane %v397_v40, %v421_v0 }
 0x11a   : > { %2798 = vset.pattern.permute.xlu2 %v2860_v39  ;;  %645 = vperm.xlu1 %2796, %v640_v27  }
 0x11b   : > { %960 = vperm.xlu2 %2798, %v943_v38  }
 0x122   : > { %666 = vperm.xlu1 %2796, %v661_v43  }
 0x123   : > { %972 = vperm.xlu2 %2798, %v947_v46  }
 0x124   : > { %v406_v54 = vpop.permute.xlu2 %405 }
 0x125   : > { %v428_v7 = vperm.slane %v406_v54, %v417_v44 }
 0x12a   : > { %2799 = vset.pattern.permute.xlu1 %v2860_v39  ;;  %v3066_v39 = vadd.s32 4294967288, %v3061_v57 }
 0x12b   : > { %981 = vperm.xlu2 %2798, %v950_v51   ;;  %963 = vperm.xlu1 %2799, %v944_v50  }
 0x12c   : > { %v400_v55 = vpop.permute.xlu1 %399  ;;  %v414_v61 = vperm.slane %v391_v47, %v3066_v39 }
 0x12d   : > { %v425_v3 = vperm.slane %v400_v55, %v3061_v57 }
 0x12e   : > { %v416_v4 = vsel %vm415_vm0, %v414_v61, %v412_v62 }
 0x133   : > { %975 = vperm.xlu1 %2799, %v948_v30  }
 0x134   : > { %v3063_v58 = vpop.permute.xlu2 %540  ;;  %v394_v59 = vpop.permute.xlu1 %393 }
 0x135   : > { %v418_v2 = vperm.slane %v394_v59, %v417_v44 }
 0x137   : > { %v420_v8 = vsel %vm419_vm1, %v418_v2, %v416_v4 }
 0x138   : > { %v424_v13 = vsel %vm423_vm2, %v422_v10, %v420_v8 }
 0x13c   : > { %v403_v60 = vpop.permute.xlu0 %402  ;;  %v3075_v5 = vpop.permute.xlu2 %554 }
 0x13d   : > { %v426_v63 = vperm.slane %v403_v60, %v3066_v39 }
 0x13f   : > { %v427_v6 = vsel %vm415_vm0, %v426_v63, %v425_v3 }
 0x140   : > { %v429_v12 = vsel %vm419_vm1, %v428_v7, %v427_v6 }
 0x144   : > { %v3084_v17 = vpop.permute.xlu2 %568  ;;  %v967_v43 = vpop.permute.xlu0 %966 }
 0x145   : > { %v986_v59 = vperm.slane %v967_v43, %v417_v44 }
 0x14c   : > { %v409_v9 = vpop.permute.xlu1 %408  ;;  %v3088_v20 = vpop.permute.xlu2 %582 }
 0x14d   : > { %v430_v11 = vperm.slane %v409_v9, %v421_v0  ;;  %v970_v50 = vpop.permute.xlu0 %969 }
 0x14e   : > { %v988_v4 = vperm.slane %v970_v50, %v421_v0 }
 0x14f   : > { %v431_v14 = vsel %vm423_vm2, %v430_v11, %v429_v12 }
 0x150   : > { %v433_v15 = vsel %vm432_vm3, %v431_v14, %v424_v13 }
 0x151   : > { %v436_v16 = vsel %vm435_vm4, %v433_v15, 0.0 }
 0x152   : > { %437 = vadd.xlane.f32.xlu0 %v436_v16 }
 0x154   : > { %v3092_v22 = vpop.permute.xlu2 %596 }
 0x155   : > { %v979_v55 = vpop.permute.xlu0 %978 }
 0x156   : > { %v993_v2 = vperm.slane %v979_v55, %v417_v44 }
 0x15c   : > { %v3086_v19 = vpop.permute.xlu1 %547  ;;  %v3096_v24 = vpop.permute.xlu2 %617 }
 0x164   : > { %v3090_v21 = vpop.permute.xlu1 %561  ;;  %v3102_v33 = vpop.permute.xlu2 %638 }
 0x16c   : > { %v3094_v23 = vpop.permute.xlu1 %575  ;;  %v3106_v27 = vpop.permute.xlu2 %659 }
 0x174   : > { %v3098_v28 = vpop.permute.xlu1 %589 }
 0x175   : > { %v961_v46 = vpop.permute.xlu2 %960 }
 0x176   : > { %v983_v54 = vperm.slane %v961_v46, %v3061_v57 }
 0x17c   : > { %v3100_v29 = vpop.permute.xlu1 %603 }
 0x17d   : > { %v973_v51 = vpop.permute.xlu2 %972 }
 0x17e   : > { %v990_v62 = vperm.slane %v973_v51, %v3061_v57 }
 0x184   : > { %v3104_v34 = vpop.permute.xlu1 %624 }
 0x185   : > { %v982_v60 = vpop.permute.xlu2 %981 }
 0x186   : > { %v995_v6 = vperm.slane %v982_v60, %v421_v0 }
 0x18c   : > { %v3108_v38 = vpop.permute.xlu1 %645 }
 0x194   : > { %v3110_v47 = vpop.permute.xlu1 %666 }
 0x19d   : > { %v964_v30 = vpop.permute.xlu1 %963 }
 0x19e   : > { %v984_v40 = vperm.slane %v964_v30, %v3066_v39 }
 0x1a0   : > { %v985_v56 = vsel %vm415_vm0, %v984_v40, %v983_v54 }
 0x1a1   : > { %v987_v3 = vsel %vm419_vm1, %v986_v59, %v985_v56 }
 0x1a2   : > { %v989_v9 = vsel %vm423_vm2, %v988_v4, %v987_v3 }
 0x1a5   : > { %v976_v61 = vpop.permute.xlu1 %975 }
 0x1a6   : > { %v991_v63 = vperm.slane %v976_v61, %v3066_v39 }
 0x1a8   : > { %v992_v7 = vsel %vm415_vm0, %v991_v63, %v990_v62 }
 0x1a9   : > { %v994_v8 = vsel %vm419_vm1, %v993_v2, %v992_v7 }
 0x1aa   : > { %v996_v10 = vsel %vm423_vm2, %v995_v6, %v994_v8 }
 0x1ab   : > { %v997_v11 = vsel %vm432_vm3, %v996_v10, %v989_v9 }
 0x1ac   : > { %v999_v12 = vsel %vm435_vm4, %v997_v11, 0.0 }
 0x1ad   : > { %1000 = vadd.xlane.f32.xlu1 %v999_v12 }
 0x1c5   : > { %v438_v13 = vpop.xlane.xlu0 %437 }
 0x1c6   : > { %v439_v39 = vmax.f32 %v438_v13, 0.0 }
 0x1c8   : > { %v700_v44 = vmul.f32 %v3005_v18, %v439_v39  ;;  %v701_v14 = vmul.f32 %v3015_v25, %v439_v39  ;;  %v702_v0 = vmul.f32 %v3011_v1, %v439_v39  ;;  %v704_v15 = vmul.f32 %v3017_v26, %v439_v39 }
 0x1c9   : > { %v703_v16 = vmul.f32 %v3021_v31, %v439_v39  ;;  %v705_v43 = vmul.f32 %v3027_v35, %v439_v39  ;;  %v707_v46 = vmul.f32 %v3037_v41, %v439_v39  ;;  %v706_v50 = vmul.f32 %v3023_v32, %v439_v39 }
 0x1ca   : > { %771 = vperm.xlu1 %2799, %v702_v0   ;;  %768 = vperm.xlu2 %2798, %v701_v14   ;;  %v708_v51 = vmul.f32 %v3031_v37, %v439_v39  ;;  %v710_v30 = vmul.f32 %v3042_v45, %v439_v39  ;;  %v709_v40 = vmul.f32 %v3046_v48, %v439_v39 }
 0x1cb   : > { %765 = vperm.xlu0 %2797, %v700_v44   ;;  %v711_v54 = vmul.f32 %v3056_v52, %v439_v39  ;;  %v713_v55 = vmul.f32 %v3063_v58, %v439_v39  ;;  %v712_v56 = vmul.f32 %v3029_v36, %v439_v39  ;;  %v714_v59 = vmul.f32 %v3086_v19, %v439_v39 }
 0x1cc   : > { %v716_v60 = vmul.f32 %v3090_v21, %v439_v39  ;;  %v715_v61 = vmul.f32 %v3075_v5, %v439_v39  ;;  %v717_v62 = vmul.f32 %v3084_v17, %v439_v39  ;;  %v719_v63 = vmul.f32 %v3088_v20, %v439_v39 }
 0x1cd   : > { %v718_v2 = vmul.f32 %v3094_v23, %v439_v39  ;;  %v720_v3 = vmul.f32 %v3098_v28, %v439_v39  ;;  %v722_v4 = vmul.f32 %v3100_v29, %v439_v39  ;;  %v721_v6 = vmul.f32 %v3092_v22, %v439_v39 }
 0x1ce   : > { %v723_v7 = vmul.f32 %v3039_v42, %v439_v39  ;;  %v725_v8 = vmul.f32 %v3104_v34, %v439_v39  ;;  %v724_v9 = vmul.f32 %v3096_v24, %v439_v39  ;;  %v726_v10 = vmul.f32 %v3048_v49, %v439_v39 }
 0x1cf   : > { %v728_v11 = vmul.f32 %v3108_v38, %v439_v39  ;;  %v727_v12 = vmul.f32 %v3102_v33, %v439_v39  ;;  %v729_v13 = vmul.f32 %v3058_v53, %v439_v39  ;;  %v731_v44 = vmul.f32 %v3110_v47, %v439_v39 }
 0x1d0   : > { %v730_v14 = vmul.f32 %v3106_v27, %v439_v39 }
 0x1d2   : > { %777 = vperm.xlu1 %2799, %v704_v15   ;;  %774 = vperm.xlu2 %2798, %v703_v16  }
 0x1d3   : > { %780 = vperm.xlu0 %2797, %v705_v43  }
 0x1da   : > { %786 = vperm.xlu1 %2799, %v707_v46   ;;  %783 = vperm.xlu2 %2798, %v706_v50  }
 0x1db   : > { %789 = vperm.xlu0 %2797, %v708_v51  }
 0x1e2   : > { %795 = vperm.xlu1 %2799, %v710_v30   ;;  %792 = vperm.xlu2 %2798, %v709_v40  }
 0x1e3   : > { %798 = vperm.xlu0 %2797, %v711_v54  }
 0x1ea   : > { %804 = vperm.xlu1 %2799, %v713_v55   ;;  %801 = vperm.xlu2 %2798, %v712_v56  }
 0x1eb   : > { %807 = vperm.xlu0 %2797, %v714_v59  }
 0x1f2   : > { %813 = vperm.xlu1 %2799, %v716_v60   ;;  %810 = vperm.xlu2 %2798, %v715_v61  }
 0x1f3   : > { %816 = vperm.xlu0 %2797, %v717_v62  }
 0x1fa   : > { %822 = vperm.xlu1 %2799, %v719_v63   ;;  %819 = vperm.xlu2 %2798, %v718_v2  }
 0x1fb   : > { %825 = vperm.xlu0 %2797, %v720_v3  }
 0x202   : > { %831 = vperm.xlu1 %2799, %v722_v4   ;;  %828 = vperm.xlu2 %2798, %v721_v6  }
 0x203   : > { %834 = vperm.xlu0 %2797, %v723_v7  }
 0x20a   : > { %840 = vperm.xlu1 %2799, %v725_v8   ;;  %837 = vperm.xlu2 %2798, %v724_v9  }
 0x20b   : > { %843 = vperm.xlu0 %2797, %v726_v10  }
 0x212   : > { %849 = vperm.xlu1 %2799, %v728_v11   ;;  %846 = vperm.xlu2 %2798, %v727_v12  }
 0x213   : > { %852 = vperm.xlu0 %2797, %v729_v13  }
 0x21a   : > { %858 = vperm.xlu1 %2799, %v731_v44   ;;  %855 = vperm.xlu2 %2798, %v730_v14  }
 0x220   : > { %v1001_v0 = vpop.xlane.xlu1 %1000 }
 0x221   : > { %v3156_v15 = vmax.f32 %v1001_v0, 0.0 }
 0x223   : > { %v1003_v16 = vmul.f32 %v3156_v15, %v3005_v18  ;;  %v1004_v43 = vmul.f32 %v3156_v15, %v3015_v25  ;;  %v1014_v46 = vmul.f32 %v3156_v15, %v3056_v52  ;;  %v1006_v39 = vmul.f32 %v3156_v15, %v3021_v31 }
 0x224   : > { %v769_v50 = vpop.permute.xlu2 %768  ;;  %v1005_v51 = vmul.f32 %v3156_v15, %v3011_v1  ;;  %v1027_v30 = vmul.f32 %v3156_v15, %v3096_v24  ;;  %v1008_v25 = vmul.f32 %v3156_v15, %v3027_v35  ;;  %v1007_v52 = vmul.f32 %v3156_v15, %v3017_v26 }
 0x225   : > { %1071 = vperm.xlu2 %2798, %v1004_v43   ;;  %1068 = vperm.xlu0 %2797, %v1003_v16   ;;  %v1023_v40 = vmul.f32 %v3156_v15, %v3098_v28  ;;  %v1011_v1 = vmul.f32 %v3156_v15, %v3031_v37  ;;  %v1009_v24 = vmul.f32 %v3156_v15, %v3023_v32 }
 0x226   : > { %1101 = vperm.xlu1 %2799, %v1014_v46   ;;  %v1018_v35 = vmul.f32 %v3156_v15, %v3075_v5  ;;  %v861_v28 = vperm.slane %v769_v50, %v3061_v57  ;;  %v1013_v5 = vmul.f32 %v3156_v15, %v3042_v45  ;;  %v1012_v62 = vmul.f32 %v3156_v15, %v3046_v48 }
 0x227   : > { %v1025_v2 = vmul.f32 %v3156_v15, %v3100_v29  ;;  %v1020_v29 = vmul.f32 %v3156_v15, %v3084_v17  ;;  %v1019_v10 = vmul.f32 %v3156_v15, %v3090_v21  ;;  %v1032_v12 = vmul.f32 %v3156_v15, %v3058_v53 }
 0x228   : > { %v1021_v43 = vmul.f32 %v3156_v15, %v3094_v23  ;;  %v1015_v53 = vmul.f32 %v3156_v15, %v3029_v36  ;;  %v1022_v36 = vmul.f32 %v3156_v15, %v3088_v20 }
 0x22c   : > { %v775_v18 = vpop.permute.xlu2 %774 }
 0x22d   : > { %1077 = vperm.xlu2 %2798, %v1006_v39   ;;  %1074 = vperm.xlu0 %2797, %v1005_v51   ;;  %v863_v37 = vperm.slane %v775_v18, %v3061_v57 }
 0x22e   : > { %1140 = vperm.xlu1 %2799, %v1027_v30  }
 0x234   : > { %v784_v31 = vpop.permute.xlu2 %783 }
 0x235   : > { %1083 = vperm.xlu2 %2798, %v1008_v25   ;;  %1080 = vperm.xlu0 %2797, %v1007_v52   ;;  %v866_v48 = vperm.slane %v784_v31, %v3061_v57 }
 0x236   : > { %1128 = vperm.xlu1 %2799, %v1023_v40   ;;  %v1016_v40 = vmul.f32 %v3156_v15, %v3063_v58  ;;  %v1017_v58 = vmul.f32 %v3156_v15, %v3086_v19 }
 0x23c   : > { %v772_v54 = vpop.permute.xlu1 %771  ;;  %v793_v55 = vpop.permute.xlu2 %792 }
 0x23d   : > { %1092 = vperm.xlu2 %2798, %v1011_v1   ;;  %v862_v26 = vperm.slane %v772_v54, %v3061_v57  ;;  %v766_v56 = vpop.permute.xlu0 %765  ;;  %1086 = vperm.xlu0 %2797, %v1009_v24   ;;  %v869_v0 = vperm.slane %v793_v55, %v3061_v57 }
 0x23e   : > { %v860_v59 = vperm.slane %v766_v56, %v3061_v57  ;;  %1113 = vperm.xlu1 %2799, %v1018_v35  }
 0x240   : > { %v892_v32 = vsel %vm432_vm3, %v861_v28, %v860_v59  ;;  %v1028_v28 = vmul.f32 %v3156_v15, %v3104_v34 }
 0x241   : > { %v894_v60 = vsel %vm893_vm5, %v862_v26, %v892_v32 }
 0x242   : > { %v896_v61 = vsel %vm895_vm6, %v863_v37, %v894_v60 }
 0x244   : > { %v778_v63 = vpop.permute.xlu1 %777  ;;  %v802_v4 = vpop.permute.xlu2 %801 }
 0x245   : > { %v864_v3 = vperm.slane %v778_v63, %v3061_v57  ;;  %1098 = vperm.xlu2 %2798, %v1013_v5   ;;  %v781_v6 = vpop.permute.xlu0 %780  ;;  %1095 = vperm.xlu0 %2797, %v1012_v62   ;;  %v872_v25 = vperm.slane %v802_v4, %v3061_v57  ;;  %v1029_v62 = vmul.f32 %v3156_v15, %v3048_v49 }
 0x246   : > { %v865_v45 = vperm.slane %v781_v6, %v3061_v57  ;;  %1134 = vperm.xlu1 %2799, %v1025_v2   ;;  %v1030_v49 = vmul.f32 %v3156_v15, %v3102_v33 }
 0x247   : > { %v898_v7 = vsel %vm897_vm7, %v864_v3, %v896_v61  ;;  %v1010_v61 = vmul.f32 %v3156_v15, %v3037_v41 }
 0x248   : > { %v900_v8 = vsel %vm899_vm8, %v865_v45, %v898_v7 }
 0x249   : > { %v902_v9 = vsel %vm901_vm9, %v866_v48, %v900_v8  ;;  %v1024_v48 = vmul.f32 %v3156_v15, %v3092_v22 }
 0x24c   : > { %v787_v11 = vpop.permute.xlu1 %786  ;;  %v811_v44 = vpop.permute.xlu2 %810 }
 0x24d   : > { %v867_v13 = vperm.slane %v787_v11, %v3061_v57  ;;  %1119 = vperm.xlu2 %2798, %v1020_v29   ;;  %v790_v14 = vpop.permute.xlu0 %789  ;;  %1116 = vperm.xlu0 %2797, %v1019_v10   ;;  %v875_v26 = vperm.slane %v811_v44, %v3061_v57 }
 0x24e   : > { %v868_v16 = vperm.slane %v790_v14, %v3061_v57  ;;  %1155 = vperm.xlu1 %2799, %v1032_v12   ;;  %v1026_v14 = vmul.f32 %v3156_v15, %v3039_v42 }
 0x24f   : > { %v3211_v17 = vsel %vm903_vm10, %v867_v13, %v902_v9 }
 0x250   : > { %v905_v21 = vsel %vm432_vm3, %v869_v0, %v868_v16  ;;  %v1031_v0 = vmul.f32 %v3156_v15, %v3108_v38  ;;  %v1034_v38 = vmul.f32 %v3156_v15, %v3110_v47 }
 0x254   : > { %v796_v46 = vpop.permute.xlu1 %795  ;;  %v820_v39 = vpop.permute.xlu2 %819 }
 0x255   : > { %v870_v50 = vperm.slane %v796_v46, %v3061_v57  ;;  %1122 = vperm.xlu2 %2798, %v1021_v43   ;;  %v799_v51 = vpop.permute.xlu0 %798  ;;  %1104 = vperm.xlu0 %2797, %v1015_v53   ;;  %v878_v34 = vperm.slane %v820_v39, %v3061_v57 }
 0x256   : > { %v871_v18 = vperm.slane %v799_v51, %v3061_v57 }
 0x257   : > { %v906_v30 = vsel %vm893_vm5, %v870_v50, %v905_v21 }
 0x258   : > { %v907_v52 = vsel %vm895_vm6, %v871_v18, %v906_v30  ;;  %v1033_v18 = vmul.f32 %v3156_v15, %v3106_v27 }
 0x259   : > { %v908_v23 = vsel %vm897_vm7, %v872_v25, %v907_v52 }
 0x25c   : > { %v805_v31 = vpop.permute.xlu1 %804  ;;  %v829_v24 = vpop.permute.xlu2 %828 }
 0x25d   : > { %v873_v1 = vperm.slane %v805_v31, %v3061_v57  ;;  %1125 = vperm.xlu2 %2798, %v1022_v36   ;;  %v808_v54 = vpop.permute.xlu0 %807  ;;  %1107 = vperm.xlu0 %2797, %v1016_v40   ;;  %v881_v8 = vperm.slane %v829_v24, %v3061_v57 }
 0x25e   : > { %v874_v55 = vperm.slane %v808_v54, %v3061_v57 }
 0x25f   : > { %v909_v35 = vsel %vm899_vm8, %v873_v1, %v908_v23 }
 0x260   : > { %v910_v56 = vsel %vm901_vm9, %v874_v55, %v909_v35 }
 0x261   : > { %v3234_v20 = vsel %vm903_vm10, %v875_v26, %v910_v56 }
 0x262   : > { %v934_v15 = vsel %vm930_vm11, %v3234_v20, 0.0 }
 0x264   : > { %v814_v59 = vpop.permute.xlu1 %813  ;;  %v838_v37 = vpop.permute.xlu2 %837 }
 0x265   : > { %1110 = vperm.xlu2 %2798, %v1017_v58   ;;  %v817_v32 = vpop.permute.xlu0 %816  ;;  %1143 = vperm.xlu0 %2797, %v1028_v28   ;;  %v876_v60 = vperm.slane %v814_v59, %v3061_v57  ;;  %v884_v21 = vperm.slane %v838_v37, %v3061_v57  ;;  %v931_v58 = vsel %vm930_vm11, %v3211_v17, 0.0 }
 0x266   : > { %v877_v5 = vperm.slane %v817_v32, %v3061_v57 }
 0x268   : > { %v912_v19 = vsel %vm432_vm3, %v877_v5, %v876_v60 }
 0x269   : > { %v913_v6 = vsel %vm893_vm5, %v878_v34, %v912_v19 }
 0x26c   : > { %v823_v63 = vpop.permute.xlu1 %822  ;;  %v847_v3 = vpop.permute.xlu2 %846 }
 0x26d   : > { %v879_v2 = vperm.slane %v823_v63, %v3061_v57  ;;  %1089 = vperm.xlu2 %2798, %v1010_v61   ;;  %v826_v4 = vpop.permute.xlu0 %825  ;;  %1146 = vperm.xlu0 %2797, %v1029_v62   ;;  %v887_v51 = vperm.slane %v847_v3, %v3061_v57 }
 0x26e   : > { %v880_v7 = vperm.slane %v826_v4, %v3061_v57 }
 0x26f   : > { %v914_v41 = vsel %vm895_vm6, %v879_v2, %v913_v6 }
 0x270   : > { %v915_v45 = vsel %vm897_vm7, %v880_v7, %v914_v41 }
 0x271   : > { %v916_v11 = vsel %vm899_vm8, %v881_v8, %v915_v45 }
 0x274   : > { %v832_v9 = vpop.permute.xlu1 %831  ;;  %v856_v12 = vpop.permute.xlu2 %855 }
 0x275   : > { %v882_v29 = vperm.slane %v832_v9, %v3061_v57  ;;  %1149 = vperm.xlu2 %2798, %v1030_v49   ;;  %v835_v10 = vpop.permute.xlu0 %834  ;;  %1131 = vperm.xlu0 %2797, %v1024_v48   ;;  %v890_v32 = vperm.slane %v856_v12, %v3061_v57 }
 0x276   : > { %v883_v13 = vperm.slane %v835_v10, %v3061_v57 }
 0x277   : > { %v917_v33 = vsel %vm901_vm9, %v882_v29, %v916_v11 }
 0x278   : > { %v918_v44 = vsel %vm903_vm10, %v883_v13, %v917_v33 }
 0x279   : > { %v937_v22 = vsel %vm930_vm11, %v918_v44, 0.0 }
 0x27a   : > { %938 = vadd.xlane.f32.xlu1 %v937_v22 }
 0x27c   : > { %v841_v16 = vpop.permute.xlu1 %840 }
 0x27d   : > { %v885_v43 = vperm.slane %v841_v16, %v3061_v57  ;;  %1137 = vperm.xlu2 %2798, %v1026_v14   ;;  %v844_v53 = vpop.permute.xlu0 %843  ;;  %1152 = vperm.xlu0 %2797, %v1031_v0  }
 0x27e   : > { %v886_v50 = vperm.slane %v844_v53, %v3061_v57 }
 0x27f   : > { %v919_v46 = vsel %vm432_vm3, %v885_v43, %v884_v21  ;;  %v1072_v39 = vpop.permute.xlu2 %1071 }
 0x280   : > { %v920_v42 = vsel %vm893_vm5, %v886_v50, %v919_v46  ;;  %v1164_v2 = vperm.slane %v1072_v39, %v3061_v57 }
 0x281   : > { %v921_v30 = vsel %vm895_vm6, %v887_v51, %v920_v42 }
 0x284   : > { %v850_v1 = vpop.permute.xlu1 %849 }
 0x285   : > { %1161 = vperm.xlu2 %2798, %v1034_v38   ;;  %1158 = vperm.xlu0 %2797, %v1033_v18   ;;  %v853_v23 = vpop.permute.xlu0 %852  ;;  %v888_v55 = vperm.slane %v850_v1, %v3061_v57 }
 0x286   : > { %v889_v47 = vperm.slane %v853_v23, %v3061_v57 }
 0x287   : > { %v1078_v25 = vpop.permute.xlu2 %1077  ;;  %v922_v27 = vsel %vm897_vm7, %v888_v55, %v921_v30 }
 0x288   : > { %v923_v28 = vsel %vm899_vm8, %v889_v47, %v922_v27  ;;  %v1166_v49 = vperm.slane %v1078_v25, %v3061_v57 }
 0x289   : > { %v924_v5 = vsel %vm901_vm9, %v890_v32, %v923_v28 }
 0x28c   : > { %v859_v26 = vpop.permute.xlu1 %858 }
 0x28d   : > { %v891_v59 = vperm.slane %v859_v26, %v3061_v57 }
 0x28f   : > { %v1084_v52 = vpop.permute.xlu2 %1083  ;;  %v925_v61 = vsel %vm903_vm10, %v891_v59, %v924_v5 }
 0x290   : > { %v940_v62 = vsel %vm930_vm11, %v925_v61, 0.0  ;;  %v1168_v9 = vperm.slane %v1084_v52, %v3061_v57 }
 0x297   : > { %v1093_v36 = vpop.permute.xlu2 %1092  ;;  %v1069_v40 = vpop.permute.xlu0 %1068 }
 0x298   : > { %v1102_v60 = vpop.permute.xlu1 %1101  ;;  %v1163_v17 = vperm.slane %v1069_v40, %v3061_v57  ;;  %v1171_v44 = vperm.slane %v1093_v36, %v3061_v57 }
 0x299   : > { %v1174_v46 = vperm.slane %v1102_v60, %v3061_v57 }
 0x29a   : > { %v1195_v4 = vsel %vm432_vm3, %v1164_v2, %v1163_v17 }
 0x29f   : > { %v1099_v31 = vpop.permute.xlu2 %1098  ;;  %v1075_v24 = vpop.permute.xlu0 %1074 }
 0x2a0   : > { %v3297_v63 = vpop.permute.xlu1 %1140  ;;  %v1165_v34 = vperm.slane %v1075_v24, %v3061_v57  ;;  %v1173_v21 = vperm.slane %v1099_v31, %v3061_v57 }
 0x2a2   : > { %v1196_v7 = vsel %vm893_vm5, %v1165_v34, %v1195_v4  ;;  %v1187_v34 = vperm.slane %v3297_v63, %v3061_v57 }
 0x2a3   : > { %v1197_v45 = vsel %vm895_vm6, %v1166_v49, %v1196_v7 }
 0x2a7   : > { %v3279_v54 = vpop.permute.xlu2 %1119  ;;  %v1081_v35 = vpop.permute.xlu0 %1080 }
 0x2a8   : > { %v1167_v41 = vperm.slane %v1081_v35, %v3061_v57  ;;  %v1129_v29 = vpop.permute.xlu1 %1128  ;;  %v1180_v24 = vperm.slane %v3279_v54, %v3061_v57 }
 0x2a9   : > { %v1183_v28 = vperm.slane %v1129_v29, %v3061_v57 }
 0x2aa   : > { %v1198_v48 = vsel %vm897_vm7, %v1167_v41, %v1197_v45 }
 0x2ab   : > { %v1199_v33 = vsel %vm899_vm8, %v1168_v9, %v1198_v48 }
 0x2ae   : > { %935 = vadd.xlane.f32.xlu2 %v934_v15 }
 0x2af   : > { %v3286_v56 = vpop.permute.xlu2 %1122  ;;  %932 = vadd.xlane.f32.xlu0 %v931_v58  ;;  %v1087_v37 = vpop.permute.xlu0 %1086 }
 0x2b0   : > { %v1169_v8 = vperm.slane %v1087_v37, %v3061_v57  ;;  %v1114_v50 = vpop.permute.xlu1 %1113  ;;  %v1181_v26 = vperm.slane %v3286_v56, %v3061_v57 }
 0x2b1   : > { %v1178_v18 = vperm.slane %v1114_v50, %v3061_v57 }
 0x2b2   : > { %v1200_v22 = vsel %vm901_vm9, %v1169_v8, %v1199_v33 }
 0x2b7   : > { %v1126_v20 = vpop.permute.xlu2 %1125  ;;  %941 = vadd.xlane.f32.xlu0 %v940_v62  ;;  %v1096_v19 = vpop.permute.xlu0 %1095 }
 0x2b8   : > { %v1172_v10 = vperm.slane %v1096_v19, %v3061_v57  ;;  %v1182_v27 = vperm.slane %v1126_v20, %v3061_v57  ;;  %v1135_v15 = vpop.permute.xlu1 %1134 }
 0x2b9   : > { %v1185_v54 = vperm.slane %v1135_v15, %v3061_v57 }
 0x2ba   : > { %v1202_v0 = vsel %vm432_vm3, %v1172_v10, %v1171_v44 }
 0x2bb   : > { %v1203_v43 = vsel %vm893_vm5, %v1173_v21, %v1202_v0 }
 0x2bc   : > { %v1204_v51 = vsel %vm895_vm6, %v1174_v46, %v1203_v43 }
 0x2bf   : > { %v1111_v3 = vpop.permute.xlu2 %1110  ;;  %v1117_v6 = vpop.permute.xlu0 %1116 }
 0x2c0   : > { %v1177_v30 = vperm.slane %v1111_v3, %v3061_v57  ;;  %v1179_v31 = vperm.slane %v1117_v6, %v3061_v57  ;;  %v1156_v41 = vpop.permute.xlu1 %1155 }
 0x2c1   : > { %v1192_v8 = vperm.slane %v1156_v41, %v3061_v57 }
 0x2c2   : > { %v1209_v55 = vsel %vm432_vm3, %v1180_v24, %v1179_v31 }
 0x2c3   : > { %v1210_v47 = vsel %vm893_vm5, %v1181_v26, %v1209_v55 }
 0x2c4   : > { %v1211_v58 = vsel %vm895_vm6, %v1182_v27, %v1210_v47 }
 0x2c5   : > { %v1212_v60 = vsel %vm897_vm7, %v1183_v28, %v1211_v58 }
 0x2c7   : > { %v1090_v11 = vpop.permute.xlu2 %1089  ;;  %v1105_v13 = vpop.permute.xlu0 %1104 }
 0x2c8   : > { %v1170_v12 = vperm.slane %v1090_v11, %v3061_v57  ;;  %v1175_v53 = vperm.slane %v1105_v13, %v3061_v57 }
 0x2ca   : > { %v1201_v14 = vsel %vm903_vm10, %v1170_v12, %v1200_v22  ;;  %v1205_v38 = vsel %vm897_vm7, %v1175_v53, %v1204_v51 }
 0x2cb   : > { %v1227_v16 = vsel %vm930_vm11, %v1201_v14, 0.0 }
 0x2cc   : > { %1228 = vadd.xlane.f32.xlu1 %v1227_v16 }
 0x2cf   : > { %v1108_v39 = vpop.permute.xlu0 %1107  ;;  %v1150_v1 = vpop.permute.xlu2 %1149 }
 0x2d0   : > { %v1176_v42 = vperm.slane %v1108_v39, %v3061_v57  ;;  %v1190_v7 = vperm.slane %v1150_v1, %v3061_v57 }
 0x2d2   : > { %v1206_v25 = vsel %vm899_vm8, %v1176_v42, %v1205_v38 }
 0x2d3   : > { %v1207_v52 = vsel %vm901_vm9, %v1177_v30, %v1206_v25 }
 0x2d4   : > { %v1208_v23 = vsel %vm903_vm10, %v1178_v18, %v1207_v52 }
 0x2d5   : > { %v1230_v36 = vsel %vm930_vm11, %v1208_v23, 0.0 }
 0x2d6   : > { %1231 = vadd.xlane.f32.xlu0 %v1230_v36 }
 0x2d7   : > { %v1144_v40 = vpop.permute.xlu0 %1143  ;;  %v1138_v59 = vpop.permute.xlu2 %1137 }
 0x2d8   : > { %v1186_v5 = vperm.slane %v1138_v59, %v3061_v57  ;;  %v1188_v62 = vperm.slane %v1144_v40, %v3061_v57 }
 0x2da   : > { %v1216_v3 = vsel %vm432_vm3, %v1188_v62, %v1187_v34 }
 0x2df   : > { %v1147_v35 = vpop.permute.xlu0 %1146  ;;  %v1162_v45 = vpop.permute.xlu2 %1161 }
 0x2e0   : > { %v1189_v17 = vperm.slane %v1147_v35, %v3061_v57  ;;  %v1194_v29 = vperm.slane %v1162_v45, %v3061_v57 }
 0x2e2   : > { %v1217_v4 = vsel %vm893_vm5, %v1189_v17, %v1216_v3 }
 0x2e3   : > { %v1218_v49 = vsel %vm895_vm6, %v1190_v7, %v1217_v4 }
 0x2e7   : > { %v1132_v37 = vpop.permute.xlu0 %1131 }
 0x2e8   : > { %v1184_v32 = vperm.slane %v1132_v37, %v3061_v57 }
 0x2ea   : > { %v1213_v56 = vsel %vm899_vm8, %v1184_v32, %v1212_v60 }
 0x2eb   : > { %v1214_v61 = vsel %vm901_vm9, %v1185_v54, %v1213_v56 }
 0x2ec   : > { %v1215_v20 = vsel %vm903_vm10, %v1186_v5, %v1214_v61 }
 0x2ed   : > { %v1233_v19 = vsel %vm930_vm11, %v1215_v20, 0.0  ;;  %v939_v22 = vpop.xlane.xlu1 %938 }
 0x2ee   : > { %1234 = vadd.xlane.f32.xlu2 %v1233_v19 }
 0x2ef   : > { %v1153_v2 = vpop.permute.xlu0 %1152 }
 0x2f0   : > { %v1191_v6 = vperm.slane %v1153_v2, %v3061_v57 }
 0x2f2   : > { %v1219_v48 = vsel %vm897_vm7, %v1191_v6, %v1218_v49 }
 0x2f3   : > { %v1220_v10 = vsel %vm899_vm8, %v1192_v8, %v1219_v48 }
 0x2f7   : > { %v1159_v9 = vpop.permute.xlu0 %1158 }
 0x2f8   : > { %v1193_v63 = vperm.slane %v1159_v9, %v3061_v57 }
 0x2fa   : > { %v1221_v11 = vsel %vm901_vm9, %v1193_v63, %v1220_v10 }
 0x2fb   : > { %v1222_v12 = vsel %vm903_vm10, %v1194_v29, %v1221_v11 }
 0x2fc   : > { %v1236_v13 = vsel %vm930_vm11, %v1222_v12, 0.0 }
 0x2fd   : > { %1237 = vadd.xlane.f32.xlu1 %v1236_v13  ;;  %v2824_v13 = vld [vmem:[%s2932_s30 + $0x18] sm:$0xff] }
 0x321   : > { %v936_v16 = vpop.xlane.xlu2 %935 }
 0x322   : > { %v933_v33 = vpop.xlane.xlu0 %932 }
 0x32a   : > { %v942_v44 = vpop.xlane.xlu0 %941 }
 0x33f   : > { %v1229_v0 = vpop.xlane.xlu1 %1228 }
 0x340   : > { %v1239_v43 = vadd.f32 %v1229_v0, %v933_v33  ;;  %v2826_v0 = vld [vmem:[%s2932_s30 + $0x28] sm:$0xff] }
 0x342   : > { %v2643_v46 = vmul.f32 -1.442695, %v1239_v43  ;;  %v2827_v43 = vld [vmem:[%s2932_s30 + $0x20] sm:$0xff] }
 0x349   : > { %v1232_v14 = vpop.xlane.xlu0 %1231 }
 0x34a   : > { %v1240_v21 = vadd.f32 %v1232_v14, %v936_v16 }
 0x34c   : > { %v2644_v53 = vmul.f32 -1.442695, %v1240_v21 }
 0x34e   : > { %2800 = vpow2.f32 %v2644_v53 }
 0x34f   : > { %2802 = vpow2.f32 %v2643_v46 }
 0x354   : > { %v2801_v51 = vpop.eup %2800 }
 0x355   : > { %v2803_v30 = vpop.eup %2802  ;;  %v1256_v38 = vadd.f32 1.0, %v2801_v51  ;;  %v2828_v51 = vld [vmem:[%s2932_s30] sm:$0xff] }
 0x356   : > { %v1255_v18 = vadd.f32 1.0, %v2803_v30  ;;  %v2829_v30 = vld [vmem:[%s2932_s30 + $0x10] sm:$0xff] }
 0x357   : > { %v1285_v56 = vand.u32 2147483648, %v1256_v38  ;;  %vm1279_vm14 = vweird.f32 %v1256_v38  ;;  %v1283_v61 = vand.u32 2147483647, %v1256_v38 }
 0x358   : > { %v1270_v5 = vand.u32 2147483648, %v1255_v18  ;;  %vm1264_vm0 = vweird.f32 %v1255_v18  ;;  %v1268_v62 = vand.u32 2147483647, %v1255_v18 }
 0x359   : > { %v1286_v7 = vor.u32 1.1754944e-38, %v1285_v56  ;;  %vm1284_vm5 = vcmp.eq.f32.partialorder %v1283_v61, 8.507059e+37 }
 0x35a   : > { %v1271_v49 = vor.u32 1.1754944e-38, %v1270_v5  ;;  %vm1269_vm6 = vcmp.eq.f32.partialorder %v1268_v62, 8.507059e+37 }
 0x361   : > { %v1235_v50 = vpop.xlane.xlu2 %1234 }
 0x362   : > { %v1241_v39 = vadd.f32 %v1235_v50, %v939_v22  ;;  %v2825_v22 = vld [vmem:[%s2932_s30 + $0x8] sm:$0xff] }
 0x364   : > { %v2645_v42 = vmul.f32 -1.442695, %v1241_v39 }
 0x366   : > { %2804 = vpow2.f32 %v2645_v42 }
 0x367   : > { %2806 = vrcp.f32 %v1256_v38 }
 0x368   : > { %2808 = vrcp.f32 %v1255_v18 }
 0x36c   : > { %v2805_v25 = vpop.eup %2804 }
 0x36d   : > { %v1257_v52 = vadd.f32 1.0, %v2805_v25  ;;  %v2807_v36 = vpop.eup %2806 }
 0x36e   : > { %v2809_v31 = vpop.eup %2808  ;;  %v1275_v24 = vmul.f32 %v2807_v36, %v1256_v38  ;;  %vm1280_vm12 = vweird.f32 %v2807_v36 }
 0x36f   : > { %2810 = vrcp.f32 %v1257_v52  ;;  %v1260_v55 = vmul.f32 %v2809_v31, %v1255_v18  ;;  %vm1265_vm13 = vweird.f32 %v2809_v31  ;;  %vm3365_vm1 = vmor %vm1279_vm14, %vm1280_vm12  ;;  %v1300_v17 = vand.u32 2147483648, %v1257_v52  ;;  %v2830_v18 = vld [vmem:[%s2932_s30 + $0x30] sm:$0xff] }
 0x370   : > { %v1238_v23 = vpop.xlane.xlu1 %1237  ;;  %v1276_v47 = vsub.f32 1.0, %v1275_v24  ;;  %vm3369_vm2 = vmor %vm1264_vm0, %vm1265_vm13  ;;  %vm1294_vm3 = vweird.f32 %v1257_v52  ;;  %v1298_v4 = vand.u32 2147483647, %v1257_v52  ;;  %vm1493_vm12 = vcmp.lt.s32.totalorder %v3061_v57, 96 }
 0x371   : > { %v1242_v40 = vadd.f32 %v1238_v23, %v942_v44  ;;  %v1261_v27 = vsub.f32 1.0, %v1260_v55  ;;  %v1301_v8 = vor.u32 1.1754944e-38, %v1300_v17  ;;  %vm1464_vm13 = vcmp.lt.s32.totalorder %v3061_v57, 112 }
 0x372   : > { %v1277_v28 = vmul.f32 %v2807_v36, %v1276_v47  ;;  %vm1299_vm7 = vcmp.eq.f32.partialorder %v1298_v4, 8.507059e+37  ;;  %vm1390_vm14 = vcmp.lt.s32.totalorder %v3061_v57, 32  ;;  %vm1522_vm0 = vcmp.lt.s32.totalorder %v3061_v57, 80 }
 0x373   : > { %v2646_v1 = vmul.f32 -1.442695, %v1242_v40  ;;  %v1262_v37 = vmul.f32 %v2809_v31, %v1261_v27 }
 0x374   : > { %v1278_v54 = vadd.f32 %v2807_v36, %v1277_v28 }
 0x375   : > { %v2811_v35 = vpop.eup %2810  ;;  %2812 = vpow2.f32 %v2646_v1  ;;  %v1263_v60 = vadd.f32 %v2809_v31, %v1262_v37 }
 0x376   : > { %v1290_v26 = vmul.f32 %v2811_v35, %v1257_v52  ;;  %vm1295_vm15 = vweird.f32 %v2811_v35  ;;  %v1282_v3 = vsel %vm3365_vm1, %v2807_v36, %v1278_v54  ;;  %v2831_v52 = vld [vmem:[%s2932_s30 + $0x38] sm:$0xff]  ;;  %s3451_s30 = sld [smem:[#allocation2 + $0x17]]  ;;  %vm1373_vm1 = vcmp.lt.s32.totalorder %v3061_v57, 48 }
 0x377   : > { %v1267_v6 = vsel %vm3369_vm2, %v2809_v31, %v1263_v60  ;;  %vm1296_vm4 = vmor %vm1294_vm3, %vm1295_vm15  ;;  %v1287_v48 = vsel %vm1284_vm5, %v1286_v7, %v1282_v3  ;;  %vm1419_vm15 = vcmp.lt.s32.totalorder %v3061_v57, 16  ;;  %vm2317_vm2 = vcmp.lt.s32.totalorder %v3061_v57, 126 }
 0x378   : > { %v1291_v15 = vsub.f32 1.0, %v1290_v26  ;;  %v1272_v63 = vsel %vm1269_vm6, %v1271_v49, %v1267_v6  ;;  %v3378_v33 = vmul.f32 %v2824_v13, %v1287_v48  ;;  %v3395_v38 = vmul.f32 %v2829_v30, %v1287_v48  ;;  %v3468_v13 = vld [vmem:[%s4490_s4] sm:$0x7f] }
 0x379   : > { %v3381_v14 = vmul.f32 %v2825_v22, %v1272_v63  ;;  %v3392_v42 = vmul.f32 %v2828_v51, %v1272_v63  ;;  %vm2184_vm3 = vcmp.lt.s32.totalorder %v3061_v57, 127  ;;  %vm1792_vm5 = vcmp.lt.s32.totalorder %v3061_v57, 2 }
 0x37a   : > { %v1292_v32 = vmul.f32 %v2811_v35, %v1291_v15  ;;  %4544 = vst [vmem:[#allocation5_spill] sm:$0xff] %v3378_v33  ;;  %vm2450_vm6 = vcmp.lt.s32.totalorder %v3061_v57, 125 }
 0x37b   : > { %v2813_v58 = vpop.eup %2812  ;;  %4545 = vst [vmem:[#allocation6_spill] sm:$0xff] %v3381_v14  ;;  %v1336_v50 = vadd.f32 %v3378_v33, %v3381_v14  ;;  %v1327_v61 = vadd.f32 %v3395_v38, %v3392_v42 }
 0x37c   : > { %v1258_v59 = vadd.f32 1.0, %v2813_v58  ;;  %v1293_v20 = vadd.f32 %v2811_v35, %v1292_v32  ;;  %4548 = vst [vmem:[#allocation9_spill] sm:$0xff] %v3392_v42 }
 0x37d   : > { %4549 = vst [vmem:[#allocation10_spill] sm:$0xff] %v3395_v38 }
 0x37e   : > { %2814 = vrcp.f32 %v1258_v59  ;;  %v1297_v45 = vsel %vm1296_vm4, %v2811_v35, %v1293_v20  ;;  %v1315_v29 = vand.u32 2147483648, %v1258_v59  ;;  %v1313_v12 = vand.u32 2147483647, %v1258_v59 }
 0x37f   : > { %v1302_v10 = vsel %vm1299_vm7, %v1301_v8, %v1297_v45  ;;  %vm1309_vm9 = vweird.f32 %v1258_v59  ;;  %vm1925_vm4 = vcmp.lt.s32.totalorder %v3061_v57, 1  ;;  %vm1665_vm7 = vcmp.lt.s32.totalorder %v3061_v57, 3 }
 0x380   : > { %v3384_v16 = vmul.f32 %v2826_v0, %v1302_v10  ;;  %v1316_v21 = vor.u32 1.1754944e-38, %v1315_v29  ;;  %v3387_v53 = vmul.f32 %v2827_v43, %v1302_v10  ;;  %vm1314_vm11 = vcmp.eq.f32.partialorder %v1313_v12, 8.507059e+37 }
 0x381   : > { %v2230_v43 = vstv %s3443_s26  ;;  %s3527_s26 = sld [smem:[#allocation2 + $0x4e]] }
 0x382   : > { %4546 = vst [vmem:[#allocation7_spill] sm:$0xff] %v3384_v16  ;;  %v1337_v36 = vadd.f32 %v1336_v50, %v3384_v16  ;;  %v1347_v40 = vmax.f32 %v3392_v42, %v3387_v53  ;;  %v1356_v31 = vmax.f32 %v3381_v14, %v3384_v16  ;;  %v1328_v17 = vadd.f32 %v1327_v61, %v3387_v53 }
 0x383   : > { %4547 = vst [vmem:[#allocation8_spill] sm:$0xff] %v3387_v53 }
 0x384   : > { %v2815_v34 = vpop.eup %2814 }
 0x385   : > { %v1305_v41 = vmul.f32 %v2815_v34, %v1258_v59  ;;  %vm1310_vm8 = vweird.f32 %v2815_v34 }
 0x386   : > { %vm1311_vm10 = vmor %vm1309_vm9, %vm1310_vm8 }
 0x387   : > { %v1306_v9 = vsub.f32 1.0, %v1305_v41 }
 0x389   : > { %v1307_v11 = vmul.f32 %v2815_v34, %v1306_v9 }
 0x38b   : > { %v1308_v44 = vadd.f32 %v2815_v34, %v1307_v11  ;;  %v3459_v11 = vld [vmem:[%s4490_s4 + $0x8] sm:$0x7f] }
 0x38d   : > { %v1312_v46 = vsel %vm1311_vm10, %v2815_v34, %v1308_v44 }
 0x38e   : > { %v1317_v39 = vsel %vm1314_vm11, %v1316_v21, %v1312_v46  ;;  %v2226_v21 = vstv %s3441_s25  ;;  %s3521_s25 = sld [smem:[#allocation2 + $0x39]] }
 0x38f   : > { %v3398_v25 = vmul.f32 %v2830_v18, %v1317_v39  ;;  %v3401_v23 = vmul.f32 %v2831_v52, %v1317_v39  ;;  %v1701_v18 = vstv %s3447_s28  ;;  %v1705_v52 = vstv %s3449_s29  ;;  %s3533_s28 = sld [smem:[#allocation2 + $0x3a]] }
 0x390   : > { %s3539_s29 = sld [smem:[#allocation2 + $0x4f]] }
 0x391   : > { %4550 = vst [vmem:[#allocation11_spill] sm:$0xff] %v3398_v25  ;;  %v1348_v1 = vmax.f32 %v3395_v38, %v3398_v25  ;;  %v1357_v24 = vmax.f32 %v3378_v33, %v3401_v23  ;;  %v1338_v35 = vadd.f32 %v1337_v36, %v3401_v23  ;;  %v1329_v34 = vadd.f32 %v1328_v17, %v3398_v25 }
 0x392   : > { %4551 = vst [vmem:[#allocation12_spill] sm:$0xff] %v3401_v23 }
 0x393   : > { %v1349_v55 = vmax.f32 %v1347_v40, %v1348_v1  ;;  %v1358_v26 = vmax.f32 %v1356_v31, %v1357_v24  ;;  %v1339_v15 = vrot.slane %v1338_v35, 4  ;;  %v1330_v3 = vrot.slane %v1329_v34, 4 }
 0x394   : > { %v1834_v40 = vstv %s3451_s30  ;;  %v1838_v31 = vstv %s3454_s7  ;;  %s3545_s30 = sld [smem:[#allocation2 + $0x44]] }
 0x395   : > { %v1350_v47 = vrot.slane %v1349_v55, 4  ;;  %v1359_v27 = vrot.slane %v1358_v26, 4  ;;  %v1340_v32 = vadd.f32 %v1339_v15, %v1338_v35  ;;  %v1331_v6 = vadd.f32 %v1330_v3, %v1329_v34  ;;  %s3553_s7 = sld [smem:[#allocation2 + $0x40]] }
 0x396   : > { %v2097_v15 = vstv %s3463_s11  ;;  %s3590_s11 = sld [smem:[#allocation2 + $0x8]] }
 0x397   : > { %v1360_v58 = vmax.f32 %v1358_v26, %v1359_v27  ;;  %v1351_v28 = vmax.f32 %v1349_v55, %v1350_v47  ;;  %v1341_v20 = vrot.slane %v1340_v32, 2  ;;  %v1332_v41 = vrot.slane %v1331_v6, 2 }
 0x398   : > { %v2093_v27 = vstv %s3461_s10  ;;  %s3577_s10 = sld [smem:[#allocation2 + $0x60]] }
 0x399   : > { %v1361_v59 = vrot.slane %v1360_v58, 2  ;;  %v1352_v37 = vrot.slane %v1351_v28, 2  ;;  %v1342_v2 = vadd.f32 %v1341_v20, %v1340_v32  ;;  %v1333_v45 = vadd.f32 %v1332_v41, %v1331_v6 }
 0x39b   : > { %v1362_v54 = vmax.f32 %v1360_v58, %v1361_v59  ;;  %v1353_v60 = vmax.f32 %v1351_v28, %v1352_v37  ;;  %v1343_v4 = vrot.slane %v1342_v2, 1  ;;  %v1334_v48 = vrot.slane %v1333_v45, 1 }
 0x39c   : > { %v2359_v59 = vstv %s3471_s14  ;;  %v2363_v37 = vstv %s3479_s15  ;;  %s3606_s14 = sld [smem:[#allocation2 + $0x5d]] }
 0x39d   : > { %v1363_v5 = vrot.slane %v1362_v54, 1  ;;  %v1354_v56 = vrot.slane %v1353_v60, 1  ;;  %v1344_v7 = vadd.f32 %v1343_v4, %v1342_v2  ;;  %v1335_v8 = vadd.f32 %v1334_v48, %v1333_v45  ;;  %s3612_s15 = sld [smem:[#allocation2 + $0x28]] }
 0x39f   : > { %v3415_v62 = vmax.f32 %v1362_v54, %v1363_v5  ;;  %v3417_v19 = vmax.f32 %v1353_v60, %v1354_v56  ;;  %v1346_v49 = vmul.f32 0.03125, %v1344_v7  ;;  %v1345_v9 = vmul.f32 0.03125, %v1335_v8 }
 0x3a0   : > { %v1574_v60 = vstv %s3483_s16  ;;  %s3629_s16 = sld [smem:[#allocation2 + $0x24]] }
 0x3a1   : > { %1491 = vrot.lane.b32.xlu0 %v3415_v62, %s2861_s17  ;;  %1413 = vrot.lane.b32.xlu1 %v3417_v19, %s2862_s18  ;;  %v1445_v29 = vrot.slane %v1346_v49, 5  ;;  %v1447_v10 = vrot.slane %v3415_v62, 5  ;;  %v1444_v12 = vrot.slane %v1345_v9, 5  ;;  %v1446_v44 = vrot.slane %v3417_v19, 5 }
 0x3a2   : > { %1487 = vrot.lane.b32.xlu2 %v3417_v19, %s2861_s17 }
 0x3a3   : > { %v3474_v22 = vmul.f32 %v1445_v29, %v3459_v11  ;;  %v3477_v0 = vmul.f32 %v1447_v10, %v3459_v11  ;;  %v3486_v46 = vmul.f32 %v1444_v12, %v3468_v13  ;;  %v3493_v39 = vmul.f32 %v1446_v44, %v3468_v13 }
 0x3a5   : > { %4552 = vst [vmem:[#allocation13_spill] sm:$0xff] %v3474_v22  ;;  %v2228_v51 = vmul.f32 %v2226_v21, %v3474_v22  ;;  %v2232_v30 = vmul.f32 %v2230_v43, %v3477_v0  ;;  %v2227_v36 = vmul.f32 %v2226_v21, %v3486_v46  ;;  %v2231_v1 = vmul.f32 %v2230_v43, %v3493_v39 }
 0x3a6   : > { %4553 = vst [vmem:[#allocation14_spill] sm:$0xff] %v3477_v0  ;;  %v1702_v24 = vmul.f32 %v1701_v18, %v3486_v46  ;;  %v1706_v35 = vmul.f32 %v1705_v52, %v3493_v39  ;;  %v1703_v55 = vmul.f32 %v1701_v18, %v3474_v22  ;;  %v1707_v47 = vmul.f32 %v1705_v52, %v3477_v0 }
 0x3a7   : > { %4554 = vst [vmem:[#allocation15_spill] sm:$0xff] %v3486_v46  ;;  %v3514_v26 = vadd.f32 %v2232_v30, %v2228_v51  ;;  %v1835_v58 = vmul.f32 %v1834_v40, %v3486_v46  ;;  %v1839_v28 = vmul.f32 %v1838_v31, %v3493_v39  ;;  %v1836_v32 = vmul.f32 %v1834_v40, %v3474_v22 }
 0x3a8   : > { %4555 = vst [vmem:[#allocation16_spill] sm:$0xff] %v3493_v39  ;;  %v1840_v54 = vmul.f32 %v1838_v31, %v3477_v0  ;;  %v2094_v56 = vmul.f32 %v2093_v27, %v3486_v46  ;;  %v2098_v61 = vmul.f32 %v2097_v15, %v3493_v39  ;;  %v2095_v20 = vmul.f32 %v2093_v27, %v3474_v22 }
 0x3a9   : > { %1462 = vrot.lane.b32.xlu1 %v3415_v62, %s2863_s19  ;;  %1384 = vrot.lane.b32.xlu0 %v3417_v19, %s2864_s20  ;;  %v2364_v17 = vmul.f32 %v2363_v37, %v3493_v39  ;;  %v2361_v34 = vmul.f32 %v2359_v59, %v3474_v22  ;;  %v2365_v2 = vmul.f32 %v2363_v37, %v3477_v0 }
 0x3aa   : > { %1388 = vrot.lane.b32.xlu2 %v3415_v62, %s2864_s20  ;;  %v3547_v4 = vadd.f32 %v2231_v1, %v2227_v36  ;;  %v1576_v6 = vmul.f32 %v1574_v60, %v3474_v22  ;;  %v3555_v45 = vadd.f32 %v1706_v35, %v1702_v24  ;;  %v3557_v48 = vadd.f32 %v1707_v47, %v1703_v55 }
 0x3ab   : > { %v3559_v8 = vadd.f32 %v1839_v28, %v1835_v58  ;;  %v3566_v29 = vadd.f32 %v2098_v61, %v2094_v56  ;;  %v3575_v21 = vadd.f32 %v2365_v2, %v2361_v34  ;;  %v1575_v30 = vmul.f32 %v1574_v60, %v3486_v46 }
 0x3ac   : > { %v1685_v34 = vstv %s3521_s25  ;;  %v1715_v2 = vstv %s3527_s26  ;;  %s3690_s25 = sld [smem:[#allocation2 + $0x2c]]  ;;  %v4576_v22 = vstv %s3577_s10 }
 0x3ad   : > { %4556 = vst [vmem:[#allocation17_spill] sm:$0xff] %v3566_v29  ;;  %s3704_s26 = sld [smem:[#allocation2 + $0x21]]  ;;  %v4578_v42 = vmov %v4576_v22 }
 0x3ae   : > { %4559 = vst [vmem:[#allocation20_spill] sm:$0xff] %v3575_v21  ;;  %s4166_s10 = sld [smem:[#allocation2 + $0x43]] }
 0x3b1   : > { %1489 = vrot.lane.b32.xlu1 %v1346_v49, %s2861_s17  ;;  %1417 = vrot.lane.b32.xlu0 %v3415_v62, %s2862_s18 }
 0x3b2   : > { %1458 = vrot.lane.b32.xlu2 %v3417_v19, %s2863_s19 }
 0x3b9   : > { %1386 = vrot.lane.b32.xlu1 %v1346_v49, %s2864_s20  ;;  %1516 = vrot.lane.b32.xlu0 %v3417_v19, %s2865_s23 }
 0x3ba   : > { %1520 = vrot.lane.b32.xlu2 %v3415_v62, %s2865_s23 }
 0x3c1   : > { %1456 = vrot.lane.b32.xlu1 %v1345_v9, %s2863_s19  ;;  %1485 = vrot.lane.b32.xlu0 %v1345_v9, %s2861_s17  ;;  %s3488_s17 = sld [smem:[#allocation2 + $0x46]] }
 0x3c2   : > { %1382 = vrot.lane.b32.xlu2 %v1345_v9, %s2864_s20  ;;  %s3506_s20 = sld [smem:[#allocation2 + $0x56]] }
 0x3c7   : > { %v1578_v5 = vstv %s3488_s17  ;;  %s3635_s17 = sld [smem:[#allocation2 + $0x25]] }
 0x3c8   : > { %v1580_v7 = vmul.f32 %v1578_v5, %v3477_v0  ;;  %v1579_v18 = vmul.f32 %v1578_v5, %v3493_v39  ;;  %v1858_v60 = vstv %s3506_s20  ;;  %s3651_s20 = sld [smem:[#allocation2 + $0xf]] }
 0x3c9   : > { %1518 = vrot.lane.b32.xlu1 %v1346_v49, %s2865_s23  ;;  %1411 = vrot.lane.b32.xlu0 %v1345_v9, %s2862_s18 }
 0x3ca   : > { %1415 = vrot.lane.b32.xlu2 %v1346_v49, %s2862_s18  ;;  %s3497_s18 = sld [smem:[#allocation2 + $0x59]]  ;;  %v3580_v51 = vadd.f32 %v1580_v7, %v1576_v6  ;;  %v3609_v28 = vadd.f32 %v1579_v18, %v1575_v30  ;;  %v1818_v18 = vstv %s3533_s28 }
 0x3cb   : > { %s3714_s28 = sld [smem:[#allocation2 + $0x1d]] }
 0x3cc   : > { %4560 = vst [vmem:[#allocation21_spill] sm:$0xff] %v3580_v51 }
 0x3cd   : > { %4561 = vst [vmem:[#allocation22_spill] sm:$0xff] %v3609_v28 }
 0x3d1   : > { %1367 = vrot.lane.b32.xlu1 %v3417_v19, %s2866_s24  ;;  %1460 = vrot.lane.b32.xlu0 %v1346_v49, %s2863_s19  ;;  %s3501_s19 = sld [smem:[#allocation2 + $0x55]]  ;;  %v2360_v19 = vmul.f32 %v2359_v59, %v3486_v46 }
 0x3d2   : > { %1514 = vrot.lane.b32.xlu2 %v1345_v9, %s2865_s23  ;;  %s3508_s23 = sld [smem:[#allocation2 + $0x3d]] }
 0x3d3   : > { %v3573_v44 = vadd.f32 %v2364_v17, %v2360_v19 }
 0x3d5   : > { %4558 = vst [vmem:[#allocation19_spill] sm:$0xff] %v3573_v44 }
 0x3d8   : > { %v2210_v19 = vstv %s3508_s23  ;;  %s3658_s23 = sld [smem:[#allocation2 + $0x2b]] }
 0x3d9   : > { %1365 = vrot.lane.b32.xlu0 %v1345_v9, %s2866_s24  ;;  %v3564_v9 = vadd.f32 %v1840_v54, %v1836_v32  ;;  %v2250_v32 = vstv %s3497_s18  ;;  %v1725_v54 = vstv %s3501_s19  ;;  %s3643_s18 = sld [smem:[#allocation2 + $0x13]] }
 0x3da   : > { %1369 = vrot.lane.b32.xlu2 %v1346_v49, %s2866_s24  ;;  %s3645_s19 = sld [smem:[#allocation2 + $0x2f]] }
 0x3e1   : > { %1371 = vrot.lane.b32.xlu0 %v3415_v62, %s2866_s24  ;;  %s3516_s24 = sld [smem:[#allocation2 + $0x52]]  ;;  %v2099_v62 = vmul.f32 %v2097_v15, %v3477_v0  ;;  %v4575_v0 = vstv %s3570_s9 }
 0x3e2   : > { %s3905_s9 = sld [smem:[#allocation2 + $0x33]] }
 0x3e3   : > { %v3568_v10 = vadd.f32 %v2099_v62, %v2095_v20 }
 0x3e5   : > { %4557 = vst [vmem:[#allocation18_spill] sm:$0xff] %v3568_v10  ;;  %v4583_v10 = vstv %s3602_s13  ;;  %s4190_s13 = sld [smem:[#allocation2 + $0x27]] }
 0x3e7   : > { %v2240_v17 = vstv %s3516_s24  ;;  %s3674_s24 = sld [smem:[#allocation2 + $0x10]] }
 0x3fc   : > { %v3445_v63 = vpop.permute.xlu2 %1487 }
 0x404   : > { %v3490_v50 = vpop.permute.xlu2 %1388 }
 0x40c   : > { %v1459_v3 = vpop.permute.xlu2 %1458 }
 0x413   : > { %v1492_v41 = vpop.permute.xlu0 %1491  ;;  %v3551_v49 = vpop.permute.xlu1 %1413 }
 0x414   : > { %v1495_v52 = vsel %vm1493_vm12, %v3445_v63, %v1492_v41  ;;  %v1497_v36 = vsel %vm1493_vm12, %v1492_v41, %v3445_v63  ;;  %v3617_v5 = vpop.permute.xlu2 %1520 }
 0x415   : > { %v1504_v27 = vrot.slane %v1495_v52, 3  ;;  %v1505_v15 = vrot.slane %v1497_v36, 3  ;;  %v1848_v52 = vstv %s3539_s29  ;;  %s3728_s29 = sld [smem:[#allocation2 + $0x1e]] }
 0x417   : > { %v3641_v6 = vmul.f32 %v1505_v15, %v3459_v11 }
 0x419   : > { %4563 = vst [vmem:[#allocation24_spill] sm:$0xff] %v3641_v6  ;;  %v3669_v47 = vmul.f32 %v2250_v32, %v3641_v6  ;;  %v3702_v31 = vmul.f32 %v1858_v60, %v3641_v6 }
 0x41b   : > { %v1463_v59 = vpop.permute.xlu1 %1462  ;;  %v1385_v37 = vpop.permute.xlu0 %1384 }
 0x41c   : > { %v1466_v56 = vsel %vm1464_vm13, %v1459_v3, %v1463_v59  ;;  %v1468_v61 = vsel %vm1464_vm13, %v1463_v59, %v1459_v3  ;;  %v1392_v20 = vsel %vm1390_vm14, %v1385_v37, %v3490_v50  ;;  %v1394_v62 = vsel %vm1390_vm14, %v3490_v50, %v1385_v37  ;;  %v1383_v58 = vpop.permute.xlu2 %1382 }
 0x41d   : > { %v3638_v3 = vmul.f32 %v1504_v27, %v3468_v13  ;;  %v1476_v50 = vrot.slane %v1468_v61, 4  ;;  %v1402_v7 = vrot.slane %v1392_v20, 7  ;;  %v1475_v41 = vrot.slane %v1466_v56, 4 }
 0x41e   : > { %v1401_v30 = vrot.slane %v1394_v62, 7  ;;  %v2220_v27 = vstv %s3545_s30  ;;  %s3742_s30 = sld [smem:[#allocation2 + $0x3c]] }
 0x41f   : > { %4562 = vst [vmem:[#allocation23_spill] sm:$0xff] %v3638_v3  ;;  %v3663_v56 = vmul.f32 %v1476_v50, %v3459_v11  ;;  %v3666_v62 = vmul.f32 %v1402_v7, %v3459_v11  ;;  %v3672_v63 = vmul.f32 %v2250_v32, %v3638_v3  ;;  %v3677_v55 = vmul.f32 %v1475_v41, %v3468_v13 }
 0x420   : > { %v3680_v35 = vmul.f32 %v1401_v30, %v3468_v13  ;;  %v3685_v24 = vmul.f32 %v1725_v54, %v3638_v3  ;;  %v3688_v32 = vmul.f32 %v1725_v54, %v3641_v6  ;;  %v3699_v1 = vmul.f32 %v1858_v60, %v3638_v3 }
 0x421   : > { %4564 = vst [vmem:[#allocation25_spill] sm:$0xff] %v3663_v56  ;;  %v3709_v20 = vmul.f32 %v2210_v19, %v3666_v62  ;;  %v3712_v61 = vmul.f32 %v2240_v17, %v3663_v56  ;;  %v3726_v12 = vmul.f32 %v2240_v17, %v3677_v55  ;;  %v3734_v43 = vmul.f32 %v1715_v2, %v3677_v55 }
 0x422   : > { %4565 = vst [vmem:[#allocation26_spill] sm:$0xff] %v3666_v62  ;;  %v3748_v17 = vmul.f32 %v1848_v52, %v3677_v55  ;;  %v3754_v37 = vmul.f32 %v1848_v52, %v3663_v56  ;;  %v4584_v6 = vstv %s3606_s14 }
 0x423   : > { %4566 = vst [vmem:[#allocation27_spill] sm:$0xff] %v3677_v55  ;;  %v3682_v50 = vpop.permute.xlu1 %1489  ;;  %v1418_v7 = vpop.permute.xlu0 %1417 }
 0x424   : > { %v1421_v41 = vsel %vm1419_vm15, %v3551_v49, %v1418_v7  ;;  %v1423_v30 = vsel %vm1419_vm15, %v1418_v7, %v3551_v49  ;;  %v3731_v49 = vmul.f32 %v1685_v34, %v3680_v35  ;;  %v3751_v7 = vmul.f32 %v1818_v18, %v3666_v62  ;;  %v1416_v14 = vpop.permute.xlu2 %1415 }
 0x425   : > { %v1430_v40 = vrot.slane %v1423_v30, 6  ;;  %v1431_v54 = vrot.slane %v1421_v41, 6  ;;  %v2211_v30 = vmul.f32 %v2210_v19, %v3680_v35  ;;  %v3745_v19 = vmul.f32 %v1818_v18, %v3680_v35 }
 0x427   : > { %v3719_v60 = vmul.f32 %v1430_v40, %v3468_v13  ;;  %v3722_v41 = vmul.f32 %v1431_v54, %v3459_v11  ;;  %v3737_v40 = vmul.f32 %v1685_v34, %v3666_v62  ;;  %v3740_v54 = vmul.f32 %v1715_v2, %v3663_v56 }
 0x429   : > { %4567 = vst [vmem:[#allocation28_spill] sm:$0xff] %v3722_v41  ;;  %v3763_v25 = vmul.f32 %v2220_v27, %v3722_v41  ;;  %v3766_v16 = vmul.f32 %v2220_v27, %v3719_v60 }
 0x42b   : > { %v1387_v59 = vpop.permute.xlu1 %1386  ;;  %v1517_v23 = vpop.permute.xlu0 %1516 }
 0x42c   : > { %v1391_v15 = vsel %vm1390_vm14, %v1383_v58, %v1387_v59  ;;  %v1393_v2 = vsel %vm1390_vm14, %v1387_v59, %v1383_v58  ;;  %v1524_v36 = vsel %vm1522_vm0, %v1517_v23, %v3617_v5  ;;  %v1526_v34 = vsel %vm1522_vm0, %v3617_v5, %v1517_v23 }
 0x42d   : > { %v1399_v27 = vrot.slane %v1393_v2, 7  ;;  %v1400_v52 = vrot.slane %v1391_v15, 7  ;;  %v1533_v18 = vrot.slane %v1524_v36, 2  ;;  %v1534_v53 = vrot.slane %v1526_v34, 2 }
 0x42e   : > { %v4568_v58 = vstv %s3553_s7  ;;  %v4570_v5 = vstv %s3562_s8  ;;  %s3821_s7 = sld [smem:[#allocation2 + $0xb]] }
 0x42f   : > { %v3787_v59 = vmul.f32 %v4568_v58, %v3719_v60  ;;  %v4569_v33 = vmov %v4568_v58  ;;  %v3799_v36 = vmul.f32 %v4570_v5, %v3719_v60  ;;  %v4571_v15 = vmov %v4570_v5  ;;  %s3882_s8 = sld [smem:[#allocation2 + $0x32]] }
 0x430   : > { %v3792_v23 = vmul.f32 %v4569_v33, %v3722_v41  ;;  %v3804_v34 = vmul.f32 %v4571_v15, %v3722_v41  ;;  %v3807_v2 = vmul.f32 %v1399_v27, %v3468_v13  ;;  %v3810_v33 = vmul.f32 %v1400_v52, %v3459_v11 }
 0x431   : > { %v3813_v58 = vmul.f32 %v1533_v18, %v3468_v13  ;;  %v3816_v5 = vmul.f32 %v1534_v53, %v3459_v11  ;;  %v4577_v53 = vmov %v4575_v0  ;;  %v4579_v15 = vstv %s3590_s11  ;;  %s4178_s11 = sld [smem:[#allocation2 + $0x12]] }
 0x432   : > { %4572 = vst [vmem:[#allocation29_spill] sm:$0xff] %v3810_v33  ;;  %v2208_v52 = vmul.f32 %v4575_v0, %v3810_v33  ;;  %v2207_v39 = vmul.f32 %v4577_v53, %v3807_v2  ;;  %v1682_v46 = vmul.f32 %v4579_v15, %v3807_v2  ;;  %v4580_v27 = vstv %s3594_s12  ;;  %s4180_s12 = sld [smem:[#allocation2 + $0x20]] }
 0x433   : > { %4573 = vst [vmem:[#allocation30_spill] sm:$0xff] %v3813_v58  ;;  %v3830_v18 = vmul.f32 %v4576_v22, %v3816_v5  ;;  %v3838_v38 = vmul.f32 %v4578_v42, %v3813_v58  ;;  %v3846_v0 = vmul.f32 %v4580_v27, %v3813_v58  ;;  %v4581_v51 = vmov %v4579_v15  ;;  %v3856_v53 = vpop.permute.xlu1 %1456  ;;  %v1486_v44 = vpop.permute.xlu0 %1485 }
 0x434   : > { %4574 = vst [vmem:[#allocation31_spill] sm:$0xff] %v3816_v5  ;;  %v1683_v22 = vmul.f32 %v4581_v51, %v3810_v33  ;;  %v4582_v28 = vmov %v4580_v27  ;;  %v3859_v42 = vadd.f32 %v3709_v20, %v2208_v52  ;;  %v3861_v15 = vadd.f32 %v2211_v30, %v2207_v39 }
 0x435   : > { %v3854_v21 = vmul.f32 %v4582_v28, %v3816_v5  ;;  %v1815_v27 = vmul.f32 %v4583_v10, %v3807_v2  ;;  %v3869_v56 = vmul.f32 %v4584_v6, %v3813_v58  ;;  %v1494_v51 = vsel %vm1493_vm12, %v1486_v44, %v3682_v50 }
 0x436   : > { %v1496_v28 = vsel %vm1493_vm12, %v3682_v50, %v1486_v44  ;;  %v1502_v39 = vrot.slane %v1494_v51, 3  ;;  %v3885_v62 = vadd.f32 %v3731_v49, %v1682_v46  ;;  %v3888_v44 = vadd.f32 %v3737_v40, %v1683_v22  ;;  %v1515_v49 = vpop.permute.xlu2 %1514 }
 0x437   : > { %v1503_v30 = vrot.slane %v1496_v28, 3  ;;  %v3898_v41 = vadd.f32 %v3745_v19, %v1815_v27  ;;  %v4587_v6 = vmov %v4583_v10  ;;  %v4588_v40 = vstv %s3606_s14  ;;  %s4195_s14 = sld [smem:[#allocation2 + $0x2e]] }
 0x438   : > { %v3892_v51 = vmul.f32 %v1502_v39, %v3468_v13  ;;  %v1816_v10 = vmul.f32 %v4587_v6, %v3810_v33  ;;  %v3910_v22 = vmul.f32 %v4588_v40, %v3816_v5  ;;  %v4591_v52 = vstv %s3629_s16  ;;  %s2867_s16 = smov 126  }
 0x439   : > { %v3895_v28 = vmul.f32 %v1503_v30, %v3459_v11  ;;  %v4589_v30 = vstv %s3612_s15  ;;  %v4592_v46 = vmov %v4591_v52  ;;  %v4593_v33 = vstv %s3635_s17  ;;  %s4205_s15 = sld [smem:[#allocation2 + $0x5f]]  ;;  %s2868_s17 = smov 2  }
 0x43a   : > { %4585 = vst [vmem:[#allocation32_spill] sm:$0xff] %v3892_v51  ;;  %v4590_v19 = vmov %v4589_v30  ;;  %v1722_v6 = vmul.f32 %v4591_v52, %v3892_v51  ;;  %v1855_v29 = vmul.f32 %v4593_v33, %v3892_v51  ;;  %v3930_v39 = vadd.f32 %v3751_v7, %v1816_v10 }
 0x43b   : > { %4586 = vst [vmem:[#allocation33_spill] sm:$0xff] %v3895_v28  ;;  %v2248_v50 = vmul.f32 %v4589_v30, %v3895_v28  ;;  %v2247_v27 = vmul.f32 %v4590_v19, %v3892_v51  ;;  %v1723_v20 = vmul.f32 %v4592_v46, %v3895_v28  ;;  %v4594_v30 = vmov %v4593_v33  ;;  %v1519_v58 = vpop.permute.xlu1 %1518  ;;  %v1412_v19 = vpop.permute.xlu0 %1411 }
 0x43c   : > { %v1856_v5 = vmul.f32 %v4594_v30, %v3895_v28  ;;  %v3942_v3 = vadd.f32 %v3685_v24, %v1722_v6  ;;  %v1523_v7 = vsel %vm1522_vm0, %v1515_v49, %v1519_v58  ;;  %v1525_v10 = vsel %vm1522_vm0, %v1519_v58, %v1515_v49 }
 0x43d   : > { %v3936_v52 = vadd.f32 %v3669_v47, %v2248_v50  ;;  %v3939_v46 = vadd.f32 %v3672_v63, %v2247_v27  ;;  %v3945_v33 = vadd.f32 %v3688_v32, %v1723_v20  ;;  %v1420_v47 = vsel %vm1419_vm15, %v1412_v19, %v1416_v14 }
 0x43e   : > { %v1422_v63 = vsel %vm1419_vm15, %v1416_v14, %v1412_v19  ;;  %v1531_v50 = vrot.slane %v1523_v7, 2  ;;  %v1532_v27 = vrot.slane %v1525_v10, 2  ;;  %v1429_v32 = vrot.slane %v1420_v47, 6 }
 0x43f   : > { %v1428_v24 = vrot.slane %v1422_v63, 6  ;;  %v1759_v10 = vrot.slane %v3945_v33, 1  ;;  %v3974_v63 = vadd.f32 %v3699_v1, %v1855_v29  ;;  %v3977_v40 = vadd.f32 %v3702_v31, %v1856_v5 }
 0x440   : > { %v3960_v14 = vmul.f32 %v1531_v50, %v3468_v13  ;;  %v3963_v30 = vmul.f32 %v1532_v27, %v3459_v11  ;;  %v3969_v7 = vmul.f32 %v1429_v32, %v3459_v11  ;;  %v4595_v50 = vstv %s3643_s18  ;;  %s4232_s18 = sld [smem:[#allocation2 + $0x5a]] }
 0x441   : > { %v3966_v19 = vmul.f32 %v1428_v24, %v3468_v13  ;;  %v4596_v24 = vstv %s3645_s19  ;;  %v4597_v32 = vmov %v4595_v50  ;;  %v4599_v29 = vstv %s3651_s20  ;;  %s4237_s19 = sld [smem:[#allocation2 + $0x3e]] }
 0x442   : > { %v2218_v27 = vmul.f32 %v4595_v50, %v3969_v7  ;;  %v2258_v58 = vmul.f32 %v4596_v24, %v3963_v30  ;;  %v4598_v33 = vmov %v4596_v24  ;;  %v4600_v31 = vstv %s3658_s23  ;;  %s4243_s20 = sld [smem:[#allocation2 + $0x6]] }
 0x443   : > { %v2217_v49 = vmul.f32 %v4597_v32, %v3966_v19  ;;  %v2257_v47 = vmul.f32 %v4598_v33, %v3960_v14  ;;  %v1692_v1 = vmul.f32 %v4599_v29, %v3966_v19  ;;  %v1732_v5 = vmul.f32 %v4600_v31, %v3960_v14  ;;  %v1461_v51 = vpop.permute.xlu0 %1460  ;;  %s4247_s23 = sld [smem:[#allocation2 + $0x37]] }
 0x444   : > { %v4601_v6 = vmov %v4599_v29  ;;  %v4602_v50 = vmov %v4600_v31  ;;  %v2224_v24 = vadd.f32 %v3763_v25, %v2218_v27  ;;  %v2264_v32 = vadd.f32 %v3830_v18, %v2258_v58 }
 0x445   : > { %v1693_v20 = vmul.f32 %v4601_v6, %v3969_v7  ;;  %v1733_v28 = vmul.f32 %v4602_v50, %v3963_v30  ;;  %v2223_v55 = vadd.f32 %v3766_v16, %v2217_v49  ;;  %v2263_v33 = vadd.f32 %v3838_v38, %v2257_v47 }
 0x446   : > { %v1465_v29 = vsel %vm1464_vm13, %v3856_v53, %v1461_v51  ;;  %v1467_v6 = vsel %vm1464_vm13, %v1461_v51, %v3856_v53  ;;  %v1698_v31 = vadd.f32 %v3787_v59, %v1692_v1  ;;  %v1738_v50 = vadd.f32 %v3846_v0, %v1732_v5 }
 0x447   : > { %v1473_v25 = vrot.slane %v1465_v29, 4  ;;  %v1474_v18 = vrot.slane %v1467_v6, 4  ;;  %v4603_v16 = vrot.slane %v3514_v26, 1  ;;  %v2300_v58 = vrot.slane %v2264_v32, 2 }
 0x448   : > { %v4604_v49 = vrot.slane %v3547_v4, 1  ;;  %v2299_v53 = vrot.slane %v2263_v33, 2  ;;  %v4605_v59 = vrot.slane %v3555_v45, 1  ;;  %v1774_v51 = vrot.slane %v1738_v50, 2 }
 0x449   : > { %v4018_v38 = vadd.f32 %v4603_v16, %v2224_v24  ;;  %v4029_v27 = vmul.f32 %v1473_v25, %v3468_v13  ;;  %v4032_v26 = vmul.f32 %v1474_v18, %v3459_v11  ;;  %v1699_v4 = vadd.f32 %v3792_v23, %v1693_v20 }
 0x44a   : > { %v4022_v47 = vadd.f32 %v4604_v49, %v2223_v55  ;;  %v4026_v0 = vadd.f32 %v4605_v59, %v1698_v31  ;;  %v1739_v45 = vadd.f32 %v3854_v21, %v1733_v28  ;;  %v4606_v24 = vstv %s3674_s24 }
 0x44b   : > { %v2292_v1 = vrot.slane %v4018_v38, 2  ;;  %v1825_v32 = vmul.f32 %v4606_v24, %v3966_v19  ;;  %v4607_v33 = vstv %s3704_s26  ;;  %v4609_v50 = vstv %s3714_s28  ;;  %v1370_v24 = vpop.permute.xlu2 %1369  ;;  %s2869_s26 = smov 1   ;;  %s4265_s28 = sld [smem:[#allocation2 + $0x14]] }
 0x44c   : > { %v2291_v55 = vrot.slane %v4022_v47, 2  ;;  %v1766_v5 = vrot.slane %v4026_v0, 2  ;;  %v2238_v29 = vmul.f32 %v4607_v33, %v4032_v26  ;;  %v4608_v6 = vmov %v4607_v33  ;;  %v1366_v33 = vpop.permute.xlu0 %1365 }
 0x44d   : > { %v2237_v31 = vmul.f32 %v4608_v6, %v4029_v27  ;;  %v1712_v25 = vmul.f32 %v4609_v50, %v4029_v27  ;;  %v4610_v23 = vmov %v4609_v50  ;;  %v4611_v18 = vrot.slane %v3557_v48, 1 }
 0x44e   : > { %v1713_v20 = vmul.f32 %v4610_v23, %v4032_v26  ;;  %v1775_v21 = vrot.slane %v1739_v45, 2  ;;  %v1831_v28 = vadd.f32 %v3799_v36, %v1825_v32  ;;  %v4612_v49 = vstv %s3728_s29 }
 0x44f   : > { %v4056_v16 = vadd.f32 %v4611_v18, %v1699_v4  ;;  %v1845_v59 = vmul.f32 %v4612_v49, %v4029_v27  ;;  %v2244_v6 = vadd.f32 %v3712_v61, %v2238_v29  ;;  %v2243_v50 = vadd.f32 %v3726_v12, %v2237_v31 }
 0x450   : > { %v1718_v23 = vadd.f32 %v3734_v43, %v1712_v25  ;;  %v1719_v48 = vadd.f32 %v3740_v54, %v1713_v20  ;;  %v1374_v4 = vsel %vm1373_vm1, %v1366_v33, %v1370_v24  ;;  %v1376_v36 = vsel %vm1373_vm1, %v1370_v24, %v1366_v33 }
 0x451   : > { %v1767_v45 = vrot.slane %v4056_v16, 2  ;;  %v1851_v61 = vadd.f32 %v3748_v17, %v1845_v59  ;;  %v4073_v32 = vmul.f32 %v1376_v36, %v3468_v13  ;;  %v4076_v12 = vmul.f32 %v1374_v4, %v3459_v11 }
 0x452   : > { %v4613_v43 = vrot.slane %v3936_v52, 1  ;;  %v4614_v29 = vrot.slane %v3939_v46, 1  ;;  %v4615_v25 = vrot.slane %v3942_v3, 1  ;;  %v1763_v18 = vadd.f32 %v1759_v10, %v1719_v48 }
 0x453   : > { %v4616_v49 = vstv %s3690_s25  ;;  %v4617_v59 = vrot.slane %v3559_v8, 1  ;;  %v4618_v33 = vstv %s3760_s27  ;;  %v4620_v3 = vstv %s3780_s0  ;;  %s4137_s0 = sld [smem:[#allocation2 + $0x4]] }
 0x454   : > { %v2288_v54 = vadd.f32 %v4613_v43, %v2244_v6  ;;  %v2287_v31 = vadd.f32 %v4614_v29, %v2243_v50  ;;  %v1762_v20 = vadd.f32 %v4615_v25, %v1718_v23  ;;  %v1865_v17 = vmul.f32 %v4616_v49, %v3960_v14  ;;  %s4152_s27 = sld [smem:[#allocation2 + $0x51]] }
 0x455   : > { %v4089_v24 = vadd.f32 %v4617_v59, %v1831_v28  ;;  %v2198_v4 = vmul.f32 %v4618_v33, %v4076_v12  ;;  %v4619_v46 = vmov %v4618_v33  ;;  %v1672_v10 = vmul.f32 %v4620_v3, %v4073_v32 }
 0x456   : > { %v4094_v52 = vadd.f32 %v2300_v58, %v2288_v54  ;;  %v2197_v6 = vmul.f32 %v4619_v46, %v4073_v32  ;;  %v4099_v50 = vadd.f32 %v2299_v53, %v2287_v31  ;;  %v4104_v23 = vadd.f32 %v1774_v51, %v1762_v20  ;;  %v1372_v20 = vpop.permute.xlu0 %1371 }
 0x457   : > { %v4621_v8 = vmov %v4620_v3  ;;  %v4109_v48 = vadd.f32 %v1775_v21, %v1763_v18  ;;  %v4622_v53 = vstv %s3794_s2  ;;  %v1871_v54 = vadd.f32 %v3869_v56, %v1865_v17  ;;  %v1368_v21 = vpop.permute.xlu1 %1367  ;;  %s4147_s2 = sld [smem:[#allocation2 + $0x58]] }
 0x458   : > { %v1673_v28 = vmul.f32 %v4621_v8, %v4076_v12  ;;  %v2308_v58 = vrot.slane %v4094_v52, 4  ;;  %v1805_v43 = vmul.f32 %v4622_v53, %v4073_v32  ;;  %v1891_v31 = vrot.slane %v3974_v63, 1 }
 0x459   : > { %v1899_v25 = vrot.slane %v4089_v24, 2  ;;  %v1907_v18 = vrot.slane %v1871_v54, 2  ;;  %v4623_v49 = vmov %v4622_v53  ;;  %v4624_v33 = vstv %s3674_s24  ;;  %s4253_s24 = sld [smem:[#allocation2 + $0xd]] }
 0x45a   : > { %v1806_v59 = vmul.f32 %v4623_v49, %v4076_v12  ;;  %v1826_v46 = vmul.f32 %v4624_v33, %v3969_v7  ;;  %v4625_v3 = vstv %s3728_s29  ;;  %v1375_v17 = vsel %vm1373_vm1, %v1368_v21, %v1372_v20  ;;  %s4269_s29 = sld [smem:[#allocation2 + $0x45]] }
 0x45b   : > { %v1846_v56 = vmul.f32 %v4625_v3, %v4032_v26  ;;  %v1377_v63 = vsel %vm1373_vm1, %v1372_v20, %v1368_v21  ;;  %v1895_v24 = vadd.f32 %v1891_v31, %v1851_v61  ;;  %v4626_v8 = vstv %s3690_s25  ;;  %s4261_s25 = sld [smem:[#allocation2 + $0x53]] }
 0x45c   : > { %v1866_v53 = vmul.f32 %v4626_v8, %v3963_v30  ;;  %v4140_v54 = vmul.f32 %v1377_v63, %v3468_v13  ;;  %v4143_v49 = vmul.f32 %v1375_v17, %v3459_v11  ;;  %v1832_v33 = vadd.f32 %v3804_v34, %v1826_v46 }
 0x45d   : > { %v1852_v21 = vadd.f32 %v3754_v37, %v1846_v56  ;;  %v1911_v61 = vadd.f32 %v1907_v18, %v1895_v24  ;;  %v1876_v20 = vrot.slane %v3930_v39, 1  ;;  %v1892_v3 = vrot.slane %v3977_v40, 1 }
 0x45e   : > { %v1872_v31 = vadd.f32 %v3910_v22, %v1866_v53  ;;  %v4627_v13 = vstv %s3782_s1  ;;  %v4629_v34 = vstv %s3882_s8  ;;  %v4631_v22 = vstv %s3905_s9  ;;  %s4176_s1 = sld [smem:[#allocation2 + $0x35]] }
 0x45f   : > { %v2202_v11 = vmul.f32 %v4627_v13, %v4143_v49  ;;  %v4628_v17 = vmov %v4627_v13  ;;  %v1676_v37 = vmul.f32 %v4629_v34, %v4140_v54  ;;  %v4630_v46 = vmov %v4629_v34  ;;  %s4281_s8 = sld [smem:[#allocation2 + $0x30]] }
 0x460   : > { %v2201_v63 = vmul.f32 %v4628_v17, %v4140_v54  ;;  %v1677_v18 = vmul.f32 %v4630_v46, %v4143_v49  ;;  %v1809_v39 = vmul.f32 %v4631_v22, %v4140_v54  ;;  %v1915_v40 = vrot.slane %v1911_v61, 4  ;;  %s4288_s9 = sld [smem:[#allocation2 + $0x61]] }
 0x461   : > { %v4632_v56 = vmov %v4631_v22  ;;  %v4633_v8 = vrot.slane %v3564_v9, 1  ;;  %v2204_v13 = vadd.f32 %v2202_v11, %v2198_v4  ;;  %v1678_v34 = vadd.f32 %v1676_v37, %v1672_v10 }
 0x462   : > { %v1810_v24 = vmul.f32 %v4632_v56, %v4143_v49  ;;  %v2203_v17 = vadd.f32 %v2201_v63, %v2197_v6  ;;  %v1679_v51 = vadd.f32 %v1677_v18, %v1673_v28  ;;  %v1811_v46 = vadd.f32 %v1809_v39, %v1805_v43 }
 0x463   : > { %v1888_v53 = vadd.f32 %v4633_v8, %v1832_v33  ;;  %v1896_v36 = vadd.f32 %v1892_v3, %v1852_v21  ;;  %v4634_v61 = vrot.slane %v3859_v42, 1  ;;  %v4635_v9 = vrot.slane %v3861_v15, 1 }
 0x464   : > { %v1812_v29 = vadd.f32 %v1810_v24, %v1806_v59  ;;  %v4636_v4 = vrot.slane %v3885_v62, 1  ;;  %v4637_v10 = vrot.slane %v3888_v44, 1  ;;  %v4638_v43 = vrot.slane %v3898_v41, 1 }
 0x465   : > { %v1900_v22 = vrot.slane %v1888_v53, 2  ;;  %v2272_v56 = vadd.f32 %v4634_v61, %v2204_v13  ;;  %v2271_v33 = vadd.f32 %v4635_v9, %v2203_v17  ;;  %v1908_v3 = vrot.slane %v1872_v31, 2 }
 0x466   : > { %v1746_v6 = vadd.f32 %v4636_v4, %v1678_v34  ;;  %v1747_v28 = vadd.f32 %v4637_v10, %v1679_v51  ;;  %v1879_v59 = vadd.f32 %v4638_v43, %v1811_v46  ;;  %v1880_v21 = vadd.f32 %v1876_v20, %v1812_v29  ;;  %v4644_v34 = vld [vmem:[#allocation27_spill] sm:$0xff] }
 0x467   : > { %v2063_v11 = vstv %s4137_s0  ;;  %v2296_v42 = vadd.f32 %v2292_v1, %v2272_v56  ;;  %v2295_v62 = vadd.f32 %v2291_v55, %v2271_v33  ;;  %v1912_v51 = vadd.f32 %v1908_v3, %v1896_v36  ;;  %v4645_v56 = vld [vmem:[#allocation32_spill] sm:$0xff]  ;;  %v4646_v33 = vld [vmem:[#allocation23_spill] sm:$0xff]  ;;  %s2870_s0 = smov 127  }
 0x468   : > { %v1770_v15 = vadd.f32 %v1766_v5, %v1746_v6  ;;  %v1771_v41 = vadd.f32 %v1767_v45, %v1747_v28  ;;  %v1903_v44 = vadd.f32 %v1899_v25, %v1879_v59  ;;  %v1904_v29 = vadd.f32 %v1900_v22, %v1880_v21  ;;  %v4647_v59 = vld [vmem:[#allocation30_spill] sm:$0xff] }
 0x469   : > { %v2064_v38 = vmul.f32 %v2063_v11, %v4073_v32  ;;  %v2312_v47 = vadd.f32 %v2308_v58, %v2296_v42  ;;  %v4639_v1 = vrot.slane %v4099_v50, 4  ;;  %v4640_v55 = vrot.slane %v4104_v23, 4 }
 0x46a   : > { %v4641_v16 = vrot.slane %v4109_v48, 4  ;;  %v1919_v25 = vadd.f32 %v1915_v40, %v1903_v44  ;;  %v1916_v31 = vrot.slane %v1912_v51, 4  ;;  %v2067_v20 = vstv %s4176_s1  ;;  %s4319_s1 = sld [smem:[#allocation2 + $0x31]] }
 0x46b   : > { %v2311_v0 = vadd.f32 %v4639_v1, %v2295_v62  ;;  %v1786_v5 = vadd.f32 %v4640_v55, %v1770_v15  ;;  %v4642_v36 = vstv %s3821_s7  ;;  %2315 = vrot.lane.b32.xlu2 %v2312_v47, %s2867_s16  ;;  %v2068_v52 = vmul.f32 %v2067_v20, %v4140_v54  ;;  %v4648_v62 = vld [vmem:[#allocation17_spill] sm:$0xff]  ;;  %v4652_v55 = vld [vmem:[#allocation26_spill] sm:$0xff]  ;;  %s4278_s7 = sld [smem:[#allocation2 + $0x29]] }
 0x46c   : > { %v1787_v45 = vadd.f32 %v4641_v16, %v1771_v41  ;;  %v2074_v63 = vmul.f32 %v4642_v36, %v3807_v2  ;;  %v4643_v50 = vstv %s3742_s30  ;;  %v2083_v58 = vstv %s4178_s11  ;;  %v4650_v47 = vld [vmem:[#allocation29_spill] sm:$0xff]  ;;  %s4273_s30 = sld [smem:[#allocation2 + $0x22]] }
 0x46d   : > { %2313 = vrot.lane.b32.xlu1 %v2311_v0, %s2867_s16  ;;  %v2078_v23 = vmul.f32 %v4643_v50, %v3680_v35  ;;  %v2087_v48 = vstv %s4166_s10  ;;  %1788 = vrot.lane.b32.xlu0 %v1786_v5, %s2868_s17  ;;  %v1920_v37 = vadd.f32 %v1916_v31, %v1904_v29  ;;  %v2084_v18 = vmul.f32 %v2083_v58, %v3966_v19  ;;  %s4314_s10 = sld [smem:[#allocation2]] }
 0x46e   : > { %v2088_v39 = vmul.f32 %v2087_v48, %v3719_v60  ;;  %v2103_v40 = vstv %s4180_s12  ;;  %v2070_v24 = vadd.f32 %v2068_v52, %v2064_v38  ;;  %v2107_v13 = vstv %s4152_s27  ;;  %s4310_s27 = sld [smem:[#allocation2 + $0x38]] }
 0x46f   : > { %v2080_v8 = vadd.f32 %v2078_v23, %v2074_v63  ;;  %v2104_v53 = vmul.f32 %v2103_v40, %v4029_v27  ;;  %v2108_v46 = vmul.f32 %v2107_v13, %v4644_v34  ;;  %v2113_v22 = vstv %s4190_s13  ;;  %s4324_s11 = sld [smem:[#allocation2 + $0x7]] }
 0x470   : > { %v2090_v17 = vadd.f32 %v2088_v39, %v2084_v18  ;;  %v2117_v61 = vstv %s4147_s2  ;;  %v2114_v9 = vmul.f32 %v2113_v22, %v4645_v56  ;;  %v2123_v6 = vstv %s4195_s14  ;;  %s4306_s2 = sld [smem:[#allocation2 + $0x54]] }
 0x471   : > { %v2118_v4 = vmul.f32 %v2117_v61, %v4646_v33  ;;  %v2127_v10 = vstv %s4205_s15  ;;  %v2110_v28 = vadd.f32 %v2108_v46, %v2104_v53  ;;  %v2124_v43 = vmul.f32 %v2123_v6, %v3960_v14  ;;  %v4658_v46 = vld [vmem:[#allocation31_spill] sm:$0xff]  ;;  %s4328_s12 = sld [smem:[#allocation2 + $0x4d]] }
 0x472   : > { %v2128_v21 = vmul.f32 %v2127_v10, %v4647_v59  ;;  %v2134_v3 = vrot.slane %v2080_v8, 1  ;;  %v4649_v15 = vrot.slane %v4648_v62, 1  ;;  %v2065_v44 = vmul.f32 %v2063_v11, %v4076_v12  ;;  %v4656_v8 = vld [vmem:[#allocation33_spill] sm:$0xff]  ;;  %s4333_s13 = sld [smem:[#allocation2 + $0xe]] }
 0x473   : > { %v2120_v42 = vadd.f32 %v2118_v4, %v2114_v9  ;;  %v2069_v29 = vmul.f32 %v2067_v20, %v4143_v49  ;;  %v4651_v1 = vmov %v4642_v36  ;;  %v4653_v5 = vmov %v4643_v50  ;;  %1921 = vrot.lane.b32.xlu2 %v1919_v25, %s2869_s26  ;;  %v4654_v50 = vld [vmem:[#allocation28_spill] sm:$0xff]  ;;  %v4655_v25 = vld [vmem:[#allocation25_spill] sm:$0xff]  ;;  %s4335_s14 = sld [smem:[#allocation2 + $0x3f]] }
 0x474   : > { %v2146_v41 = vadd.f32 %v4649_v15, %v2090_v17  ;;  %v2130_v51 = vadd.f32 %v2128_v21, %v2124_v43  ;;  %v2138_v38 = vadd.f32 %v2134_v3, %v2070_v24  ;;  %v2075_v0 = vmul.f32 %v4651_v1, %v4650_v47  ;;  %v4657_v17 = vld [vmem:[#allocation24_spill] sm:$0xff]  ;;  %v4659_v21 = vld [vmem:[#allocation18_spill] sm:$0xff]  ;;  %s4340_s15 = sld [smem:[#allocation2 + $0x1c]] }
 0x475   : > { %v2079_v16 = vmul.f32 %v4653_v5, %v4652_v55  ;;  %1790 = vrot.lane.b32.xlu1 %v1787_v45, %s2868_s17  ;;  %v2150_v31 = vrot.slane %v2120_v42, 1  ;;  %v2071_v36 = vadd.f32 %v2069_v29, %v2065_v44  ;;  %v2085_v20 = vmul.f32 %v2083_v58, %v3969_v7  ;;  %1923 = vrot.lane.b32.xlu0 %v1920_v37, %s2869_s26  ;;  %s4344_s16 = sld [smem:[#allocation2 + $0x23]] }
 0x476   : > { %v2158_v11 = vrot.slane %v2146_v41, 2  ;;  %v2166_v63 = vrot.slane %v2130_v51, 2  ;;  %v2089_v23 = vmul.f32 %v2087_v48, %v4654_v50  ;;  %v2105_v18 = vmul.f32 %v2103_v40, %v4032_v26  ;;  %s4349_s17 = sld [smem:[#allocation2 + $0x2a]] }
 0x477   : > { %v2081_v52 = vadd.f32 %v2079_v16, %v2075_v0  ;;  %v2154_v45 = vadd.f32 %v2150_v31, %v2110_v28  ;;  %v2109_v24 = vmul.f32 %v2107_v13, %v4655_v25  ;;  %v2115_v53 = vmul.f32 %v2113_v22, %v4656_v8  ;;  %s2690_s26 = sld [smem:[#allocation2 + $0xa]] }
 0x478   : > { %v2162_v39 = vadd.f32 %v2158_v11, %v2138_v38  ;;  %v2091_v58 = vadd.f32 %v2089_v23, %v2085_v20  ;;  %v2119_v37 = vmul.f32 %v2117_v61, %v4657_v17  ;;  %v2125_v48 = vmul.f32 %v2123_v6, %v3963_v30 }
 0x479   : > { %v2129_v9 = vmul.f32 %v2127_v10, %v4658_v46  ;;  %v2170_v40 = vadd.f32 %v2166_v63, %v2154_v45  ;;  %v2111_v4 = vadd.f32 %v2109_v24, %v2105_v18  ;;  %v2135_v28 = vrot.slane %v2081_v52, 1 }
 0x47a   : > { %v2329_v43 = vstv %s4243_s20  ;;  %v2121_v13 = vadd.f32 %v2119_v37, %v2115_v53  ;;  %v4660_v3 = vrot.slane %v4659_v21, 1  ;;  %v2333_v10 = vstv %s4247_s23  ;;  %s2872_s20 = smov 3   ;;  %s2694_s23 = sld [smem:[#allocation2 + $0x18]] }
 0x47b   : > { %v2131_v22 = vadd.f32 %v2129_v9, %v2125_v48  ;;  %v2330_v42 = vmul.f32 %v2329_v43, %v4073_v32  ;;  %v2174_v6 = vrot.slane %v2170_v40, 4  ;;  %v2139_v62 = vadd.f32 %v2135_v28, %v2071_v36 }
 0x47c   : > { %v2147_v61 = vadd.f32 %v4660_v3, %v2091_v58  ;;  %v2339_v15 = vstv %s4253_s24  ;;  %v2151_v41 = vrot.slane %v2121_v13, 1  ;;  %v2334_v51 = vmul.f32 %v2333_v10, %v4140_v54  ;;  %s2695_s24 = sld [smem:[#allocation2 + $0x49]] }
 0x47d   : > { %v2167_v29 = vrot.slane %v2131_v22, 2  ;;  %v2178_v38 = vadd.f32 %v2174_v6, %v2162_v39  ;;  %v2340_v1 = vmul.f32 %v2339_v15, %v3807_v2  ;;  %v2343_v0 = vstv %s4237_s19  ;;  %s2871_s19 = smov 125  }
 0x47e   : > { %v2159_v44 = vrot.slane %v2147_v61, 2  ;;  %v2349_v5 = vstv %s4265_s28  ;;  %v2155_v16 = vadd.f32 %v2151_v41, %v2111_v4  ;;  %v2336_v11 = vadd.f32 %v2334_v51, %v2330_v42  ;;  %s4395_s28 = sld [smem:[#allocation2 + $0x3b]] }
 0x47f   : > { %v2344_v36 = vmul.f32 %v2343_v0, %v3680_v35  ;;  %2180 = vrot.lane.b32.xlu1 %v2178_v38, %s2870_s0  ;;  %v2350_v20 = vmul.f32 %v2349_v5, %v3966_v19  ;;  %v2353_v63 = vstv %s4269_s29  ;;  %v2369_v52 = vstv %s4273_s30  ;;  %s4397_s29 = sld [smem:[#allocation2 + $0x50]] }
 0x480   : > { %v2163_v31 = vadd.f32 %v2159_v44, %v2139_v62  ;;  %v2373_v23 = vstv %s4261_s25  ;;  %v2171_v18 = vadd.f32 %v2167_v29, %v2155_v16  ;;  %v2354_v39 = vmul.f32 %v2353_v63, %v3719_v60  ;;  %v4661_v62 = vld [vmem:[#allocation19_spill] sm:$0xff]  ;;  %s4393_s25 = sld [smem:[#allocation2 + $0x57]] }
 0x481   : > { %v2346_v45 = vadd.f32 %v2344_v36, %v2340_v1  ;;  %v2370_v24 = vmul.f32 %v2369_v52, %v4029_v27  ;;  %v2374_v53 = vmul.f32 %v2373_v23, %v4644_v34  ;;  %v2379_v58 = vstv %s4278_s7  ;;  %s4399_s30 = sld [smem:[#allocation2 + $0x26]] }
 0x482   : > { %v2383_v37 = vstv %s4232_s18  ;;  %v2389_v48 = vstv %s4281_s8  ;;  %v2175_v9 = vrot.slane %v2171_v18, 4  ;;  %v2356_v40 = vadd.f32 %v2354_v39, %v2350_v20  ;;  %s4351_s18 = sld [smem:[#allocation2 + $0x5b]] }
 0x483   : > { %v2380_v4 = vmul.f32 %v2379_v58, %v4645_v56  ;;  %v2384_v28 = vmul.f32 %v2383_v37, %v4646_v33  ;;  %v2376_v13 = vadd.f32 %v2374_v53, %v2370_v24  ;;  %v2390_v22 = vmul.f32 %v2389_v48, %v3960_v14  ;;  %s4401_s7 = sld [smem:[#allocation2 + $0x11]] }
 0x484   : > { %v2393_v21 = vstv %s4288_s9  ;;  %v2400_v3 = vrot.slane %v2346_v45, 1  ;;  %v2179_v61 = vadd.f32 %v2175_v9, %v2163_v31  ;;  %v4662_v41 = vrot.slane %v4661_v62, 1  ;;  %s4403_s8 = sld [smem:[#allocation2 + $0x42]] }
 0x485   : > { %v2386_v42 = vadd.f32 %v2384_v28, %v2380_v4  ;;  %v2394_v6 = vmul.f32 %v2393_v21, %v4647_v59  ;;  %v2331_v51 = vmul.f32 %v2329_v43, %v4076_v12  ;;  %v2335_v38 = vmul.f32 %v2333_v10, %v4143_v49  ;;  %s4407_s9 = sld [smem:[#allocation2 + $0x1f]] }
 0x486   : > { %v2412_v44 = vadd.f32 %v4662_v41, %v2356_v40  ;;  %v2404_v29 = vadd.f32 %v2400_v3, %v2336_v11  ;;  %v2341_v1 = vmul.f32 %v2339_v15, %v4650_v47  ;;  %2182 = vrot.lane.b32.xlu2 %v2179_v61, %s2870_s0  ;;  %v2345_v20 = vmul.f32 %v2343_v0, %v4652_v55  ;;  %s4409_s0 = sld [smem:[#allocation2 + $0x2d]] }
 0x487   : > { %v2396_v16 = vadd.f32 %v2394_v6, %v2390_v22  ;;  %v2416_v31 = vrot.slane %v2386_v42, 1  ;;  %v2337_v18 = vadd.f32 %v2335_v38, %v2331_v51  ;;  %v2351_v11 = vmul.f32 %v2349_v5, %v3969_v7  ;;  %v4663_v22 = vld [vmem:[#allocation20_spill] sm:$0xff] }
 0x488   : > { %v2424_v36 = vrot.slane %v2412_v44, 2  ;;  %v2355_v43 = vmul.f32 %v2353_v63, %v4654_v50  ;;  %v2371_v10 = vmul.f32 %v2369_v52, %v4032_v26  ;;  %v2347_v24 = vadd.f32 %v2345_v20, %v2341_v1 }
 0x489   : > { %v2420_v15 = vadd.f32 %v2416_v31, %v2376_v13  ;;  %v2432_v39 = vrot.slane %v2396_v16, 2  ;;  %v2375_v0 = vmul.f32 %v2373_v23, %v4655_v25  ;;  %v2381_v9 = vmul.f32 %v2379_v58, %v4656_v8 }
 0x48a   : > { %v2428_v45 = vadd.f32 %v2424_v36, %v2404_v29  ;;  %v2357_v53 = vadd.f32 %v2355_v43, %v2351_v11  ;;  %v2385_v5 = vmul.f32 %v2383_v37, %v4657_v17  ;;  %v2391_v52 = vmul.f32 %v2389_v48, %v3963_v30 }
 0x48b   : > { %v2436_v63 = vadd.f32 %v2432_v39, %v2420_v15  ;;  %v2395_v40 = vmul.f32 %v2393_v21, %v4658_v46  ;;  %v2401_v4 = vrot.slane %v2347_v24, 1  ;;  %v2377_v28 = vadd.f32 %v2375_v0, %v2371_v10  ;;  %v4665_v21 = vld [vmem:[#allocation22_spill] sm:$0xff] }
 0x48c   : > { %v2387_v13 = vadd.f32 %v2385_v5, %v2381_v9  ;;  %v4664_v23 = vrot.slane %v4663_v22, 1  ;;  %v1544_v58 = vstv %s4314_s10  ;;  %v1623_v42 = vrot.slane %v4665_v21, 1  ;;  %s4417_s10 = sld [smem:[#allocation2 + $0x3]] }
 0x48d   : > { %v2440_v37 = vrot.slane %v2436_v63, 4  ;;  %v2397_v61 = vadd.f32 %v2395_v40, %v2391_v52  ;;  %v2405_v48 = vadd.f32 %v2401_v4, %v2337_v18  ;;  %v1546_v62 = vmul.f32 %v1544_v58, %v4076_v12 }
 0x48e   : > { %v2413_v3 = vadd.f32 %v4664_v23, %v2357_v53  ;;  %v2417_v6 = vrot.slane %v2387_v13, 1  ;;  %v1548_v41 = vstv %s4319_s1  ;;  %v1554_v44 = vstv %s4324_s11 }
 0x48f   : > { %v2444_v29 = vadd.f32 %v2440_v37, %v2428_v45  ;;  %v2433_v38 = vrot.slane %v2397_v61, 2  ;;  %v1556_v1 = vmul.f32 %v1554_v44, %v4650_v47  ;;  %v1550_v31 = vmul.f32 %v1548_v41, %v4143_v49 }
 0x490   : > { %v2425_v51 = vrot.slane %v2413_v3, 2  ;;  %v2421_v16 = vadd.f32 %v2417_v6, %v2377_v28  ;;  %v1558_v36 = vstv %s4310_s27  ;;  %v1564_v20 = vstv %s4333_s13  ;;  %s4415_s27 = sld [smem:[#allocation2 + $0x5e]] }
 0x491   : > { %2446 = vrot.lane.b32.xlu0 %v2444_v29, %s2871_s19  ;;  %v1560_v11 = vmul.f32 %v1558_v36, %v4652_v55  ;;  %v1566_v43 = vmul.f32 %v1564_v20, %v3969_v7  ;;  %v1568_v10 = vstv %s4335_s14  ;;  %v1584_v39 = vstv %s4340_s15  ;;  %s4672_s14 = sshll.u32 %s4682_s22, 6 }
 0x492   : > { %v2429_v18 = vadd.f32 %v2425_v51, %v2405_v48  ;;  %v2437_v15 = vadd.f32 %v2433_v38, %v2421_v16  ;;  %v1570_v45 = vmul.f32 %v1568_v10, %v4654_v50  ;;  %v1588_v24 = vstv %s4328_s12  ;;  %v4666_v51 = vld [vmem:[#allocation21_spill] sm:$0xff] }
 0x493   : > { %v1562_v53 = vadd.f32 %v1560_v11, %v1556_v1  ;;  %v1586_v0 = vmul.f32 %v1584_v39, %v4032_v26  ;;  %v1590_v9 = vmul.f32 %v1588_v24, %v4655_v25  ;;  %v1594_v5 = vstv %s4344_s16 }
 0x494   : > { %v2441_v63 = vrot.slane %v2437_v15, 4  ;;  %v1572_v52 = vadd.f32 %v1570_v45, %v1566_v43  ;;  %v1596_v40 = vmul.f32 %v1594_v5, %v4656_v8  ;;  %v1598_v4 = vstv %s4306_s2  ;;  %s4411_s2 = sld [smem:[#allocation2 + $0x34]] }
 0x495   : > { %v1552_v28 = vadd.f32 %v1550_v31, %v1546_v62  ;;  %v1600_v13 = vmul.f32 %v1598_v4, %v4657_v17  ;;  %v1604_v22 = vstv %s4349_s17  ;;  %v1608_v23 = vstv %s4351_s18  ;;  %s265_s17 = scalar_lea.vmem %s4492_s6, %s4672_s14 }
 0x496   : > { %v2445_v3 = vadd.f32 %v2441_v63, %v2429_v18  ;;  %v1592_v37 = vadd.f32 %v1590_v9, %v1586_v0  ;;  %v1606_v61 = vmul.f32 %v1604_v22, %v3963_v30  ;;  %v1610_v48 = vmul.f32 %v1608_v23, %v4658_v46 }
 0x497   : > { %v1602_v6 = vadd.f32 %v1600_v13, %v1596_v40  ;;  %v1616_v29 = vrot.slane %v1562_v53, 1  ;;  %v4667_v38 = vrot.slane %v4666_v51, 1  ;;  %v1549_v16 = vmul.f32 %v1548_v41, %v4140_v54 }
 0x498   : > { %2448 = vrot.lane.b32.xlu1 %v2445_v3, %s2871_s19  ;;  %v1612_v11 = vadd.f32 %v1610_v48, %v1606_v61  ;;  %v1545_v62 = vmul.f32 %v1544_v58, %v4073_v32  ;;  %v1555_v31 = vmul.f32 %v1554_v44, %v3807_v2  ;;  %v1559_v18 = vmul.f32 %v1558_v36, %v3680_v35 }
 0x499   : > { %v1628_v1 = vadd.f32 %v4667_v38, %v1572_v52  ;;  %v1620_v43 = vadd.f32 %v1616_v29, %v1552_v28  ;;  %v1632_v15 = vrot.slane %v1602_v6, 1  ;;  %v1565_v0 = vmul.f32 %v1564_v20, %v3966_v19 }
 0x49a   : > { %v1551_v9 = vadd.f32 %v1549_v16, %v1545_v62  ;;  %v1561_v53 = vadd.f32 %v1559_v18, %v1555_v31  ;;  %v1569_v63 = vmul.f32 %v1568_v10, %v3719_v60  ;;  %v1585_v52 = vmul.f32 %v1584_v39, %v4029_v27  ;;  %v4668_v62 = vld [vmem:[#allocation15_spill] sm:$0xff]  ;;  %v4669_v18 = vld [vmem:[#allocation16_spill] sm:$0xff] }
 0x49b   : > { %v1640_v45 = vrot.slane %v1628_v1, 2  ;;  %v1636_v41 = vadd.f32 %v1632_v15, %v1592_v37  ;;  %v1648_v40 = vrot.slane %v1612_v11, 2  ;;  %v1589_v13 = vmul.f32 %v1588_v24, %v4644_v34 }
 0x49c   : > { %v1595_v58 = vmul.f32 %v1594_v5, %v4645_v56  ;;  %v1571_v44 = vadd.f32 %v1569_v63, %v1565_v0  ;;  %v1599_v36 = vmul.f32 %v1598_v4, %v4646_v33  ;;  %v1605_v28 = vmul.f32 %v1604_v22, %v3960_v14 }
 0x49d   : > { %v1609_v3 = vmul.f32 %v1608_v23, %v4647_v59  ;;  %v1644_v20 = vadd.f32 %v1640_v45, %v1620_v43  ;;  %v1652_v61 = vadd.f32 %v1648_v40, %v1636_v41  ;;  %v1591_v48 = vadd.f32 %v1589_v13, %v1585_v52  ;;  %v4670_v45 = vld [vmem:[#allocation13_spill] sm:$0xff] }
 0x49e   : > { %v1601_v6 = vadd.f32 %v1599_v36, %v1595_v58  ;;  %v1615_v29 = vrot.slane %v1561_v53, 1  ;;  %v1627_v39 = vadd.f32 %v1623_v42, %v1571_v44  ;;  %v1967_v21 = vstv %s2694_s23 }
 0x49f   : > { %v1611_v10 = vadd.f32 %v1609_v3, %v1605_v28  ;;  %v1656_v37 = vrot.slane %v1652_v61, 4  ;;  %v1971_v42 = vstv %s2695_s24  ;;  %v1968_v31 = vmul.f32 %v1967_v21, %v4668_v62 }
 0x4a0   : > { %v1619_v24 = vadd.f32 %v1615_v29, %v1551_v9  ;;  %v1631_v51 = vrot.slane %v1601_v6, 1  ;;  %v1639_v1 = vrot.slane %v1627_v39, 2  ;;  %v1972_v43 = vmul.f32 %v1971_v42, %v4669_v18  ;;  %v4671_v9 = vld [vmem:[#allocation14_spill] sm:$0xff] }
 0x4a1   : > { %v1660_v5 = vadd.f32 %v1656_v37, %v1644_v20  ;;  %v1647_v4 = vrot.slane %v1611_v10, 2  ;;  %v1947_v15 = vstv %s2690_s26  ;;  %v1969_v0 = vmul.f32 %v1967_v21, %v4670_v45 }
 0x4a2   : > { %v1635_v38 = vadd.f32 %v1631_v51, %v1591_v48  ;;  %v1643_v22 = vadd.f32 %v1639_v1, %v1619_v24  ;;  %v1973_v53 = vmul.f32 %v1971_v42, %v4671_v9  ;;  %v1974_v63 = vadd.f32 %v1972_v43, %v1968_v31 }
 0x4a3   : > { %1663 = vrot.lane.b32.xlu0 %v1660_v5, %s2872_s20  ;;  %v1951_v52 = vstv %s4395_s28  ;;  %v1948_v40 = vmul.f32 %v1947_v15, %v3807_v2  ;;  %v1987_v13 = vstv %s4399_s30  ;;  %v1957_v58 = vstv %s4401_s7 }
 0x4a4   : > { %v1651_v23 = vadd.f32 %v1647_v4, %v1635_v38  ;;  %v1952_v44 = vmul.f32 %v1951_v52, %v3680_v35  ;;  %v1975_v36 = vadd.f32 %v1973_v53, %v1969_v0  ;;  %v1991_v28 = vstv %s4393_s25 }
 0x4a5   : > { %v2016_v3 = vrot.slane %v1974_v63, 1  ;;  %v1949_v20 = vmul.f32 %v1947_v15, %v4650_v47  ;;  %v1961_v61 = vstv %s4403_s8  ;;  %v1977_v48 = vstv %s4407_s9 }
 0x4a6   : > { %v1655_v16 = vrot.slane %v1651_v23, 4  ;;  %v1988_v6 = vmul.f32 %v1987_v13, %v4645_v56  ;;  %v1953_v10 = vmul.f32 %v1951_v52, %v4652_v55  ;;  %v1954_v29 = vadd.f32 %v1952_v44, %v1948_v40 }
 0x4a7   : > { %v1958_v2 = vmul.f32 %v1957_v58, %v3966_v19  ;;  %v1981_v39 = vstv %s4397_s29  ;;  %v1941_v37 = vstv %s4411_s2  ;;  %v1989_v35 = vmul.f32 %v1987_v13, %v4656_v8 }
 0x4a8   : > { %v1659_v11 = vadd.f32 %v1655_v16, %v1643_v22  ;;  %v1992_v24 = vmul.f32 %v1991_v28, %v4646_v33  ;;  %v1997_v51 = vstv %s4409_s0  ;;  %v1962_v5 = vmul.f32 %v1961_v61, %v3719_v60 }
 0x4a9   : > { %v1963_v47 = vmul.f32 %v1961_v61, %v4654_v50  ;;  %v1978_v38 = vmul.f32 %v1977_v48, %v4029_v27  ;;  %v2001_v1 = vstv %s4415_s27  ;;  %v1937_v4 = vstv %s4417_s10 }
 0x4aa   : > { %1661 = vrot.lane.b32.xlu2 %v1659_v11, %s2872_s20  ;;  %v1959_v55 = vmul.f32 %v1957_v58, %v3969_v7  ;;  %v1993_v19 = vmul.f32 %v1991_v28, %v4657_v17  ;;  %v1994_v22 = vadd.f32 %v1992_v24, %v1988_v6  ;;  %v1942_v23 = vmul.f32 %v1941_v37, %v4140_v54 }
 0x4ab   : > { %v1979_v8 = vmul.f32 %v1977_v48, %v4032_v26  ;;  %v1982_v33 = vmul.f32 %v1981_v39, %v4644_v34  ;;  %v1998_v60 = vmul.f32 %v1997_v51, %v3960_v14  ;;  %v1964_v16 = vadd.f32 %v1962_v5, %v1958_v2 }
 0x4ac   : > { %v1983_v50 = vmul.f32 %v1981_v39, %v4655_v25  ;;  %v1995_v27 = vadd.f32 %v1993_v19, %v1989_v35  ;;  %v2002_v11 = vmul.f32 %v2001_v1, %v4647_v59  ;;  %v1938_v7 = vmul.f32 %v1937_v4, %v4073_v32  ;;  %v281_v19 = vld [vmem:[%s4491_s5] sm:$0x7f] }
 0x4ad   : > { %v1943_v17 = vmul.f32 %v1941_v37, %v4143_v49  ;;  %v1984_v62 = vadd.f32 %v1982_v33, %v1978_v38  ;;  %v1999_v54 = vmul.f32 %v1997_v51, %v3963_v30  ;;  %v1955_v26 = vadd.f32 %v1953_v10, %v1949_v20  ;;  %v282_v33 = vld [vmem:[%s4491_s5 + $0x8] sm:$0x7f] }
 0x4ae   : > { %v1965_v31 = vadd.f32 %v1963_v47, %v1959_v55  ;;  %v2003_v34 = vmul.f32 %v2001_v1, %v4658_v46  ;;  %v2024_v14 = vrot.slane %v1994_v22, 1  ;;  %v1939_v18 = vmul.f32 %v1937_v4, %v4076_v12 }
 0x4af   : > { %v1944_v25 = vadd.f32 %v1942_v23, %v1938_v7  ;;  %v1985_v43 = vadd.f32 %v1983_v50, %v1979_v8  ;;  %v2004_v15 = vadd.f32 %v2002_v11, %v1998_v60  ;;  %v2008_v59 = vrot.slane %v1954_v29, 1 }
 0x4b0   : > { %v2017_v45 = vrot.slane %v1975_v36, 1  ;;  %v2025_v0 = vrot.slane %v1995_v27, 1  ;;  %v1945_v9 = vadd.f32 %v1943_v17, %v1939_v18  ;;  %v2005_v32 = vadd.f32 %v2003_v34, %v1999_v54 }
 0x4b1   : > { %v2020_v53 = vadd.f32 %v2016_v3, %v1964_v16  ;;  %v2028_v49 = vadd.f32 %v2024_v14, %v1984_v62  ;;  %v2009_v63 = vrot.slane %v1955_v26, 1  ;;  %v2012_v52 = vadd.f32 %v2008_v59, %v1944_v25 }
 0x4b2   : > { %v2021_v30 = vadd.f32 %v2017_v45, %v1965_v31  ;;  %v2029_v40 = vadd.f32 %v2025_v0, %v1985_v43  ;;  %v2040_v13 = vrot.slane %v2004_v15, 2  ;;  %v2041_v28 = vrot.slane %v2005_v32, 2 }
 0x4b3   : > { %v2013_v46 = vadd.f32 %v2009_v63, %v1945_v9  ;;  %v2032_v44 = vrot.slane %v2020_v53, 2 }
 0x4b4   : > { %v2044_v12 = vadd.f32 %v2040_v13, %v2028_v49  ;;  %v2033_v20 = vrot.slane %v2021_v30, 2  ;;  %v2045_v48 = vadd.f32 %v2041_v28, %v2029_v40 }
 0x4b5   : > { %v2036_v61 = vadd.f32 %v2032_v44, %v2012_v52 }
 0x4b6   : > { %v2037_v10 = vadd.f32 %v2033_v20, %v2013_v46  ;;  %v2048_v29 = vrot.slane %v2044_v12, 4  ;;  %v2049_v3 = vrot.slane %v2045_v48, 4 }
 0x4b8   : > { %v2052_v2 = vadd.f32 %v2048_v29, %v2036_v61  ;;  %v2053_v35 = vadd.f32 %v2049_v3, %v2037_v10 }
 0x4ba   : > { %v2056_v51 = vrot.slane %v2052_v2, 5  ;;  %v2057_v22 = vrot.slane %v2053_v35, 5 }
 0x4bc   : > { %v2060_v31 = vmul.f32 %v2056_v51, %v281_v19 }
 0x4be   : > { %v2471_v49 = vrot.slane %v2060_v31, 1 }
 0x4c5   : > { %v2316_v56 = vpop.permute.xlu2 %2315 }
 0x4cd   : > { %v1922_v58 = vpop.permute.xlu2 %1921 }
 0x4df   : > { %v4420_v41 = vpop.permute.xlu1 %2313  ;;  %v1789_v21 = vpop.permute.xlu0 %1788 }
 0x4e0   : > { %v2318_v39 = vsel %vm2317_vm2, %v4420_v41, %v2316_v56  ;;  %v2319_v37 = vsel %vm2317_vm2, %v2316_v56, %v4420_v41  ;;  %v2183_v24 = vpop.permute.xlu2 %2182 }
 0x4e1   : > { %v2322_v38 = vrot.slane %v2318_v39, 3  ;;  %v2323_v1 = vrot.slane %v2319_v37, 3 }
 0x4e3   : > { %v2326_v54 = vmul.f32 %v2322_v38, %v281_v19  ;;  %v2327_v26 = vmul.f32 %v2323_v1, %v282_v33 }
 0x4e5   : > { %v2479_v45 = vrot.slane %v2326_v54, 1  ;;  %v2480_v0 = vrot.slane %v2327_v26, 1 }
 0x4e7   : > { %v1791_v42 = vpop.permute.xlu1 %1790  ;;  %v1924_v6 = vpop.permute.xlu0 %1923 }
 0x4e8   : > { %v1926_v4 = vsel %vm1925_vm4, %v1922_v58, %v1924_v6  ;;  %v1927_v55 = vsel %vm1925_vm4, %v1924_v6, %v1922_v58  ;;  %v1793_v41 = vsel %vm1792_vm5, %v1789_v21, %v1791_v42  ;;  %v1794_v56 = vsel %vm1792_vm5, %v1791_v42, %v1789_v21 }
 0x4e9   : > { %v1930_v11 = vrot.slane %v1927_v55, 6  ;;  %v1931_v7 = vrot.slane %v1926_v4, 6  ;;  %v1797_v34 = vrot.slane %v1794_v56, 7  ;;  %v2061_v21 = vmul.f32 %v2057_v22, %v282_v33 }
 0x4ea   : > { %v1798_v18 = vrot.slane %v1793_v41, 7 }
 0x4eb   : > { %v1934_v15 = vmul.f32 %v1930_v11, %v281_v19  ;;  %v1935_v59 = vmul.f32 %v1931_v7, %v282_v33  ;;  %v1801_v53 = vmul.f32 %v1797_v34, %v281_v19  ;;  %v2472_v63 = vrot.slane %v2061_v21, 1 }
 0x4ec   : > { %v1802_v52 = vmul.f32 %v1798_v18, %v282_v33 }
 0x4ed   : > { %v2475_v13 = vadd.f32 %v2471_v49, %v1934_v15  ;;  %v2476_v58 = vadd.f32 %v2472_v63, %v1935_v59  ;;  %v2463_v48 = vrot.slane %v1801_v53, 1  ;;  %v4674_v15 = vld [vmem:[#allocation10_spill] sm:$0xff]  ;;  %v4677_v53 = vld [vmem:[#allocation8_spill] sm:$0xff]  ;;  %v4678_v63 = vld [vmem:[#allocation7_spill] sm:$0xff] }
 0x4ee   : > { %v2464_v6 = vrot.slane %v1802_v52, 1 }
 0x4ef   : > { %v2487_v29 = vrot.slane %v2475_v13, 2  ;;  %v2488_v3 = vrot.slane %v2476_v58, 2  ;;  %v4680_v13 = vld [vmem:[#allocation12_spill] sm:$0xff] }
 0x4f1   : > { %v2181_v36 = vpop.permute.xlu1 %2180 }
 0x4f2   : > { %v2185_v5 = vsel %vm2184_vm3, %v2181_v36, %v2183_v24  ;;  %v2186_v47 = vsel %vm2184_vm3, %v2183_v24, %v2181_v36 }
 0x4f3   : > { %v2189_v60 = vrot.slane %v2185_v5, 4  ;;  %v2190_v16 = vrot.slane %v2186_v47, 4 }
 0x4f5   : > { %v2193_v25 = vmul.f32 %v2189_v60, %v281_v19  ;;  %v2194_v43 = vmul.f32 %v2190_v16, %v282_v33 }
 0x4f7   : > { %v2483_v30 = vadd.f32 %v2479_v45, %v2193_v25  ;;  %v2484_v40 = vadd.f32 %v2480_v0, %v2194_v43  ;;  %v4673_v25 = vld [vmem:[#allocation9_spill] sm:$0xff]  ;;  %v4675_v45 = vld [vmem:[#allocation6_spill] sm:$0xff] }
 0x503   : > { %v2447_v23 = vpop.permute.xlu0 %2446 }
 0x504   : > { %v1662_v46 = vpop.permute.xlu2 %1661 }
 0x50a   : > { %v2449_v8 = vpop.permute.xlu1 %2448 }
 0x50b   : > { %v2451_v50 = vsel %vm2450_vm6, %v2447_v23, %v2449_v8  ;;  %v2452_v27 = vsel %vm2450_vm6, %v2449_v8, %v2447_v23 }
 0x50c   : > { %v2455_v17 = vrot.slane %v2451_v50, 2  ;;  %v2456_v62 = vrot.slane %v2452_v27, 2 }
 0x50e   : > { %v2459_v42 = vmul.f32 %v2455_v17, %v281_v19  ;;  %v2460_v14 = vmul.f32 %v2456_v62, %v282_v33 }
 0x510   : > { %v2495_v9 = vrot.slane %v2459_v42, 2  ;;  %v2496_v32 = vrot.slane %v2460_v14, 2 }
 0x512   : > { %v2499_v44 = vadd.f32 %v2495_v9, %v2483_v30  ;;  %v2500_v28 = vadd.f32 %v2496_v32, %v2484_v40  ;;  %v4676_v9 = vld [vmem:[#allocation5_spill] sm:$0xff]  ;;  %v4679_v30 = vld [vmem:[#allocation11_spill] sm:$0xff] }
 0x514   : > { %v2503_v2 = vrot.slane %v2499_v44, 4  ;;  %v2504_v39 = vrot.slane %v2500_v28, 4 }
 0x515   : > { %v1664_v12 = vpop.permute.xlu0 %1663 }
 0x516   : > { %v1666_v20 = vsel %vm1665_vm7, %v1662_v46, %v1664_v12  ;;  %v1667_v61 = vsel %vm1665_vm7, %v1664_v12, %v1662_v46 }
 0x517   : > { %v1668_v36 = vmul.f32 %v1667_v61, %v281_v19  ;;  %v1669_v10 = vmul.f32 %v1666_v20, %v282_v33 }
 0x519   : > { %v2467_v37 = vadd.f32 %v2463_v48, %v1668_v36  ;;  %v2468_v35 = vadd.f32 %v2464_v6, %v1669_v10 }
 0x51b   : > { %v2491_v24 = vadd.f32 %v2487_v29, %v2467_v37  ;;  %v2492_v57 = vadd.f32 %v2488_v3, %v2468_v35 }
 0x51d   : > { %v2507_v51 = vadd.f32 %v2503_v2, %v2491_v24  ;;  %v2508_v5 = vadd.f32 %v2504_v39, %v2492_v57 }
 0x51f   : > { %v2744_v47 = vmul.f32 -1.442695, %v2507_v51  ;;  %v2745_v38 = vmul.f32 -1.442695, %v2508_v5 }
 0x521   : > { %2816 = vpow2.f32 %v2744_v47 }
 0x522   : > { %2818 = vpow2.f32 %v2745_v38 }
 0x527   : > { %v2817_v1 = vpop.eup %2816 }
 0x528   : > { %v2819_v4 = vpop.eup %2818  ;;  %v2515_v55 = vadd.f32 1.0, %v2817_v1 }
 0x529   : > { %v2516_v41 = vadd.f32 1.0, %v2819_v4 }
 0x52a   : > { %2820 = vrcp.f32 %v2515_v55  ;;  %v2528_v33 = vand.u32 2147483648, %v2515_v55  ;;  %v2526_v50 = vand.u32 2147483647, %v2515_v55  ;;  %vm2522_vm10 = vweird.f32 %v2515_v55 }
 0x52b   : > { %2822 = vrcp.f32 %v2516_v41  ;;  %v2543_v27 = vand.u32 2147483648, %v2516_v41  ;;  %v2541_v7 = vand.u32 2147483647, %v2516_v41  ;;  %vm2537_vm12 = vweird.f32 %v2516_v41 }
 0x52c   : > { %v2529_v62 = vor.u32 1.1754944e-38, %v2528_v33  ;;  %vm2527_vm13 = vcmp.eq.f32.partialorder %v2526_v50, 8.507059e+37 }
 0x52d   : > { %v2544_v31 = vor.u32 1.1754944e-38, %v2543_v27  ;;  %vm2542_vm15 = vcmp.eq.f32.partialorder %v2541_v7, 8.507059e+37 }
 0x530   : > { %v2821_v19 = vpop.eup %2820 }
 0x531   : > { %v2823_v56 = vpop.eup %2822  ;;  %v2518_v22 = vmul.f32 %v2821_v19, %v2515_v55  ;;  %vm2523_vm8 = vweird.f32 %v2821_v19 }
 0x532   : > { %v2533_v23 = vmul.f32 %v2823_v56, %v2516_v41  ;;  %vm2538_vm9 = vweird.f32 %v2823_v56  ;;  %vm2524_vm11 = vmor %vm2522_vm10, %vm2523_vm8 }
 0x533   : > { %v2519_v8 = vsub.f32 1.0, %v2518_v22  ;;  %vm2539_vm14 = vmor %vm2537_vm12, %vm2538_vm9 }
 0x534   : > { %v2534_v60 = vsub.f32 1.0, %v2533_v23 }
 0x535   : > { %v2520_v16 = vmul.f32 %v2821_v19, %v2519_v8 }
 0x536   : > { %v2535_v11 = vmul.f32 %v2823_v56, %v2534_v60 }
 0x537   : > { %v2521_v17 = vadd.f32 %v2821_v19, %v2520_v16 }
 0x538   : > { %v2536_v54 = vadd.f32 %v2823_v56, %v2535_v11 }
 0x539   : > { %v2525_v26 = vsel %vm2524_vm11, %v2821_v19, %v2521_v17 }
 0x53a   : > { %v2530_v34 = vsel %vm2527_vm13, %v2529_v62, %v2525_v26  ;;  %v2540_v21 = vsel %vm2539_vm14, %v2823_v56, %v2536_v54 }
 0x53b   : > { %v2545_v42 = vsel %vm2542_vm15, %v2544_v31, %v2540_v21  ;;  %v2547_v14 = vperm.slane %v2530_v34, 0 }
 0x53c   : > { %v2548_v18 = vperm.slane %v2545_v42, 0 }
 0x53d   : > { %v2549_v43 = vmul.f32 %v2547_v14, %v4673_v25  ;;  %v2551_v59 = vmul.f32 %v2547_v14, %v4674_v15  ;;  %v2553_v49 = vmul.f32 %v2547_v14, %v4677_v53  ;;  %v2555_v40 = vmul.f32 %v2547_v14, %v4679_v30 }
 0x53e   : > { %v2550_v0 = vmul.f32 %v2548_v18, %v4675_v45  ;;  %v2552_v32 = vmul.f32 %v2548_v18, %v4676_v9  ;;  %v2554_v52 = vmul.f32 %v2548_v18, %v4678_v63  ;;  %v2556_v58 = vmul.f32 %v2548_v18, %v4680_v13 }
 0x53f   : > { %2557 = vst [vmem:[%s265_s17] sm:$0xff] %v2549_v43 }
 0x540   : > { %2558 = vst [vmem:[%s265_s17 + $0x8] sm:$0xff] %v2550_v0 }
 0x541   : > { %2559 = vst [vmem:[%s265_s17 + $0x10] sm:$0xff] %v2551_v59 }
 0x542   : > { %2560 = vst [vmem:[%s265_s17 + $0x18] sm:$0xff] %v2552_v32 }
 0x543   : > { %2561 = vst [vmem:[%s265_s17 + $0x20] sm:$0xff] %v2553_v49 }
 0x544   : > { %2562 = vst [vmem:[%s265_s17 + $0x28] sm:$0xff] %v2554_v52 }
 0x545   : > { %2563 = vst [vmem:[%s265_s17 + $0x30] sm:$0xff] %v2555_v40 }
 0x546   : > { %2564 = vst [vmem:[%s265_s17 + $0x38] sm:$0xff] %v2556_v58 }
 0x547 PF: > { %s17_s21 = sadd.s32 1, %s2857_s21  }
 0x548   : > { %p14_p7 = scmp.ge.s32.totalorder %s17_s21, 4  }
 0x54a   :  { %16 = sbr.rel (!%p14_p7) target bundleno = 5 (0x5), region = 79 }
 0x54f   :  { %2586 = vsyncpa [#allocation3], 1 }
 0x550   :  { %2588 = vsyncpa [#allocation3 + $0x1], 1 }

</bundles_post_ra>
